<compile_context>
chip_gen: v5e
topology: v5e:2x2
jax: 0.10.0
libtpu: 0.0.40
codegen_flags: <defaults>
</compile_context>

<pallas_src>
import functools

import jax
import jax.numpy as jnp
from jax.experimental import pallas as pl
from jax.experimental.pallas import tpu as pltpu


LANE = 128          # lane width for feature padding
SUBLANE_BF16 = 16   # bf16 sublane packing -> batch padded to multiples of 16


def _round_up(n: int, m: int) -> int:
    return ((n + m - 1) // m) * m


# ----------------------------------------------------------------------------
# Fused Pallas kernel: chained Linear (+ReLU) layers, activations stay in VMEM
# refs = (x_ref, w_0, ..., w_{L-1}, bias_ref, o_ref)
# ----------------------------------------------------------------------------
def _fused_mlp_kernel(*refs, relu_flags, out_widths):
    x_ref = refs[0]
    o_ref = refs[-1]
    b_ref = refs[-2]                                  # [L, N_pad_max] f32
    w_refs = refs[1:-2]                               # [K_pad_l, N_pad_l] bf16
    n_layers = len(relu_flags)

    # Per-tile f32 -> bf16 cast in-kernel (avoids a separate wrapper pass).
    x = x_ref[...].astype(jnp.bfloat16)               # [TB, K0_pad]
    for li in range(n_layers):
        npad = out_widths[li]
        y = jnp.dot(x, w_refs[li][...],               # MXU, f32 accumulate
                    preferred_element_type=jnp.float32)
        y = y + b_ref[li:li + 1, :npad]               # [1, npad] broadcast
        if relu_flags[li]:
            y = jnp.maximum(y, 0.0)
        # Keep last layer in f32 for the output store; bf16 between layers.
        x = y.astype(jnp.bfloat16) if li + 1 < n_layers else y
    o_ref[...] = x.astype(o_ref.dtype)


# ----------------------------------------------------------------------------
# Parameter construction (PyTorch nn.Linear layout, mirrors module __init__)
# ----------------------------------------------------------------------------
def make_autoencoder_params(key, input_dim, output_dim, layer_number):
    def linear_params(key, in_dim, out_dim):
        kw, kb = jax.random.split(key)
        scale = 1.0 / jnp.sqrt(jnp.float32(in_dim))
        w = jax.random.uniform(kw, (out_dim, in_dim), jnp.float32, -scale, scale)
        b = jax.random.uniform(kb, (out_dim,), jnp.float32, -scale, scale)
        return w, b

    params = {"encoder": [], "decoder": []}
    keys = iter(jax.random.split(key, 2 * (layer_number + 1)))

    # Encoder: input_dim -> input_dim/2 -> ... -> output_dim
    cur = input_dim
    for _ in range(layer_number):
        nxt = int(cur / 2)
        params["encoder"].append(linear_params(next(keys), cur, nxt))
        cur = nxt
    params["encoder_out"] = linear_params(next(keys), cur, output_dim)

    # Decoder: output_dim -> output_dim*2 -> ... -> input_dim
    cur = output_dim
    for _ in range(layer_number):
        nxt = int(cur * 2)
        params["decoder"].append(linear_params(next(keys), cur, nxt))
        cur = nxt
    params["decoder_out"] = linear_params(next(keys), cur, input_dim)
    return params


# ----------------------------------------------------------------------------
# One-time packing: pre-transpose [out,in] -> [in,out], zero-pad to 128 lanes,
# store weights in bf16, and pack all biases into one [L, N_pad_max] f32 array.
# ----------------------------------------------------------------------------
def pack_autoencoder_params(params):
    layers = []
    for w, b in params["encoder"]:
        layers.append((w, b, True))
    w, b = params["encoder_out"]
    layers.append((w, b, False))
    for w, b in params["decoder"]:
        layers.append((w, b, True))
    w, b = params["decoder_out"]
    layers.append((w, b, False))

    packed_w, bias_rows, relu_flags, out_widths = [], [], [], []
    for w, b, relu in layers:
        out_dim, in_dim = w.shape
        in_pad = _round_up(in_dim, LANE)
        out_pad = _round_up(out_dim, LANE)
        wt = (jnp.zeros((in_pad, out_pad), jnp.float32)
              .at[:in_dim, :out_dim].set(jnp.transpose(w)))
        packed_w.append(wt.astype(jnp.bfloat16))
        bias_rows.append(b)
        relu_flags.append(relu)
        out_widths.append(out_pad)

    n_max = max(out_widths)
    bias = jnp.zeros((len(layers), n_max), jnp.float32)
    for li, b in enumerate(bias_rows):
        bias = bias.at[li, :b.shape[0]].set(b)

    final_dim = params["decoder_out"][0].shape[0]   # == input_dim
    return packed_w, bias, tuple(relu_flags), tuple(out_widths), int(final_dim)


def _resident_spec(shape, resident):
    """Full-array, grid-invariant VMEM block; single-buffered when supported."""
    idx = lambda i: (0, 0)
    if resident:
        return pl.BlockSpec(shape, idx, pipeline_mode=pl.Buffered(1))
    return pl.BlockSpec(shape, idx)


# ----------------------------------------------------------------------------
# Forward: single fused pallas_call over the whole autoencoder, batch grid axis
# ----------------------------------------------------------------------------
@functools.partial(
    jax.jit,
    static_argnames=("relu_flags", "out_widths", "final_dim", "block_b",
                     "resident_weights"))
def autoencoder_forward(x, packed_w, bias, relu_flags, out_widths, final_dim,
                        block_b=256, resident_weights=True):
    B, K = x.shape
    K0p = packed_w[0].shape[0]
    Nlp = packed_w[-1].shape[1]

    # Batch tile: >=256 rows per MXU pass when the batch allows.
    TB = min(block_b, _round_up(B, SUBLANE_BF16))
    Bp = _round_up(B, TB)

    # Only the ragged batch tail / non-128-multiple feature dim pays a pad
    # (no-op for the shapes used here).
    pad_b, pad_k = Bp - B, K0p - K
    if pad_b or pad_k:
        x = jnp.pad(x, ((0, pad_b), (0, pad_k)))

    kernel = functools.partial(_fused_mlp_kernel,
                               relu_flags=relu_flags, out_widths=out_widths)

    in_specs = [pl.BlockSpec((TB, K0p), lambda i: (i, 0))]
    inputs = [x]
    for w in packed_w:
        in_specs.append(_resident_spec(w.shape, resident_weights))
        inputs.append(w)
    in_specs.append(_resident_spec(bias.shape, resident_weights))
    inputs.append(bias)

    # Advisory cost for XLA scheduling around the custom call.
    flops = 2 * Bp * sum(w.shape[0] * w.shape[1] for w in packed_w)
    bytes_accessed = (x.size * x.dtype.itemsize
                      + Bp * Nlp * 4
                      + sum(w.size * w.dtype.itemsize for w in packed_w)
                      + bias.size * bias.dtype.itemsize)
    cost = pl.CostEstimate(flops=int(flops), transcendentals=0,
                           bytes_accessed=int(bytes_accessed))

    # Scoped VMEM sized to the actual resident footprint (v5e default is 16MiB).
    weight_bytes = (sum(w.size * w.dtype.itemsize for w in packed_w)
                    + bias.size * bias.dtype.itemsize)
    act_bytes = 2 * TB * (K0p * x.dtype.itemsize + Nlp * 4)   # double-buffered x/out tiles
    work_bytes = 4 * TB * max(out_widths) * 4                 # live intermediates headroom
    vmem_limit = int(min(2 * weight_bytes + act_bytes + work_bytes + (8 << 20),
                         96 << 20))

    out = pl.pallas_call(
        kernel,
        out_shape=jax.ShapeDtypeStruct((Bp, Nlp), jnp.float32),
        grid=(Bp // TB,),
        in_specs=in_specs,
        out_specs=pl.BlockSpec((TB, Nlp), lambda i: (i, 0)),
        compiler_params=pltpu.CompilerParams(
            dimension_semantics=("parallel",),
            vmem_limit_bytes=vmem_limit,
        ),
        cost_estimate=cost,
    )(*inputs)

    return out[:B, :final_dim]


def run_autoencoder(x, packed_w, bias, relu_flags, out_widths, final_dim):
    """Prefer single-buffered resident weights; fall back if the installed
    jax rejects pipeline_mode=pl.Buffered(1) on a grid BlockSpec."""
    try:
        out = autoencoder_forward(x, packed_w, bias, relu_flags, out_widths,
                                  final_dim, resident_weights=True)
        return jax.block_until_ready(out)
    except Exception:
        out = autoencoder_forward(x, packed_w, bias, relu_flags, out_widths,
                                  final_dim, resident_weights=False)
        return jax.block_until_ready(out)


# ----------------------------------------------------------------------------
# References
# ----------------------------------------------------------------------------
def autoencoder_reference(x, params):
    """Pure-f32 nn.Linear semantics (y = x @ W.T + b)."""
    h = x
    for w, b in params["encoder"]:
        h = jnp.maximum(h @ w.T + b, 0.0)
    w, b = params["encoder_out"]
    h = h @ w.T + b
    for w, b in params["decoder"]:
        h = jnp.maximum(h @ w.T + b, 0.0)
    w, b = params["decoder_out"]
    return h @ w.T + b


def autoencoder_reference_bf16(x, packed_w, bias, relu_flags, out_widths, final_dim):
    """Mirrors the kernel's quantization exactly (bf16 operands, f32 accumulate)."""
    k0p = packed_w[0].shape[0]
    a = x
    if a.shape[1] != k0p:
        a = jnp.pad(a, ((0, 0), (0, k0p - a.shape[1])))
    a = a.astype(jnp.bfloat16)
    n_layers = len(relu_flags)
    for li in range(n_layers):
        y = jnp.dot(a, packed_w[li], preferred_element_type=jnp.float32)
        y = y + bias[li:li + 1, :out_widths[li]]
        if relu_flags[li]:
            y = jnp.maximum(y, 0.0)
        a = y.astype(jnp.bfloat16) if li + 1 < n_layers else y
    return a[:, :final_dim]


# ----------------------------------------------------------------------------
if __name__ == "__main__":
    # Config consistent with AutoencoderModelArgs (input_dim scaled down).
    INPUT_DIM = 256
    OUTPUT_DIM = 2
    LAYER_NUMBER = 1
    BATCH = 512        # enough rows for 256-row MXU tiles and a 2-step batch grid

    key = jax.random.PRNGKey(0)
    kx, kp = jax.random.split(key)
    x = jax.random.normal(kx, (BATCH, INPUT_DIM), dtype=jnp.float32)
    params = make_autoencoder_params(kp, INPUT_DIM, OUTPUT_DIM, LAYER_NUMBER)

    # Pre-transpose + lane-pad + bf16-cast ONCE (not per forward).
    packed_w, bias, relu_flags, out_widths, final_dim = pack_autoencoder_params(params)

    out = run_autoencoder(x, packed_w, bias, relu_flags, out_widths, final_dim)
    assert out.shape == (BATCH, INPUT_DIM), out.shape

    # Tight check vs. a reference that mirrors the kernel's bf16/f32 math.
    ref_bf = autoencoder_reference_bf16(x, packed_w, bias, relu_flags,
                                        out_widths, final_dim)
    assert jnp.allclose(out, ref_bf, atol=5e-3, rtol=5e-3), "mismatch vs bf16 reference"

    # Looser check vs. the full-f32 PyTorch-semantics reference (bf16 operands).
    ref32 = autoencoder_reference(x, params)
    assert jnp.allclose(out, ref32, atol=5e-2, rtol=5e-2), "mismatch vs f32 reference"

    print("KERNEL_OK")
</pallas_src>

<mosaic_0001>
module attributes {stable_mosaic.version = 11 : i64} {
  func.func @_fused_mlp_kernel(%arg0: i32, %arg1: memref<256x256xf32, #tpu.memory_space<vmem>>, %arg2: memref<256x128xbf16, #tpu.memory_space<vmem>>, %arg3: memref<128x128xbf16, #tpu.memory_space<vmem>>, %arg4: memref<128x128xbf16, #tpu.memory_space<vmem>>, %arg5: memref<128x256xbf16, #tpu.memory_space<vmem>>, %arg6: memref<4x256xf32, #tpu.memory_space<vmem>>, %arg7: memref<256x256xf32, #tpu.memory_space<vmem>>) attributes {dimension_semantics = [#tpu.dimension_semantics<parallel>], iteration_bounds = array<i64: 2>, scalar_prefetch = 0 : i64, scratch_operands = 0 : i64, tpu.core_type = #tpu.core_type<tc>, window_params = [{transform_indices = @transform_0, window_bounds = array<i64: 256, 256>}, {pipeline_mode = #tpu.pipeline_mode<synchronous>, transform_indices = @transform_1, window_bounds = array<i64: 256, 128>}, {pipeline_mode = #tpu.pipeline_mode<synchronous>, transform_indices = @transform_2, window_bounds = array<i64: 128, 128>}, {pipeline_mode = #tpu.pipeline_mode<synchronous>, transform_indices = @transform_3, window_bounds = array<i64: 128, 128>}, {pipeline_mode = #tpu.pipeline_mode<synchronous>, transform_indices = @transform_4, window_bounds = array<i64: 128, 256>}, {pipeline_mode = #tpu.pipeline_mode<synchronous>, transform_indices = @transform_5, window_bounds = array<i64: 4, 256>}, {transform_indices = @transform_6, window_bounds = array<i64: 256, 256>}]} {
    %c0 = arith.constant 0 : index
    %c0_0 = arith.constant 0 : index
    %0 = vector.load %arg1[%c0, %c0_0] : memref<256x256xf32, #tpu.memory_space<vmem>>, vector<256x256xf32>
    %1 = arith.truncf %0 : vector<256x256xf32> to vector<256x256xbf16>
    %c0_1 = arith.constant 0 : index
    %c0_2 = arith.constant 0 : index
    %2 = vector.load %arg2[%c0_1, %c0_2] : memref<256x128xbf16, #tpu.memory_space<vmem>>, vector<256x128xbf16>
    %cst = arith.constant dense<0.000000e+00> : vector<256x128xf32>
    %3 = tpu.matmul %1, %2, %cst {dimension_numbers = #tpu.dot_dimension_numbers<[1], [0], [0], [1], [0, 0, 1, 1], [], []>} : vector<256x256xbf16>, vector<256x128xbf16>, vector<256x128xf32> -> vector<256x128xf32>
    %c0_3 = arith.constant 0 : index
    %c0_4 = arith.constant 0 : index
    %4 = vector.load %arg6[%c0_3, %c0_4] : memref<4x256xf32, #tpu.memory_space<vmem>>, vector<1x128xf32>
    %5 = vector.broadcast %4 : vector<1x128xf32> to vector<256x128xf32>
    %6 = arith.addf %3, %5 : vector<256x128xf32>
    %cst_5 = arith.constant 0.000000e+00 : f32
    %7 = vector.broadcast %cst_5 : f32 to vector<256x128xf32>
    %8 = arith.maximumf %6, %7 : vector<256x128xf32>
    %9 = arith.truncf %8 : vector<256x128xf32> to vector<256x128xbf16>
    %c0_6 = arith.constant 0 : index
    %c0_7 = arith.constant 0 : index
    %10 = vector.load %arg3[%c0_6, %c0_7] : memref<128x128xbf16, #tpu.memory_space<vmem>>, vector<128x128xbf16>
    %cst_8 = arith.constant dense<0.000000e+00> : vector<256x128xf32>
    %11 = tpu.matmul %9, %10, %cst_8 {dimension_numbers = #tpu.dot_dimension_numbers<[1], [0], [0], [1], [0, 0, 1, 1], [], []>} : vector<256x128xbf16>, vector<128x128xbf16>, vector<256x128xf32> -> vector<256x128xf32>
    %c1 = arith.constant 1 : index
    %c0_9 = arith.constant 0 : index
    %12 = vector.load %arg6[%c1, %c0_9] : memref<4x256xf32, #tpu.memory_space<vmem>>, vector<1x128xf32>
    %13 = vector.broadcast %12 : vector<1x128xf32> to vector<256x128xf32>
    %14 = arith.addf %11, %13 : vector<256x128xf32>
    %15 = arith.truncf %14 : vector<256x128xf32> to vector<256x128xbf16>
    %c0_10 = arith.constant 0 : index
    %c0_11 = arith.constant 0 : index
    %16 = vector.load %arg4[%c0_10, %c0_11] : memref<128x128xbf16, #tpu.memory_space<vmem>>, vector<128x128xbf16>
    %cst_12 = arith.constant dense<0.000000e+00> : vector<256x128xf32>
    %17 = tpu.matmul %15, %16, %cst_12 {dimension_numbers = #tpu.dot_dimension_numbers<[1], [0], [0], [1], [0, 0, 1, 1], [], []>} : vector<256x128xbf16>, vector<128x128xbf16>, vector<256x128xf32> -> vector<256x128xf32>
    %c2 = arith.constant 2 : index
    %c0_13 = arith.constant 0 : index
    %18 = vector.load %arg6[%c2, %c0_13] : memref<4x256xf32, #tpu.memory_space<vmem>>, vector<1x128xf32>
    %19 = vector.broadcast %18 : vector<1x128xf32> to vector<256x128xf32>
    %20 = arith.addf %17, %19 : vector<256x128xf32>
    %cst_14 = arith.constant 0.000000e+00 : f32
    %21 = vector.broadcast %cst_14 : f32 to vector<256x128xf32>
    %22 = arith.maximumf %20, %21 : vector<256x128xf32>
    %23 = arith.truncf %22 : vector<256x128xf32> to vector<256x128xbf16>
    %c0_15 = arith.constant 0 : index
    %c0_16 = arith.constant 0 : index
    %24 = vector.load %arg5[%c0_15, %c0_16] : memref<128x256xbf16, #tpu.memory_space<vmem>>, vector<128x256xbf16>
    %cst_17 = arith.constant dense<0.000000e+00> : vector<256x256xf32>
    %25 = tpu.matmul %23, %24, %cst_17 {dimension_numbers = #tpu.dot_dimension_numbers<[1], [0], [0], [1], [0, 0, 1, 1], [], []>} : vector<256x128xbf16>, vector<128x256xbf16>, vector<256x256xf32> -> vector<256x256xf32>
    %c3 = arith.constant 3 : index
    %c0_18 = arith.constant 0 : index
    %26 = vector.load %arg6[%c3, %c0_18] : memref<4x256xf32, #tpu.memory_space<vmem>>, vector<1x256xf32>
    %27 = vector.broadcast %26 : vector<1x256xf32> to vector<256x256xf32>
    %28 = arith.addf %25, %27 : vector<256x256xf32>
    %c0_19 = arith.constant 0 : index
    %c0_20 = arith.constant 0 : index
    %29 = vector.load %arg7[%c0_19, %c0_20] : memref<256x256xf32, #tpu.memory_space<vmem>>, vector<256x256xf32>
    tpu.vector_store %arg7[%c0_19, %c0_20], %28 {strides = array<i32>} : memref<256x256xf32, #tpu.memory_space<vmem>>, vector<256x256xf32>,
    return
  }
  func.func @transform_0(%arg0: i32) -> (i32, i32) {
    %c0_i32 = arith.constant 0 : i32
    %c0_i32_0 = arith.constant 0 : i32
    return %arg0, %c0_i32 : i32, i32
  }
  func.func @transform_1(%arg0: i32) -> (i32, i32) {
    %c0_i32 = arith.constant 0 : i32
    %c0_i32_0 = arith.constant 0 : i32
    %c0_i32_1 = arith.constant 0 : i32
    return %c0_i32, %c0_i32_0 : i32, i32
  }
  func.func @transform_2(%arg0: i32) -> (i32, i32) {
    %c0_i32 = arith.constant 0 : i32
    %c0_i32_0 = arith.constant 0 : i32
    %c0_i32_1 = arith.constant 0 : i32
    return %c0_i32, %c0_i32_0 : i32, i32
  }
  func.func @transform_3(%arg0: i32) -> (i32, i32) {
    %c0_i32 = arith.constant 0 : i32
    %c0_i32_0 = arith.constant 0 : i32
    %c0_i32_1 = arith.constant 0 : i32
    return %c0_i32, %c0_i32_0 : i32, i32
  }
  func.func @transform_4(%arg0: i32) -> (i32, i32) {
    %c0_i32 = arith.constant 0 : i32
    %c0_i32_0 = arith.constant 0 : i32
    %c0_i32_1 = arith.constant 0 : i32
    return %c0_i32, %c0_i32_0 : i32, i32
  }
  func.func @transform_5(%arg0: i32) -> (i32, i32) {
    %c0_i32 = arith.constant 0 : i32
    %c0_i32_0 = arith.constant 0 : i32
    %c0_i32_1 = arith.constant 0 : i32
    return %c0_i32, %c0_i32_0 : i32, i32
  }
  func.func @transform_6(%arg0: i32) -> (i32, i32) {
    %c0_i32 = arith.constant 0 : i32
    %c0_i32_0 = arith.constant 0 : i32
    return %arg0, %c0_i32 : i32, i32
  }
}

module attributes {stable_mosaic.version = 11 : i64} {
  func.func @_fused_mlp_kernel(%arg0: i32, %arg1: memref<256x256xf32, #tpu.memory_space<vmem>>, %arg2: memref<256x128xbf16, #tpu.memory_space<vmem>>, %arg3: memref<128x128xbf16, #tpu.memory_space<vmem>>, %arg4: memref<128x128xbf16, #tpu.memory_space<vmem>>, %arg5: memref<128x256xbf16, #tpu.memory_space<vmem>>, %arg6: memref<4x256xf32, #tpu.memory_space<vmem>>, %arg7: memref<256x256xf32, #tpu.memory_space<vmem>>) attributes {dimension_semantics = [#tpu.dimension_semantics<parallel>], iteration_bounds = array<i64: 2>, scalar_prefetch = 0 : i64, scratch_operands = 0 : i64, tpu.core_type = #tpu.core_type<tc>, window_params = [{transform_indices = @transform_0, window_bounds = array<i64: 256, 256>}, {pipeline_mode = #tpu.pipeline_mode<synchronous>, transform_indices = @transform_1, window_bounds = array<i64: 256, 128>}, {pipeline_mode = #tpu.pipeline_mode<synchronous>, transform_indices = @transform_2, window_bounds = array<i64: 128, 128>}, {pipeline_mode = #tpu.pipeline_mode<synchronous>, transform_indices = @transform_3, window_bounds = array<i64: 128, 128>}, {pipeline_mode = #tpu.pipeline_mode<synchronous>, transform_indices = @transform_4, window_bounds = array<i64: 128, 256>}, {pipeline_mode = #tpu.pipeline_mode<synchronous>, transform_indices = @transform_5, window_bounds = array<i64: 4, 256>}, {transform_indices = @transform_6, window_bounds = array<i64: 256, 256>}]} {
    %c0 = arith.constant 0 : index
    %c0_0 = arith.constant 0 : index
    %0 = vector.load %arg1[%c0, %c0_0] : memref<256x256xf32, #tpu.memory_space<vmem>>, vector<256x256xf32>
    %1 = arith.truncf %0 : vector<256x256xf32> to vector<256x256xbf16>
    %c0_1 = arith.constant 0 : index
    %c0_2 = arith.constant 0 : index
    %2 = vector.load %arg2[%c0_1, %c0_2] : memref<256x128xbf16, #tpu.memory_space<vmem>>, vector<256x128xbf16>
    %cst = arith.constant dense<0.000000e+00> : vector<256x128xf32>
    %3 = tpu.matmul %1, %2, %cst {dimension_numbers = #tpu.dot_dimension_numbers<[1], [0], [0], [1], [0, 0, 1, 1], [], []>} : vector<256x256xbf16>, vector<256x128xbf16>, vector<256x128xf32> -> vector<256x128xf32>
    %c0_3 = arith.constant 0 : index
    %c0_4 = arith.constant 0 : index
    %4 = vector.load %arg6[%c0_3, %c0_4] : memref<4x256xf32, #tpu.memory_space<vmem>>, vector<1x128xf32>
    %5 = vector.broadcast %4 : vector<1x128xf32> to vector<256x128xf32>
    %6 = arith.addf %3, %5 : vector<256x128xf32>
    %cst_5 = arith.constant 0.000000e+00 : f32
    %7 = vector.broadcast %cst_5 : f32 to vector<256x128xf32>
    %8 = arith.maximumf %6, %7 : vector<256x128xf32>
    %9 = arith.truncf %8 : vector<256x128xf32> to vector<256x128xbf16>
    %c0_6 = arith.constant 0 : index
    %c0_7 = arith.constant 0 : index
    %10 = vector.load %arg3[%c0_6, %c0_7] : memref<128x128xbf16, #tpu.memory_space<vmem>>, vector<128x128xbf16>
    %cst_8 = arith.constant dense<0.000000e+00> : vector<256x128xf32>
    %11 = tpu.matmul %9, %10, %cst_8 {dimension_numbers = #tpu.dot_dimension_numbers<[1], [0], [0], [1], [0, 0, 1, 1], [], []>} : vector<256x128xbf16>, vector<128x128xbf16>, vector<256x128xf32> -> vector<256x128xf32>
    %c1 = arith.constant 1 : index
    %c0_9 = arith.constant 0 : index
    %12 = vector.load %arg6[%c1, %c0_9] : memref<4x256xf32, #tpu.memory_space<vmem>>, vector<1x128xf32>
    %13 = vector.broadcast %12 : vector<1x128xf32> to vector<256x128xf32>
    %14 = arith.addf %11, %13 : vector<256x128xf32>
    %15 = arith.truncf %14 : vector<256x128xf32> to vector<256x128xbf16>
    %c0_10 = arith.constant 0 : index
    %c0_11 = arith.constant 0 : index
    %16 = vector.load %arg4[%c0_10, %c0_11] : memref<128x128xbf16, #tpu.memory_space<vmem>>, vector<128x128xbf16>
    %cst_12 = arith.constant dense<0.000000e+00> : vector<256x128xf32>
    %17 = tpu.matmul %15, %16, %cst_12 {dimension_numbers = #tpu.dot_dimension_numbers<[1], [0], [0], [1], [0, 0, 1, 1], [], []>} : vector<256x128xbf16>, vector<128x128xbf16>, vector<256x128xf32> -> vector<256x128xf32>
    %c2 = arith.constant 2 : index
    %c0_13 = arith.constant 0 : index
    %18 = vector.load %arg6[%c2, %c0_13] : memref<4x256xf32, #tpu.memory_space<vmem>>, vector<1x128xf32>
    %19 = vector.broadcast %18 : vector<1x128xf32> to vector<256x128xf32>
    %20 = arith.addf %17, %19 : vector<256x128xf32>
    %cst_14 = arith.constant 0.000000e+00 : f32
    %21 = vector.broadcast %cst_14 : f32 to vector<256x128xf32>
    %22 = arith.maximumf %20, %21 : vector<256x128xf32>
    %23 = arith.truncf %22 : vector<256x128xf32> to vector<256x128xbf16>
    %c0_15 = arith.constant 0 : index
    %c0_16 = arith.constant 0 : index
    %24 = vector.load %arg5[%c0_15, %c0_16] : memref<128x256xbf16, #tpu.memory_space<vmem>>, vector<128x256xbf16>
    %cst_17 = arith.constant dense<0.000000e+00> : vector<256x256xf32>
    %25 = tpu.matmul %23, %24, %cst_17 {dimension_numbers = #tpu.dot_dimension_numbers<[1], [0], [0], [1], [0, 0, 1, 1], [], []>} : vector<256x128xbf16>, vector<128x256xbf16>, vector<256x256xf32> -> vector<256x256xf32>
    %c3 = arith.constant 3 : index
    %c0_18 = arith.constant 0 : index
    %26 = vector.load %arg6[%c3, %c0_18] : memref<4x256xf32, #tpu.memory_space<vmem>>, vector<1x256xf32>
    %27 = vector.broadcast %26 : vector<1x256xf32> to vector<256x256xf32>
    %28 = arith.addf %25, %27 : vector<256x256xf32>
    %c0_19 = arith.constant 0 : index
    %c0_20 = arith.constant 0 : index
    %29 = vector.load %arg7[%c0_19, %c0_20] : memref<256x256xf32, #tpu.memory_space<vmem>>, vector<256x256xf32>
    tpu.vector_store %arg7[%c0_19, %c0_20], %28 {strides = array<i32>} : memref<256x256xf32, #tpu.memory_space<vmem>>, vector<256x256xf32>,
    return
  }
  func.func @transform_0(%arg0: i32) -> (i32, i32) {
    %c0_i32 = arith.constant 0 : i32
    %c0_i32_0 = arith.constant 0 : i32
    return %arg0, %c0_i32 : i32, i32
  }
  func.func @transform_1(%arg0: i32) -> (i32, i32) {
    %c0_i32 = arith.constant 0 : i32
    %c0_i32_0 = arith.constant 0 : i32
    %c0_i32_1 = arith.constant 0 : i32
    return %c0_i32, %c0_i32_0 : i32, i32
  }
  func.func @transform_2(%arg0: i32) -> (i32, i32) {
    %c0_i32 = arith.constant 0 : i32
    %c0_i32_0 = arith.constant 0 : i32
    %c0_i32_1 = arith.constant 0 : i32
    return %c0_i32, %c0_i32_0 : i32, i32
  }
  func.func @transform_3(%arg0: i32) -> (i32, i32) {
    %c0_i32 = arith.constant 0 : i32
    %c0_i32_0 = arith.constant 0 : i32
    %c0_i32_1 = arith.constant 0 : i32
    return %c0_i32, %c0_i32_0 : i32, i32
  }
  func.func @transform_4(%arg0: i32) -> (i32, i32) {
    %c0_i32 = arith.constant 0 : i32
    %c0_i32_0 = arith.constant 0 : i32
    %c0_i32_1 = arith.constant 0 : i32
    return %c0_i32, %c0_i32_0 : i32, i32
  }
  func.func @transform_5(%arg0: i32) -> (i32, i32) {
    %c0_i32 = arith.constant 0 : i32
    %c0_i32_0 = arith.constant 0 : i32
    %c0_i32_1 = arith.constant 0 : i32
    return %c0_i32, %c0_i32_0 : i32, i32
  }
  func.func @transform_6(%arg0: i32) -> (i32, i32) {
    %c0_i32 = arith.constant 0 : i32
    %c0_i32_0 = arith.constant 0 : i32
    return %arg0, %c0_i32 : i32, i32
  }
}

</mosaic_0001>

<bundles_post_ra>
// kernel: autoencoder_forward.1
= control target key start
LH: loop header
LB: loop body
LE: loop exit
PB: predicated region body
PF: predicated region fallthrough
CT: control target
= control target key end

     0   :  { %s2898_s0 = inlined_call_operand.hbm [shape: f32[512,256], index: 0, kind: input, shape index: {}]   ;;  %s2899_s1 = inlined_call_operand.hbm [shape: bf16[256,128], index: 1, kind: input, shape index: {}]   ;;  %s2900_s2 = inlined_call_operand.hbm [shape: bf16[128,128], index: 2, kind: input, shape index: {}]   ;;  %s2901_s3 = inlined_call_operand.hbm [shape: bf16[128,128], index: 3, kind: input, shape index: {}]   ;;  %s2902_s4 = inlined_call_operand.hbm [shape: bf16[128,256], index: 4, kind: input, shape index: {}]   ;;  %s2903_s5 = inlined_call_operand.hbm [shape: f32[4,256], index: 5, kind: input, shape index: {}]   ;;  %s2904_s6 = inlined_call_operand.hbm [shape: f32[512,256], index: 6, kind: output, shape index: {}]  }
   0x1   :  { %2905 = sst [smem:[#allocation19_spill]] %s2899_s1 }
   0x2   :  { %11 = vsyncpa [#allocation3], 0 }
   0x3   :  { %13 = vsyncpa [#allocation3 + $0x1], 0 }
   0x4   :  { %14 = vsyncpa [#allocation6], 0 }
   0x5   :  { %15 = vsyncpa [#allocation9], 0 }
   0x6   :  { %16 = vsyncpa [#allocation12], 0 }
   0x7   :  { %17 = vsyncpa [#allocation4], 0 }
   0x8   :  { %19 = vsyncpa [#allocation4 + $0x1], 0  ;;  %s2367_s21 = smov 0   ;;  %s2369_s22 = smov 0  }
   0x9   :  { %s2371_s23 = smov 0   ;;  %s2373_s24 = smov 0  }
   0xa LB: > { %s2906_s1 = sld [smem:[#allocation19_spill]]  ;;  %s2391_s28 = sadd.s32 4294967295, %s2317_s24   ;;  %s2317_s24 = sphi %s2373_s24, %s2918_s24   ;;  %s2313_s23 = sphi %s2371_s23, %s2917_s23   ;;  %s2309_s22 = sphi %s2369_s22, %s2916_s22   ;;  %s2305_s21 = sphi %s2367_s21, %s2915_s21  }
   0xb   : > { %p1666_p0 = scmp.ge.s32.totalorder %s2317_s24, 1  ;;  %p46_p1 = scmp.eq.s32.totalorder %s2391_s28, 0 }
   0xc   : > { %p187_p2 = scmp.lt.s32.totalorder %s2317_s24, 3  ;;  %s2319_s30 = smov [#allocation5]  }
   0xd   : > { %s200_s7 = sshll.u32 %s2319_s30, 4  ;;  %s226_s10 = sshll.u32 %s2901_s3, 4  ;;  %s201_s7 = int_to_ptr.vmem [resolvable:$true] %s200_s7  ;;  %s227_s10 = int_to_ptr.hbm [resolvable:$true] %s226_s10 }
   0xe   : > { %p2396_p3 = pnand %p1666_p0, %p187_p2  ;;  %s212_s14 = sshll.u32 %s2900_s2, 4  ;;  %s213_s14 = int_to_ptr.hbm [resolvable:$true] %s212_s14 }
   0xf   : > { %s2320_s15 = smov [#allocation8]   ;;  %s2321_s17 = smov 64  }
  0x10   : > { %s198_s27 = sshll.u32 %s2906_s1, 4  ;;  %p1975_p4 = pneg %p2396_p3  ;;  %s199_s27 = int_to_ptr.hbm [resolvable:$true] %s198_s27 }
  0x11   : > { %s228_s16 = sshll.u32 %s2320_s15, 4  ;;  %s2322_s18 = smov 4   ;;  %s229_s16 = int_to_ptr.vmem [resolvable:$true] %s228_s16 }
  0x12   : > { %p2408_p6 = pnand %p1975_p4, %p46_p1  ;;  %s240_s25 = sshll.u32 %s2902_s4, 4  ;;  %s241_s25 = int_to_ptr.hbm [resolvable:$true] %s240_s25 }
  0x13   : > { %s2323_s26 = smov [#allocation7]   ;;  %s2325_s8 = smov 128  }
  0x14   : > { %1978 = dma.hbm_to_vmem [thread:$0]  (!%p2408_p6), %s199_s27, 2048, %s201_s7, [#allocation6], %s2321_s17, %s2321_s17, %s2322_s18  }
  0x15   : > { %1984 = dma.hbm_to_vmem [thread:$0]  (!%p2408_p6), %s227_s10, 1024, %s229_s16, [#allocation9], %s2321_s17, %s2321_s17, %s2322_s18  }
  0x16   : > { %s214_s30 = sshll.u32 %s2323_s26, 4  ;;  %s2324_s27 = smov [#allocation10]   ;;  %s215_s30 = int_to_ptr.vmem [resolvable:$true] %s214_s30 }
  0x17   : > { %1981 = dma.hbm_to_vmem [thread:$0]  (!%p2408_p6), %s213_s14, 1024, %s215_s30, [#allocation6], %s2321_s17, %s2321_s17, %s2322_s18  }
  0x18   : > { %s242_s7 = sshll.u32 %s2324_s27, 4  ;;  %s2326_s9 = smov 8   ;;  %s243_s7 = int_to_ptr.vmem [resolvable:$true] %s242_s7 }
  0x19   : > { %1987 = dma.hbm_to_vmem [thread:$0]  (!%p2408_p6), %s241_s25, 2048, %s243_s7, [#allocation9], %s2325_s8, %s2325_s8, %s2326_s9  }
  0x1a   : > { %s255_s13 = sshll.u32 %s2903_s5, 4  ;;  %s2327_s14 = smov [#allocation11]   ;;  %s256_s13 = int_to_ptr.hbm [resolvable:$true] %s255_s13 }
  0x1b   : > { %s257_s15 = sshll.u32 %s2327_s14, 4  ;;  %s1665_s16 = sadd.s32 4294967294, %s2317_s24   ;;  %s258_s15 = int_to_ptr.vmem [resolvable:$true] %s257_s15 }
  0x1c   : > { %1990 = dma.hbm_to_vmem [thread:$0]  (!%p2408_p6), %s256_s13, 128, %s258_s15, [#allocation12]  }
  0x1d   : > { %s2433_s17 = sadd.s32 1, %s2317_s24   ;;  %s32_s18 = sadd.s32 1, %s2313_s23 }
  0x1e   : > { %s29_s19 = ssub.s32 %s2317_s24, %s2433_s17  ;;  %p39_p7 = scmp.ne.s32.totalorder %s2313_s23, %s2309_s22 }
  0x1f   : > { %p30_p8 = scmp.eq.s32.totalorder %s29_s19, 0  ;;  %p40_p9 = scmp.eq.s32.totalorder %s2317_s24, 0 }
  0x20   : > { %p45_p10 = scmp.ne.s32.totalorder %s2309_s22, %s2305_s21  ;;  %p174_p11 = scmp.eq.s32.totalorder %s2391_s28, 1 }
  0x21   : > { %s2445_s20 = scalar_select %p30_p8, %s2313_s23, %s32_s18  }
  0x22   : > { %p2447_p12 = por %p40_p9, %p39_p7  ;;  %p2453_p13 = por %p46_p1, %p45_p10 }
  0x23   : > { %p2457_p0 = por %p174_p11, %p39_p7  ;;  %p180_p2 = scmp.eq.s32.totalorder %s1665_s16, 1 }
  0x24   : > { %p2004_p4 = scmp.lt.s32.totalorder %s2317_s24, 2  ;;  %s268_s30 = sand.u32 1, %s2313_s23  }
  0x25   : > { %p2463_p6 = por %p180_p2, %p45_p10  ;;  %s1673_s7 = sshll.u32 %s268_s30, 9 }
  0x26   : > { %s1884_s8 = sshll.u32 %s2317_s24, 9  ;;  %s272_s14 = scalar_lea.vmem [#allocation2], %s1673_s7 }
  0x27   : > { %s278_s12 = scalar_lea.hbm %s2898_s0, %s1884_s8  ;;  %s281_s15 = sshll.u32 %s272_s14, 4  ;;  %s282_s15 = int_to_ptr.vmem [resolvable:$true] %s281_s15 }
  0x28   : > { %s279_s13 = sshll.u32 %s278_s12, 4  ;;  %p2473_p7 = pnand %p2004_p4, %p2447_p12  ;;  %s280_s13 = int_to_ptr.hbm [resolvable:$true] %s279_s13 }
  0x29   : > { %s269_s18 = scalar_lea.sflag [#allocation3], %s268_s30  ;;  %s2209_s19 = sshra.s32 %s280_s13, 4  ;;  %s2210_s19 = int_to_ptr.hbm [resolvable:$true] %s2209_s19 }
  0x2a   : > { %s2211_s1 = scalar_lea.hbm %s2210_s19, 512  ;;  %p2213_p9 = pneg %p2473_p7 }
  0x2b   : > { %p2212_p8 = scmp.ne.s32.totalorder %s2210_s19, %s2211_s1  ;;  %s2216_s9 = scalar_lea.hbm %s2898_s0, 1024 }
  0x2c   : > { %p2217_p12 = scmp.lt.s32.totalorder %s2210_s19, %s2898_s0  ;;  %p2218_p2 = scmp.lt.s32.totalorder %s2216_s9, %s2211_s1 }
  0x2d   : > { %p2214_p10 = pnand %p2213_p9, %p2212_p8 }
  0x2e   : > { %p2219_p4 = por %p2218_p2, %p2217_p12 }
  0x2f   : > { %p2215_p11 = pneg %p2214_p10 }
  0x31   : > { %p2220_p5 = pnand %p2219_p4, %p2215_p11 }
  0x33   : > { %2223 = shalt.err (!%p2220_p5)
}
  0x34   : > { %s2328_s30 = smov 256   ;;  %s2329_s12 = smov 16  }
  0x35   : > { %1994 = dma.hbm_to_vmem [thread:$0]  (!%p2473_p7), %s280_s13, 8192, %s282_s15, %s269_s18, %s2328_s30, %s2328_s30, %s2329_s12  }
  0x36   : > { %293 = sbr.rel (%p2396_p3) target bundleno = 911 (0x38f), region = 44  ;;  %s2490_s14 = sand.u32 (!%p2396_p3), 1, %s2309_s22  }
  0x37   : > { %s1678_s19 = sshll.u32 (!%p2396_p3), %s2490_s14, 9  ;;  %s296_s1 = scalar_lea.sflag (!%p2396_p3), [#allocation3], %s2490_s14 }
  0x38   : > { %s2496_s8 = scalar_lea.vmem (!%p2396_p3), [#allocation2], %s1678_s19 }
  0x3b   : > { %2284 = dma.done.wait (%p2453_p13), %s296_s1, 8192  }
  0x3c   : > { %2286 = vsyncadd (%p2453_p13), %s296_s1, 4294959104 }
  0x3d   : > { %2288 = dma.done.wait (%p46_p1), [#allocation6], 3072  }
  0x3e   : > { %2290 = vsyncadd (%p46_p1), [#allocation6], 4294964224 }
  0x3f   : > { %2292 = dma.done.wait (%p46_p1), [#allocation9], 3072  }
  0x40   : > { %2294 = vsyncadd (%p46_p1), [#allocation9], 4294964224 }
  0x41   : > { %2296 = dma.done.wait (%p46_p1), [#allocation12], 128  }
  0x42   : > { %2298 = vsyncadd (%p46_p1), [#allocation12], 4294967168  ;;  %v1892_v0 = vld [vmem:[#allocation5 + $0x38] sm:$0xff]  ;;  %v1891_v2 = vld [vmem:[#allocation5 + $0x30] sm:$0xff]  ;;  %s2722_s29 = scalar_lea.vmem [#allocation13], %s1678_s19  ;;  %s1934_s11 = sshll.u32 %s2391_s28, 9 }
  0x43   : > { %v1900_v1 = vld [vmem:[#allocation5 + $0x78] sm:$0xff]  ;;  %582 = vmatpush.bf16.msra.mxu0 %v1892_v0  ;;  %v1899_v3 = vld [vmem:[#allocation5 + $0x70] sm:$0xff]  ;;  %1935 = vmatpush.bf16.msra.mxu2 %v1892_v0  ;;  %v1890_v4 = vld [vmem:[#allocation5 + $0x28] sm:$0xff]  ;;  %s1540_s16 = scalar_lea.hbm %s2904_s6, %s1934_s11  ;;  %s1541_s18 = sshll.u32 %s2722_s29, 4  ;;  %s1542_s18 = int_to_ptr.vmem [resolvable:$true] %s1541_s18 }
  0x44   : > { %671 = vmatpush.bf16.msra.mxu1 %v1900_v1  ;;  %1943 = vmatpush.bf16.msra.mxu3 %v1900_v1  ;;  %v1898_v5 = vld [vmem:[#allocation5 + $0x68] sm:$0xff]  ;;  %v1889_v6 = vld [vmem:[#allocation5 + $0x20] sm:$0xff]  ;;  %v1888_v8 = vld [vmem:[#allocation5 + $0x18] sm:$0xff]  ;;  %s1543_s7 = sshll.u32 %s1540_s16, 4  ;;  %s1528_s28 = scalar_lea.sflag [#allocation4], %s2490_s14  ;;  %s1544_s7 = int_to_ptr.hbm [resolvable:$true] %s1543_s7 }
  0x45   : > { %v1897_v7 = vld [vmem:[#allocation5 + $0x60] sm:$0xff]  ;;  %v1896_v9 = vld [vmem:[#allocation5 + $0x58] sm:$0xff]  ;;  %v1887_v10 = vld [vmem:[#allocation5 + $0x10] sm:$0xff]  ;;  %s2253_s9 = sshra.s32 %s1544_s7, 4  ;;  %s2259_s12 = scalar_lea.hbm %s2904_s6, 1024  ;;  %s2254_s9 = int_to_ptr.hbm [resolvable:$true] %s2253_s9 }
  0x46   : > { %v1895_v11 = vld [vmem:[#allocation5 + $0x50] sm:$0xff]  ;;  %v1886_v12 = vld [vmem:[#allocation5 + $0x8] sm:$0xff]  ;;  %v1885_v14 = vld [vmem:[#allocation5] sm:$0xff]  ;;  %s2255_s10 = scalar_lea.hbm %s2254_s9, 512  ;;  %p2260_p13 = scmp.lt.s32.totalorder %s2254_s9, %s2904_s6 }
  0x47   : > { %583 = vmatpush.bf16.msra.mxu0 %v1891_v2  ;;  %1936 = vmatpush.bf16.msra.mxu2 %v1891_v2  ;;  %v1894_v13 = vld [vmem:[#allocation5 + $0x48] sm:$0xff]  ;;  %v1893_v15 = vld [vmem:[#allocation5 + $0x40] sm:$0xff]  ;;  %v358_v17 = vld [vmem:[%s2496_s8 + $0x10] sm:$0xff]  ;;  %p2256_p1 = scmp.ne.s32.totalorder %s2254_s9, %s2255_s10  ;;  %p2261_p7 = scmp.lt.s32.totalorder %s2259_s12, %s2255_s10 }
  0x48   : > { %672 = vmatpush.bf16.msra.mxu1 %v1899_v3  ;;  %1944 = vmatpush.bf16.msra.mxu3 %v1899_v3  ;;  %v356_v16 = vld [vmem:[%s2496_s8] sm:$0xff]  ;;  %v357_v18 = vld [vmem:[%s2496_s8 + $0x8] sm:$0xff]  ;;  %v359_v19 = vld [vmem:[%s2496_s8 + $0x18] sm:$0xff] }
  0x49   : > { %v388_v20 = vld [vmem:[%s2496_s8 + $0x100] sm:$0xff]  ;;  %v390_v21 = vld [vmem:[%s2496_s8 + $0x110] sm:$0xff]  ;;  %v389_v22 = vld [vmem:[%s2496_s8 + $0x108] sm:$0xff]  ;;  %v420_v25 = vpack.c.bf16 %v358_v17, %v356_v16  ;;  %v421_v26 = vpack.c.bf16 %v359_v19, %v357_v18  ;;  %p2257_p3 = pnand %p2256_p1, %p2457_p0  ;;  %p2262_p8 = por %p2261_p7, %p2260_p13 }
  0x4a   : > { %v391_v23 = vld [vmem:[%s2496_s8 + $0x118] sm:$0xff]  ;;  %v436_v27 = vpack.c.bf16 %v390_v21, %v388_v20  ;;  %v1907_v29 = vld [vmem:[#allocation7 + $0x30] sm:$0xff]  ;;  %v1906_v30 = vld [vmem:[#allocation7 + $0x28] sm:$0xff] }
  0x4b   : > { %584 = vmatpush.bf16.msra.mxu0 %v1890_v4  ;;  %1937 = vmatpush.bf16.msra.mxu2 %v1890_v4  ;;  %v1908_v24 = vld [vmem:[#allocation7 + $0x38] sm:$0xff]  ;;  %v437_v28 = vpack.c.bf16 %v391_v23, %v389_v22  ;;  %v360_v31 = vld [vmem:[%s2496_s8 + $0x20] sm:$0xff]  ;;  %v362_v32 = vld [vmem:[%s2496_s8 + $0x30] sm:$0xff]  ;;  %p2258_p5 = pneg %p2257_p3 }
  0x4c   : > { %673 = vmatpush.bf16.msra.mxu1 %v1898_v5  ;;  %1945 = vmatpush.bf16.msra.mxu3 %v1898_v5  ;;  %v361_v33 = vld [vmem:[%s2496_s8 + $0x28] sm:$0xff]  ;;  %v363_v34 = vld [vmem:[%s2496_s8 + $0x38] sm:$0xff]  ;;  %v392_v35 = vld [vmem:[%s2496_s8 + $0x120] sm:$0xff]  ;;  %v422_v39 = vpack.c.bf16 %v362_v32, %v360_v31 }
  0x4d   : > { %v394_v36 = vld [vmem:[%s2496_s8 + $0x130] sm:$0xff]  ;;  %v393_v37 = vld [vmem:[%s2496_s8 + $0x128] sm:$0xff]  ;;  %v395_v38 = vld [vmem:[%s2496_s8 + $0x138] sm:$0xff]  ;;  %v423_v40 = vpack.c.bf16 %v363_v34, %v361_v33  ;;  %p2263_p9 = pnand %p2262_p8, %p2258_p5 }
  0x4e   : > { %v438_v41 = vpack.c.bf16 %v394_v36, %v392_v35  ;;  %v439_v42 = vpack.c.bf16 %v395_v38, %v393_v37  ;;  %v1905_v43 = vld [vmem:[#allocation7 + $0x20] sm:$0xff]  ;;  %v366_v45 = vld [vmem:[%s2496_s8 + $0x50] sm:$0xff]  ;;  %v365_v46 = vld [vmem:[%s2496_s8 + $0x48] sm:$0xff] }
  0x4f   : > { %585 = vmatpush.bf16.msra.mxu0 %v1889_v6  ;;  %1938 = vmatpush.bf16.msra.mxu2 %v1889_v6  ;;  %v364_v44 = vld [vmem:[%s2496_s8 + $0x40] sm:$0xff]  ;;  %v367_v47 = vld [vmem:[%s2496_s8 + $0x58] sm:$0xff]  ;;  %v398_v49 = vld [vmem:[%s2496_s8 + $0x150] sm:$0xff] }
  0x50   : > { %674 = vmatpush.bf16.msra.mxu1 %v1897_v7  ;;  %1946 = vmatpush.bf16.msra.mxu3 %v1897_v7  ;;  %v396_v48 = vld [vmem:[%s2496_s8 + $0x140] sm:$0xff]  ;;  %v397_v50 = vld [vmem:[%s2496_s8 + $0x148] sm:$0xff]  ;;  %v399_v51 = vld [vmem:[%s2496_s8 + $0x158] sm:$0xff]  ;;  %v424_v52 = vpack.c.bf16 %v366_v45, %v364_v44  ;;  %v425_v53 = vpack.c.bf16 %v367_v47, %v365_v46 }
  0x51   : > { %v440_v54 = vpack.c.bf16 %v398_v49, %v396_v48  ;;  %v441_v55 = vpack.c.bf16 %v399_v51, %v397_v50  ;;  %v1904_v56 = vld [vmem:[#allocation7 + $0x18] sm:$0xff]  ;;  %v368_v57 = vld [vmem:[%s2496_s8 + $0x60] sm:$0xff]  ;;  %v370_v58 = vld [vmem:[%s2496_s8 + $0x70] sm:$0xff] }
  0x52   : > { %v369_v59 = vld [vmem:[%s2496_s8 + $0x68] sm:$0xff]  ;;  %v371_v60 = vld [vmem:[%s2496_s8 + $0x78] sm:$0xff]  ;;  %v400_v61 = vld [vmem:[%s2496_s8 + $0x160] sm:$0xff]  ;;  %v426_v1 = vpack.c.bf16 %v370_v58, %v368_v57 }
  0x53   : > { %586 = vmatpush.bf16.msra.mxu0 %v1888_v8  ;;  %1939 = vmatpush.bf16.msra.mxu2 %v1888_v8  ;;  %v402_v62 = vld [vmem:[%s2496_s8 + $0x170] sm:$0xff]  ;;  %v401_v63 = vld [vmem:[%s2496_s8 + $0x168] sm:$0xff]  ;;  %v403_v0 = vld [vmem:[%s2496_s8 + $0x178] sm:$0xff]  ;;  %v427_v2 = vpack.c.bf16 %v371_v60, %v369_v59 }
  0x54   : > { %675 = vmatpush.bf16.msra.mxu1 %v1896_v9  ;;  %1947 = vmatpush.bf16.msra.mxu3 %v1896_v9  ;;  %v442_v3 = vpack.c.bf16 %v402_v62, %v400_v61  ;;  %v443_v4 = vpack.c.bf16 %v403_v0, %v401_v63  ;;  %v1903_v5 = vld [vmem:[#allocation7 + $0x10] sm:$0xff]  ;;  %v372_v6 = vld [vmem:[%s2496_s8 + $0x80] sm:$0xff]  ;;  %v373_v8 = vld [vmem:[%s2496_s8 + $0x88] sm:$0xff] }
  0x55   : > { %v374_v7 = vld [vmem:[%s2496_s8 + $0x90] sm:$0xff]  ;;  %v375_v9 = vld [vmem:[%s2496_s8 + $0x98] sm:$0xff]  ;;  %v1902_v18 = vld [vmem:[#allocation7 + $0x8] sm:$0xff] }
  0x56   : > { %v376_v19 = vld [vmem:[%s2496_s8 + $0xa0] sm:$0xff]  ;;  %v378_v20 = vld [vmem:[%s2496_s8 + $0xb0] sm:$0xff]  ;;  %v377_v21 = vld [vmem:[%s2496_s8 + $0xa8] sm:$0xff] }
  0x57   : > { %587 = vmatpush.bf16.msra.mxu0 %v1887_v10  ;;  %1940 = vmatpush.bf16.msra.mxu2 %v1887_v10  ;;  %v404_v10 = vld [vmem:[%s2496_s8 + $0x180] sm:$0xff]  ;;  %v379_v22 = vld [vmem:[%s2496_s8 + $0xb8] sm:$0xff]  ;;  %v382_v32 = vld [vmem:[%s2496_s8 + $0xd0] sm:$0xff] }
  0x58   : > { %676 = vmatpush.bf16.msra.mxu1 %v1895_v11  ;;  %1948 = vmatpush.bf16.msra.mxu3 %v1895_v11  ;;  %v406_v11 = vld [vmem:[%s2496_s8 + $0x190] sm:$0xff]  ;;  %v408_v23 = vld [vmem:[%s2496_s8 + $0x1a0] sm:$0xff]  ;;  %v381_v33 = vld [vmem:[%s2496_s8 + $0xc8] sm:$0xff] }
  0x59   : > { %v444_v16 = vpack.c.bf16 %v406_v11, %v404_v10  ;;  %v380_v31 = vld [vmem:[%s2496_s8 + $0xc0] sm:$0xff]  ;;  %v383_v34 = vld [vmem:[%s2496_s8 + $0xd8] sm:$0xff]  ;;  %v414_v36 = vld [vmem:[%s2496_s8 + $0x1d0] sm:$0xff] }
  0x5a   : > { %v412_v35 = vld [vmem:[%s2496_s8 + $0x1c0] sm:$0xff]  ;;  %v413_v37 = vld [vmem:[%s2496_s8 + $0x1c8] sm:$0xff]  ;;  %v415_v38 = vld [vmem:[%s2496_s8 + $0x1d8] sm:$0xff] }
  0x5b   : > { %588 = vmatpush.bf16.msra.mxu0 %v1886_v12  ;;  %1941 = vmatpush.bf16.msra.mxu2 %v1886_v12  ;;  %v405_v12 = vld [vmem:[%s2496_s8 + $0x188] sm:$0xff]  ;;  %v384_v44 = vld [vmem:[%s2496_s8 + $0xe0] sm:$0xff]  ;;  %v386_v45 = vld [vmem:[%s2496_s8 + $0xf0] sm:$0xff] }
  0x5c   : > { %677 = vmatpush.bf16.msra.mxu1 %v1894_v13  ;;  %1949 = vmatpush.bf16.msra.mxu3 %v1894_v13  ;;  %v407_v13 = vld [vmem:[%s2496_s8 + $0x198] sm:$0xff]  ;;  %v385_v46 = vld [vmem:[%s2496_s8 + $0xe8] sm:$0xff]  ;;  %v416_v48 = vld [vmem:[%s2496_s8 + $0x1e0] sm:$0xff] }
  0x5d   : > { %v445_v17 = vpack.c.bf16 %v407_v13, %v405_v12  ;;  %v387_v47 = vld [vmem:[%s2496_s8 + $0xf8] sm:$0xff]  ;;  %v418_v49 = vld [vmem:[%s2496_s8 + $0x1f0] sm:$0xff]  ;;  %v417_v50 = vld [vmem:[%s2496_s8 + $0x1e8] sm:$0xff] }
  0x5e   : > { %v419_v51 = vld [vmem:[%s2496_s8 + $0x1f8] sm:$0xff]  ;;  %v2578_v58 = vld [vmem:[#allocation11] ss:$0 sm:$0xff]  ;;  %v1915_v10 = vld [vmem:[#allocation8 + $0x30] sm:$0xff] }
  0x5f   : > { %589 = vmatpush.bf16.msra.mxu0 %v1885_v14  ;;  %1942 = vmatpush.bf16.msra.mxu2 %v1885_v14  ;;  %v428_v14 = vpack.c.bf16 %v374_v7, %v372_v6  ;;  %v1916_v60 = vld [vmem:[#allocation8 + $0x38] sm:$0xff] }
  0x60   : > { %678 = vmatpush.bf16.msra.mxu1 %v1893_v15  ;;  %1950 = vmatpush.bf16.msra.mxu3 %v1893_v15  ;;  %v429_v15 = vpack.c.bf16 %v375_v9, %v373_v8 }
  0x62   : > { %590 = vmatmul.bf16.vlgmr.msra.gmra.mxu0 %v420_v25  ;;  %630 = vmatmul.bf16.vlgmr.msra.gmra.mxu2 %v436_v27  ;;  %v409_v25 = vld [vmem:[%s2496_s8 + $0x1a8] sm:$0xff]  ;;  %v430_v27 = vpack.c.bf16 %v378_v20, %v376_v19 }
  0x63   : > { %874 = vmatpush.bf16.msrb.mxu2 %v1908_v24  ;;  %679 = vmatmul.bf16.vlgmr.msra.gmra.mxu1 %v421_v26  ;;  %v410_v24 = vld [vmem:[%s2496_s8 + $0x1b0] sm:$0xff]  ;;  %v411_v26 = vld [vmem:[%s2496_s8 + $0x1b8] sm:$0xff] }
  0x64   : > { %719 = vmatmul.bf16.vlgmr.msra.gmra.mxu3 %v437_v28  ;;  %v431_v28 = vpack.c.bf16 %v379_v22, %v377_v21 }
  0x65   : > { %1045 = vmatpush.bf16.msrb.mxu3 %v1916_v60 }
  0x67   : > { %875 = vmatpush.bf16.msrb.mxu2 %v1907_v29  ;;  %v446_v29 = vpack.c.bf16 %v410_v24, %v408_v23  ;;  %v1914_v24 = vld [vmem:[#allocation8 + $0x28] sm:$0xff] }
  0x69   : > { %1046 = vmatpush.bf16.msrb.mxu3 %v1915_v10 }
  0x6b   : > { %876 = vmatpush.bf16.msrb.mxu2 %v1906_v30  ;;  %v447_v30 = vpack.c.bf16 %v411_v26, %v409_v25 }
  0x6d   : > { %1047 = vmatpush.bf16.msrb.mxu3 %v1914_v24 }
  0x6f   : > { %877 = vmatpush.bf16.msrb.mxu2 %v1905_v43  ;;  %v1901_v43 = vld [vmem:[#allocation7] sm:$0xff] }
  0x72   : > { %595 = vmatmul.bf16.gmra.mxu0 %v422_v39  ;;  %635 = vmatmul.bf16.gmra.mxu2 %v438_v41  ;;  %v432_v39 = vpack.c.bf16 %v382_v32, %v380_v31  ;;  %v448_v41 = vpack.c.bf16 %v414_v36, %v412_v35 }
  0x73   : > { %684 = vmatmul.bf16.gmra.mxu1 %v423_v40  ;;  %878 = vmatpush.bf16.msrb.mxu2 %v1904_v56  ;;  %v433_v40 = vpack.c.bf16 %v383_v34, %v381_v33 }
  0x74   : > { %724 = vmatmul.bf16.gmra.mxu3 %v439_v42  ;;  %v449_v42 = vpack.c.bf16 %v415_v38, %v413_v37  ;;  %v1913_v38 = vld [vmem:[#allocation8 + $0x20] sm:$0xff] }
  0x75   : > { %1048 = vmatpush.bf16.msrb.mxu3 %v1913_v38 }
  0x77   : > { %879 = vmatpush.bf16.msrb.mxu2 %v1903_v5 }
  0x7b   : > { %880 = vmatpush.bf16.msrb.mxu2 %v1902_v18 }
  0x7f   : > { %881 = vmatpush.bf16.msrb.mxu2 %v1901_v43 }
  0x82   : > { %600 = vmatmul.bf16.gmra.mxu0 %v424_v52  ;;  %640 = vmatmul.bf16.gmra.mxu2 %v440_v54  ;;  %v434_v52 = vpack.c.bf16 %v386_v45, %v384_v44  ;;  %v450_v54 = vpack.c.bf16 %v418_v49, %v416_v48 }
  0x83   : > { %689 = vmatmul.bf16.gmra.mxu1 %v425_v53  ;;  %v435_v53 = vpack.c.bf16 %v387_v47, %v385_v46 }
  0x84   : > { %729 = vmatmul.bf16.gmra.mxu3 %v441_v55  ;;  %v451_v55 = vpack.c.bf16 %v419_v51, %v417_v50 }
  0x92   : > { %605 = vmatmul.bf16.gmra.mxu0 %v426_v1  ;;  %645 = vmatmul.bf16.gmra.mxu2 %v442_v3 }
  0x93   : > { %694 = vmatmul.bf16.gmra.mxu1 %v427_v2 }
  0x94   : > { %734 = vmatmul.bf16.gmra.mxu3 %v443_v4 }
  0xa2   : > { %610 = vmatmul.bf16.gmra.mxu0 %v428_v14  ;;  %650 = vmatmul.bf16.gmra.mxu2 %v444_v16 }
  0xa3   : > { %699 = vmatmul.bf16.gmra.mxu1 %v429_v15 }
  0xa4   : > { %739 = vmatmul.bf16.gmra.mxu3 %v445_v17 }
  0xb2   : > { %615 = vmatmul.bf16.gmra.mxu0 %v430_v27  ;;  %655 = vmatmul.bf16.gmra.mxu2 %v446_v29 }
  0xb3   : > { %704 = vmatmul.bf16.gmra.mxu1 %v431_v28 }
  0xb4   : > { %744 = vmatmul.bf16.gmra.mxu3 %v447_v30 }
  0xc2   : > { %620 = vmatmul.bf16.gmra.mxu0 %v432_v39  ;;  %660 = vmatmul.bf16.gmra.mxu2 %v448_v41 }
  0xc3   : > { %709 = vmatmul.bf16.gmra.mxu1 %v433_v40 }
  0xc4   : > { %749 = vmatmul.bf16.gmra.mxu3 %v449_v42 }
  0xd2   : > { %625 = vmatmul.bf16.gmra.mxu0 %v434_v52  ;;  %665 = vmatmul.bf16.gmra.mxu2 %v450_v54  ;;  %v1912_v52 = vld [vmem:[#allocation8 + $0x18] sm:$0xff] }
  0xd3   : > { %714 = vmatmul.bf16.gmra.mxu1 %v435_v53  ;;  %1049 = vmatpush.bf16.msrb.mxu3 %v1912_v52 }
  0xd4   : > { %754 = vmatmul.bf16.gmra.mxu3 %v451_v55 }
  0xdf   : > { %v591_v56 = vpop.f32.mrf.mxu0 }
  0xe0   : > { %v680_v57 = vpop.f32.mrf.mxu1  ;;  %v592_v59 = vadd.f32 %v2578_v58, %v591_v56 }
  0xe2   : > { %v681_v0 = vadd.f32 %v680_v57, %v592_v59 }
  0xe4   : > { %v760_v3 = vmax.f32 %v681_v0, 0.0 }
  0xe5   : > { %v2581_v61 = vpop.f32.mrf.mxu2 }
  0xe7   : > { %v593_v62 = vpop.f32.mrf.mxu0 }
  0xe8   : > { %v682_v63 = vpop.f32.mrf.mxu1  ;;  %v594_v1 = vadd.f32 %v2578_v58, %v593_v62 }
  0xea   : > { %v683_v2 = vadd.f32 %v682_v63, %v594_v1 }
  0xec   : > { %v761_v4 = vmax.f32 %v683_v2, 0.0 }
  0xed   : > { %v2584_v6 = vpop.f32.mrf.mxu2 }
  0xee   : > { %v792_v5 = vpack.c.bf16 %v761_v4, %v760_v3  ;;  %v1911_v4 = vld [vmem:[#allocation8 + $0x10] sm:$0xff] }
  0xef   : > { %v596_v7 = vpop.f32.mrf.mxu0  ;;  %1050 = vmatpush.bf16.msrb.mxu3 %v1911_v4  ;;  %v1932_v4 = vld [vmem:[#allocation10 + $0x74] sm:$0xf0] }
  0xf0   : > { %v685_v8 = vpop.f32.mrf.mxu1  ;;  %882 = vmatmul.bf16.vlgmr.msrb.gmra.mxu2 %v792_v5  ;;  %v597_v9 = vadd.f32 %v2578_v58, %v596_v7 }
  0xf2   : > { %v686_v14 = vadd.f32 %v685_v8, %v597_v9 }
  0xf4   : > { %v762_v17 = vmax.f32 %v686_v14, 0.0 }
  0xf5   : > { %v2587_v11 = vpop.f32.mrf.mxu2 }
  0xf7   : > { %v598_v12 = vpop.f32.mrf.mxu0 }
  0xf8   : > { %v687_v13 = vpop.f32.mrf.mxu1  ;;  %v599_v15 = vadd.f32 %v2578_v58, %v598_v12 }
  0xfa   : > { %v688_v16 = vadd.f32 %v687_v13, %v599_v15  ;;  %v720_v13 = vpop.f32.mrf.mxu3 }
  0xfc   : > { %v763_v18 = vmax.f32 %v688_v16, 0.0 }
  0xfd   : > { %v2590_v20 = vpop.f32.mrf.mxu2 }
  0xfe   : > { %v793_v19 = vpack.c.bf16 %v763_v18, %v762_v17 }
  0xff   : > { %v601_v21 = vpop.f32.mrf.mxu0 }
 0x100   : > { %v690_v22 = vpop.f32.mrf.mxu1  ;;  %887 = vmatmul.bf16.gmra.mxu2 %v793_v19  ;;  %v602_v23 = vadd.f32 %v2578_v58, %v601_v21  ;;  %v1910_v19 = vld [vmem:[#allocation8 + $0x8] sm:$0xff] }
 0x101   : > { %1051 = vmatpush.bf16.msrb.mxu3 %v1910_v19 }
 0x102   : > { %v691_v28 = vadd.f32 %v690_v22, %v602_v23  ;;  %v722_v23 = vpop.f32.mrf.mxu3 }
 0x104   : > { %v764_v31 = vmax.f32 %v691_v28, 0.0 }
 0x105   : > { %v2593_v25 = vpop.f32.mrf.mxu2 }
 0x107   : > { %v603_v26 = vpop.f32.mrf.mxu0 }
 0x108   : > { %v692_v27 = vpop.f32.mrf.mxu1  ;;  %v604_v29 = vadd.f32 %v2578_v58, %v603_v26 }
 0x10a   : > { %v693_v30 = vadd.f32 %v692_v27, %v604_v29  ;;  %v725_v38 = vpop.f32.mrf.mxu3 }
 0x10c   : > { %v765_v32 = vmax.f32 %v693_v30, 0.0 }
 0x10d   : > { %v2596_v34 = vpop.f32.mrf.mxu2 }
 0x10e   : > { %v794_v33 = vpack.c.bf16 %v765_v32, %v764_v31 }
 0x10f   : > { %v606_v35 = vpop.f32.mrf.mxu0 }
 0x110   : > { %v695_v36 = vpop.f32.mrf.mxu1  ;;  %892 = vmatmul.bf16.gmra.mxu2 %v794_v33  ;;  %v607_v37 = vadd.f32 %v2578_v58, %v606_v35 }
 0x112   : > { %v696_v42 = vadd.f32 %v695_v36, %v607_v37  ;;  %v1909_v37 = vld [vmem:[#allocation8] sm:$0xff] }
 0x113   : > { %1052 = vmatpush.bf16.msrb.mxu3 %v1909_v37 }
 0x114   : > { %v766_v45 = vmax.f32 %v696_v42, 0.0 }
 0x115   : > { %v2599_v39 = vpop.f32.mrf.mxu2 }
 0x117   : > { %v608_v40 = vpop.f32.mrf.mxu0 }
 0x118   : > { %v697_v41 = vpop.f32.mrf.mxu1  ;;  %v609_v43 = vadd.f32 %v2578_v58, %v608_v40 }
 0x11a   : > { %v698_v44 = vadd.f32 %v697_v41, %v609_v43 }
 0x11c   : > { %v767_v46 = vmax.f32 %v698_v44, 0.0 }
 0x11d   : > { %v2602_v48 = vpop.f32.mrf.mxu2 }
 0x11e   : > { %v795_v47 = vpack.c.bf16 %v767_v46, %v766_v45 }
 0x11f   : > { %v611_v49 = vpop.f32.mrf.mxu0 }
 0x120   : > { %v700_v50 = vpop.f32.mrf.mxu1  ;;  %897 = vmatmul.bf16.gmra.mxu2 %v795_v47  ;;  %v612_v51 = vadd.f32 %v2578_v58, %v611_v49  ;;  %v727_v47 = vpop.f32.mrf.mxu3 }
 0x122   : > { %v701_v56 = vadd.f32 %v700_v50, %v612_v51 }
 0x124   : > { %v768_v60 = vmax.f32 %v701_v56, 0.0 }
 0x125   : > { %v2605_v53 = vpop.f32.mrf.mxu2 }
 0x127   : > { %v613_v54 = vpop.f32.mrf.mxu0 }
 0x128   : > { %v702_v55 = vpop.f32.mrf.mxu1  ;;  %v614_v57 = vadd.f32 %v2578_v58, %v613_v54  ;;  %v632_v54 = vadd.f32 %v2578_v58, %v2581_v61  ;;  %v730_v56 = vpop.f32.mrf.mxu3  ;;  %v637_v61 = vadd.f32 %v2578_v58, %v2587_v11 }
 0x12a   : > { %v703_v59 = vadd.f32 %v702_v55, %v614_v57  ;;  %v634_v55 = vadd.f32 %v2578_v58, %v2584_v6  ;;  %v721_v57 = vadd.f32 %v720_v13, %v632_v54  ;;  %v639_v6 = vadd.f32 %v2578_v58, %v2590_v20  ;;  %v1863_v20 = vld [vmem:[#allocation10 + $0x60] sm:$0xf]  ;;  %v1857_v54 = vld [vmem:[#allocation10 + $0x58] sm:$0xf0] }
 0x12b   : > { %v726_v13 = vadd.f32 %v725_v38, %v637_v61 }
 0x12c   : > { %v769_v62 = vmax.f32 %v703_v59, 0.0  ;;  %v723_v59 = vadd.f32 %v722_v23, %v634_v55  ;;  %v647_v55 = vadd.f32 %v2578_v58, %v2599_v39  ;;  %v1847_v39 = vld [vmem:[#allocation10 + $0x40] sm:$0xf] }
 0x12d   : > { %v2608_v0 = vpop.f32.mrf.mxu2 }
 0x12e   : > { %v796_v63 = vpack.c.bf16 %v769_v62, %v768_v60  ;;  %v776_v60 = vmax.f32 %v721_v57, 0.0  ;;  %v777_v62 = vmax.f32 %v723_v59, 0.0 }
 0x12f   : > { %v616_v1 = vpop.f32.mrf.mxu0 }
 0x130   : > { %v705_v2 = vpop.f32.mrf.mxu1  ;;  %902 = vmatmul.bf16.gmra.mxu2 %v796_v63  ;;  %v617_v3 = vadd.f32 %v2578_v58, %v616_v1  ;;  %v800_v1 = vpack.c.bf16 %v777_v62, %v776_v60 }
 0x132   : > { %v706_v8 = vadd.f32 %v705_v2, %v617_v3  ;;  %v732_v2 = vpop.f32.mrf.mxu3  ;;  %v1871_v3 = vld [vmem:[#allocation10 + $0x70] sm:$0xf] }
 0x134   : > { %v770_v14 = vmax.f32 %v706_v8, 0.0  ;;  %v1873_v8 = vld [vmem:[#allocation10 + $0x78] sm:$0xf0] }
 0x135   : > { %v2612_v10 = vpop.f32.mrf.mxu2 }
 0x137   : > { %v618_v5 = vpop.f32.mrf.mxu0 }
 0x138   : > { %v707_v7 = vpop.f32.mrf.mxu1  ;;  %v619_v9 = vadd.f32 %v2578_v58, %v618_v5  ;;  %v1931_v5 = vld [vmem:[#allocation10 + $0x74] sm:$0xf] }
 0x13a   : > { %v708_v12 = vadd.f32 %v707_v7, %v619_v9  ;;  %v1872_v7 = vor.u32 %v1932_v4, %v1871_v3  ;;  %v1876_v9 = vor.u32 %v1931_v5, %v1873_v8 }
 0x13c   : > { %v771_v15 = vmax.f32 %v708_v12, 0.0  ;;  %1285 = vmatpush.bf16.msrb.mxu0 %v1872_v7  ;;  %1374 = vmatpush.bf16.msrb.mxu1 %v1876_v9 }
 0x13d   : > { %v2614_v21 = vpop.f32.mrf.mxu2 }
 0x13e   : > { %v797_v16 = vpack.c.bf16 %v771_v15, %v770_v14  ;;  %v728_v14 = vadd.f32 %v727_v47, %v639_v6  ;;  %v2636_v15 = vld [vmem:[#allocation11 + $0x1] ss:$0 sm:$0xff]  ;;  %v1925_v6 = vld [vmem:[#allocation10 + $0x44] sm:$0xf] }
 0x13f   : > { %v621_v17 = vpop.f32.mrf.mxu0 }
 0x140   : > { %v710_v18 = vpop.f32.mrf.mxu1  ;;  %907 = vmatmul.bf16.gmra.mxu2 %v797_v16  ;;  %v622_v22 = vadd.f32 %v2578_v58, %v621_v17  ;;  %v735_v16 = vpop.f32.mrf.mxu3  ;;  %v778_v17 = vmax.f32 %v726_v13, 0.0  ;;  %v1849_v13 = vld [vmem:[#allocation10 + $0x48] sm:$0xf0] }
 0x141   : > { %v736_v60 = vadd.f32 %v735_v16, %v647_v55  ;;  %v654_v16 = vadd.f32 %v2578_v58, %v2608_v0  ;;  %v1924_v0 = vld [vmem:[#allocation10 + $0x34] sm:$0xf0]  ;;  %v1833_v55 = vld [vmem:[#allocation10 + $0x28] sm:$0xf0] }
 0x142   : > { %v711_v27 = vadd.f32 %v710_v18, %v622_v22  ;;  %v779_v18 = vmax.f32 %v728_v14, 0.0  ;;  %v652_v14 = vadd.f32 %v2578_v58, %v2605_v53  ;;  %v1839_v53 = vld [vmem:[#allocation10 + $0x30] sm:$0xf] }
 0x144   : > { %v772_v30 = vmax.f32 %v711_v27, 0.0  ;;  %v1929_v27 = vld [vmem:[#allocation10 + $0x64] sm:$0xf] }
 0x145   : > { %v2618_v32 = vpop.f32.mrf.mxu2 }
 0x147   : > { %v623_v24 = vpop.f32.mrf.mxu0 }
 0x148   : > { %v712_v26 = vpop.f32.mrf.mxu1  ;;  %v624_v28 = vadd.f32 %v2578_v58, %v623_v24  ;;  %v801_v24 = vpack.c.bf16 %v779_v18, %v778_v17  ;;  %v1852_v17 = vor.u32 %v1925_v6, %v1849_v13 }
 0x14a   : > { %v713_v29 = vadd.f32 %v712_v26, %v624_v28  ;;  %v1930_v26 = vld [vmem:[#allocation10 + $0x64] sm:$0xf0] }
 0x14b   : > { %v1864_v28 = vor.u32 %v1930_v26, %v1863_v20 }
 0x14c   : > { %v773_v31 = vmax.f32 %v713_v29, 0.0  ;;  %v1865_v29 = vld [vmem:[#allocation10 + $0x68] sm:$0xf0] }
 0x14d   : > { %v2621_v41 = vpop.f32.mrf.mxu2  ;;  %1286 = vmatpush.bf16.msrb.mxu0 %v1864_v28 }
 0x14e   : > { %v798_v33 = vpack.c.bf16 %v773_v31, %v772_v30  ;;  %v642_v30 = vadd.f32 %v2578_v58, %v2593_v25  ;;  %v644_v31 = vadd.f32 %v2578_v58, %v2596_v34  ;;  %v1855_v34 = vld [vmem:[#allocation10 + $0x50] sm:$0xf] }
 0x14f   : > { %v626_v35 = vpop.f32.mrf.mxu0 }
 0x150   : > { %v715_v36 = vpop.f32.mrf.mxu1  ;;  %912 = vmatmul.bf16.gmra.mxu2 %v798_v33  ;;  %v627_v40 = vadd.f32 %v2578_v58, %v626_v35  ;;  %v1868_v33 = vor.u32 %v1929_v27, %v1865_v29  ;;  %v737_v35 = vpop.f32.mrf.mxu3  ;;  %v731_v37 = vadd.f32 %v730_v56, %v642_v30  ;;  %v733_v38 = vadd.f32 %v732_v2, %v644_v31  ;;  %v1923_v30 = vld [vmem:[#allocation10 + $0x34] sm:$0xf] }
 0x151   : > { %v649_v56 = vadd.f32 %v2578_v58, %v2602_v48  ;;  %v782_v2 = vmax.f32 %v736_v60, 0.0  ;;  %v1926_v48 = vld [vmem:[#allocation10 + $0x44] sm:$0xf0]  ;;  %v1840_v31 = vor.u32 %v1924_v0, %v1839_v53 }
 0x152   : > { %v716_v43 = vadd.f32 %v715_v36, %v627_v40  ;;  %1375 = vmatpush.bf16.msrb.mxu1 %v1868_v33  ;;  %v780_v40 = vmax.f32 %v731_v37, 0.0  ;;  %v1841_v33 = vld [vmem:[#allocation10 + $0x38] sm:$0xf0] }
 0x153   : > { %v738_v62 = vadd.f32 %v737_v35, %v649_v56  ;;  %v657_v35 = vadd.f32 %v2578_v58, %v2612_v10  ;;  %v1844_v37 = vor.u32 %v1923_v30, %v1841_v33  ;;  %v662_v56 = vadd.f32 %v2578_v58, %v2618_v32  ;;  %v1823_v32 = vld [vmem:[#allocation10 + $0x10] sm:$0xf] }
 0x154   : > { %v774_v49 = vmax.f32 %v716_v43, 0.0 }
 0x155   : > { %v2624_v52 = vpop.f32.mrf.mxu2  ;;  %v783_v3 = vmax.f32 %v738_v62, 0.0 }
 0x157   : > { %v628_v42 = vpop.f32.mrf.mxu0  ;;  %v803_v8 = vpack.c.bf16 %v783_v3, %v782_v2 }
 0x158   : > { %v629_v44 = vadd.f32 %v2578_v58, %v628_v42  ;;  %v717_v45 = vpop.f32.mrf.mxu1  ;;  %v781_v42 = vmax.f32 %v733_v38, 0.0 }
 0x15a   : > { %v718_v46 = vadd.f32 %v717_v45, %v629_v44  ;;  %v802_v47 = vpack.c.bf16 %v781_v42, %v780_v40 }
 0x15c   : > { %v775_v50 = vmax.f32 %v718_v46, 0.0  ;;  %v740_v46 = vpop.f32.mrf.mxu3 }
 0x15d   : > { %v2630_v63 = vpop.f32.mrf.mxu2 }
 0x15e   : > { %v799_v51 = vpack.c.bf16 %v775_v50, %v774_v49  ;;  %v1928_v49 = vld [vmem:[#allocation10 + $0x54] sm:$0xf0]  ;;  %v1927_v50 = vld [vmem:[#allocation10 + $0x54] sm:$0xf]  ;;  %v669_v13 = vadd.f32 %v2578_v58, %v2630_v63  ;;  %v1917_v63 = vld [vmem:[#allocation10 + $0x4] sm:$0xf] }
 0x15f   : > { %v1860_v57 = vor.u32 %v1927_v50, %v1857_v54  ;;  %v1922_v50 = vld [vmem:[#allocation10 + $0x24] sm:$0xf0] }
 0x160   : > { %917 = vmatmul.bf16.gmra.mxu2 %v799_v51  ;;  %v1856_v51 = vor.u32 %v1928_v49, %v1855_v34 }
 0x161   : > { %1376 = vmatpush.bf16.msrb.mxu1 %v1860_v57  ;;  %v664_v57 = vadd.f32 %v2578_v58, %v2621_v41  ;;  %v1920_v41 = vld [vmem:[#allocation10 + $0x14] sm:$0xf0] }
 0x162   : > { %1287 = vmatpush.bf16.msrb.mxu0 %v1856_v51  ;;  %v1921_v51 = vld [vmem:[#allocation10 + $0x24] sm:$0xf]  ;;  %v1824_v6 = vor.u32 %v1920_v41, %v1823_v32 }
 0x165   : > { %1377 = vmatpush.bf16.msrb.mxu1 %v1852_v17 }
 0x169   : > { %1378 = vmatpush.bf16.msrb.mxu1 %v1844_v37 }
 0x170   : > { %922 = vmatmul.bf16.gmra.mxu2 %v800_v1  ;;  %v742_v1 = vpop.f32.mrf.mxu3 }
 0x173   : > { %v883_v12 = vpop.f32.mrf.mxu2 }
 0x174   : > { %v884_v22 = vadd.f32 %v2636_v15, %v883_v12  ;;  %v1848_v12 = vor.u32 %v1926_v48, %v1847_v39  ;;  %v1919_v48 = vld [vmem:[#allocation10 + $0x14] sm:$0xf] }
 0x176   : > { %1288 = vmatpush.bf16.msrb.mxu0 %v1848_v12  ;;  %v667_v12 = vadd.f32 %v2578_v58, %v2624_v52  ;;  %v1815_v52 = vld [vmem:[#allocation10] sm:$0xf] }
 0x178   : > { %v745_v9 = vpop.f32.mrf.mxu3 }
 0x179   : > { %v746_v42 = vadd.f32 %v745_v9, %v657_v35  ;;  %v1825_v9 = vld [vmem:[#allocation10 + $0x18] sm:$0xf0] }
 0x17a   : > { %1289 = vmatpush.bf16.msrb.mxu0 %v1840_v31 }
 0x17b   : > { %v885_v19 = vpop.f32.mrf.mxu2 }
 0x17c   : > { %v886_v23 = vadd.f32 %v2636_v15, %v885_v19  ;;  %v741_v19 = vadd.f32 %v740_v46, %v652_v14  ;;  %v1828_v14 = vor.u32 %v1919_v48, %v1825_v9 }
 0x17e   : > { %v963_v11 = vpack.c.bf16 %v886_v23, %v884_v22  ;;  %v743_v22 = vadd.f32 %v742_v1, %v654_v16  ;;  %v784_v23 = vmax.f32 %v741_v19, 0.0 }
 0x180   : > { %927 = vmatmul.bf16.gmra.mxu2 %v801_v24  ;;  %1053 = vmatmul.bf16.vlgmr.msrb.gmra.mxu3 %v963_v11  ;;  %v785_v11 = vmax.f32 %v743_v22, 0.0  ;;  %v747_v24 = vpop.f32.mrf.mxu3 }
 0x182   : > { %v804_v28 = vpack.c.bf16 %v785_v11, %v784_v23 }
 0x183   : > { %v888_v36 = vpop.f32.mrf.mxu2 }
 0x184   : > { %v889_v44 = vadd.f32 %v2636_v15, %v888_v36  ;;  %v659_v36 = vadd.f32 %v2578_v58, %v2614_v21  ;;  %v1831_v21 = vld [vmem:[#allocation10 + $0x20] sm:$0xf]  ;;  %v1918_v58 = vld [vmem:[#allocation10 + $0x4] sm:$0xf0] }
 0x185   : > { %v1832_v54 = vor.u32 %v1922_v50, %v1831_v21 }
 0x187   : > { %1290 = vmatpush.bf16.msrb.mxu0 %v1832_v54 }
 0x188   : > { %v750_v40 = vpop.f32.mrf.mxu3 }
 0x189   : > { %v751_v62 = vadd.f32 %v750_v40, %v662_v56 }
 0x18b   : > { %v890_v43 = vpop.f32.mrf.mxu2  ;;  %v788_v3 = vmax.f32 %v751_v62, 0.0  ;;  %1291 = vmatpush.bf16.msrb.mxu0 %v1824_v6 }
 0x18c   : > { %v891_v45 = vadd.f32 %v2636_v15, %v890_v43  ;;  %v748_v43 = vadd.f32 %v747_v24, %v659_v36 }
 0x18e   : > { %v964_v25 = vpack.c.bf16 %v891_v45, %v889_v44  ;;  %v786_v44 = vmax.f32 %v746_v42, 0.0  ;;  %v787_v45 = vmax.f32 %v748_v43, 0.0 }
 0x190   : > { %932 = vmatmul.bf16.gmra.mxu2 %v802_v47  ;;  %1058 = vmatmul.bf16.gmra.mxu3 %v964_v25  ;;  %v805_v49 = vpack.c.bf16 %v787_v45, %v786_v44  ;;  %v752_v10 = vpop.f32.mrf.mxu3  ;;  %v2680_v45 = vld [vmem:[#allocation11 + $0x2] ss:$0 sm:$0xff] }
 0x191   : > { %v753_v1 = vadd.f32 %v752_v10, %v664_v57 }
 0x193   : > { %v893_v59 = vpop.f32.mrf.mxu2 }
 0x194   : > { %v894_v5 = vadd.f32 %v2636_v15, %v893_v59  ;;  %v1836_v59 = vor.u32 %v1921_v51, %v1833_v55 }
 0x196   : > { %1379 = vmatpush.bf16.msrb.mxu1 %v1836_v59 }
 0x198   : > { %v755_v2 = vpop.f32.mrf.mxu3 }
 0x19a   : > { %1380 = vmatpush.bf16.msrb.mxu1 %v1828_v14 }
 0x19b   : > { %v895_v4 = vpop.f32.mrf.mxu2 }
 0x19c   : > { %v896_v7 = vadd.f32 %v2636_v15, %v895_v4  ;;  %v789_v4 = vmax.f32 %v753_v1, 0.0 }
 0x19e   : > { %v965_v61 = vpack.c.bf16 %v896_v7, %v894_v5  ;;  %v806_v39 = vpack.c.bf16 %v789_v4, %v788_v3 }
 0x1a0   : > { %937 = vmatmul.bf16.gmra.mxu2 %v803_v8  ;;  %1063 = vmatmul.bf16.gmra.mxu3 %v965_v61  ;;  %v757_v16 = vpop.f32.mrf.mxu3 }
 0x1a1   : > { %v758_v19 = vadd.f32 %v757_v16, %v669_v13 }
 0x1a3   : > { %v898_v18 = vpop.f32.mrf.mxu2  ;;  %v791_v23 = vmax.f32 %v758_v19, 0.0 }
 0x1a4   : > { %v899_v26 = vadd.f32 %v2636_v15, %v898_v18  ;;  %v756_v18 = vadd.f32 %v755_v2, %v667_v12 }
 0x1a6   : > { %v790_v22 = vmax.f32 %v756_v18, 0.0 }
 0x1ab   : > { %v900_v20 = vpop.f32.mrf.mxu2 }
 0x1ac   : > { %v901_v27 = vadd.f32 %v2636_v15, %v900_v20 }
 0x1ae   : > { %v966_v29 = vpack.c.bf16 %v901_v27, %v899_v26  ;;  %v807_v27 = vpack.c.bf16 %v791_v23, %v790_v22 }
 0x1b0   : > { %942 = vmatmul.bf16.gmra.mxu2 %v804_v28  ;;  %1068 = vmatmul.bf16.gmra.mxu3 %v966_v29  ;;  %v1816_v28 = vor.u32 %v1918_v58, %v1815_v52  ;;  %v1817_v29 = vld [vmem:[#allocation10 + $0x8] sm:$0xf0] }
 0x1b1   : > { %v1820_v53 = vor.u32 %v1917_v63, %v1817_v29 }
 0x1b2   : > { %1292 = vmatpush.bf16.msrb.mxu0 %v1816_v28 }
 0x1b3   : > { %v903_v38 = vpop.f32.mrf.mxu2  ;;  %1381 = vmatpush.bf16.msrb.mxu1 %v1820_v53 }
 0x1b4   : > { %v904_v47 = vadd.f32 %v2636_v15, %v903_v38 }
 0x1bb   : > { %v905_v46 = vpop.f32.mrf.mxu2 }
 0x1bc   : > { %v906_v25 = vadd.f32 %v2636_v15, %v905_v46 }
 0x1be   : > { %v967_v34 = vpack.c.bf16 %v906_v25, %v904_v47 }
 0x1c0   : > { %947 = vmatmul.bf16.gmra.mxu2 %v805_v49  ;;  %1073 = vmatmul.bf16.gmra.mxu3 %v967_v34 }
 0x1c3   : > { %v908_v60 = vpop.f32.mrf.mxu2 }
 0x1c4   : > { %v909_v7 = vadd.f32 %v2636_v15, %v908_v60 }
 0x1cb   : > { %v910_v5 = vpop.f32.mrf.mxu2 }
 0x1cc   : > { %v911_v8 = vadd.f32 %v2636_v15, %v910_v5 }
 0x1ce   : > { %v968_v61 = vpack.c.bf16 %v911_v8, %v909_v7 }
 0x1d0   : > { %952 = vmatmul.bf16.gmra.mxu2 %v806_v39  ;;  %1078 = vmatmul.bf16.gmra.mxu3 %v968_v61 }
 0x1d3   : > { %v913_v17 = vpop.f32.mrf.mxu2 }
 0x1d4   : > { %v914_v24 = vadd.f32 %v2636_v15, %v913_v17 }
 0x1db   : > { %v915_v11 = vpop.f32.mrf.mxu2 }
 0x1dc   : > { %v916_v20 = vadd.f32 %v2636_v15, %v915_v11 }
 0x1de   : > { %v969_v26 = vpack.c.bf16 %v916_v20, %v914_v24 }
 0x1e0   : > { %957 = vmatmul.bf16.gmra.mxu2 %v807_v27  ;;  %1083 = vmatmul.bf16.gmra.mxu3 %v969_v26 }
 0x1e3   : > { %v918_v0 = vpop.f32.mrf.mxu2 }
 0x1e4   : > { %v919_v31 = vadd.f32 %v2636_v15, %v918_v0 }
 0x1eb   : > { %v920_v30 = vpop.f32.mrf.mxu2 }
 0x1ec   : > { %v921_v33 = vadd.f32 %v2636_v15, %v920_v30 }
 0x1ee   : > { %v970_v35 = vpack.c.bf16 %v921_v33, %v919_v31 }
 0x1f0   : > { %1088 = vmatmul.bf16.gmra.mxu3 %v970_v35 }
 0x1f3   : > { %v923_v36 = vpop.f32.mrf.mxu2 }
 0x1f4   : > { %v924_v38 = vadd.f32 %v2636_v15, %v923_v36 }
 0x1fb   : > { %v925_v37 = vpop.f32.mrf.mxu2 }
 0x1fc   : > { %v926_v40 = vadd.f32 %v2636_v15, %v925_v37 }
 0x1fe   : > { %v971_v42 = vpack.c.bf16 %v926_v40, %v924_v38 }
 0x200   : > { %1093 = vmatmul.bf16.gmra.mxu3 %v971_v42 }
 0x203   : > { %v928_v43 = vpop.f32.mrf.mxu2  ;;  %v1054_v44 = vpop.f32.mrf.mxu3 }
 0x204   : > { %v1055_v46 = vadd.f32 %v2680_v45, %v1054_v44  ;;  %v929_v34 = vadd.f32 %v2636_v15, %v928_v43 }
 0x206   : > { %v1134_v21 = vmax.f32 %v1055_v46, 0.0 }
 0x20b   : > { %v930_v47 = vpop.f32.mrf.mxu2  ;;  %v1056_v25 = vpop.f32.mrf.mxu3 }
 0x20c   : > { %v931_v49 = vadd.f32 %v2636_v15, %v930_v47  ;;  %v1057_v10 = vadd.f32 %v2680_v45, %v1056_v25 }
 0x20e   : > { %v972_v50 = vpack.c.bf16 %v931_v49, %v929_v34  ;;  %v1135_v51 = vmax.f32 %v1057_v10, 0.0 }
 0x210   : > { %1098 = vmatmul.bf16.gmra.mxu3 %v972_v50  ;;  %v1166_v54 = vpack.c.bf16 %v1135_v51, %v1134_v21 }
 0x212   : > { %1293 = vmatmul.bf16.vlgmr.msrb.gmra.mxu0 %v1166_v54  ;;  %1382 = vmatmul.bf16.vlgmr.msrb.gmra.mxu1 %v1166_v54 }
 0x213   : > { %v933_v55 = vpop.f32.mrf.mxu2  ;;  %v1059_v56 = vpop.f32.mrf.mxu3 }
 0x214   : > { %v1060_v57 = vadd.f32 %v2680_v45, %v1059_v56  ;;  %v934_v62 = vadd.f32 %v2636_v15, %v933_v55 }
 0x216   : > { %v1136_v3 = vmax.f32 %v1060_v57, 0.0 }
 0x21b   : > { %v935_v59 = vpop.f32.mrf.mxu2  ;;  %v1061_v60 = vpop.f32.mrf.mxu3 }
 0x21c   : > { %v936_v1 = vadd.f32 %v2636_v15, %v935_v59  ;;  %v1062_v2 = vadd.f32 %v2680_v45, %v1061_v60 }
 0x21e   : > { %v973_v4 = vpack.c.bf16 %v936_v1, %v934_v62  ;;  %v1137_v5 = vmax.f32 %v1062_v2, 0.0 }
 0x220   : > { %1103 = vmatmul.bf16.gmra.mxu3 %v973_v4  ;;  %v1167_v7 = vpack.c.bf16 %v1137_v5, %v1136_v3 }
 0x222   : > { %1298 = vmatmul.bf16.gmra.mxu0 %v1167_v7  ;;  %1387 = vmatmul.bf16.gmra.mxu1 %v1167_v7 }
 0x223   : > { %v938_v8 = vpop.f32.mrf.mxu2  ;;  %v1064_v61 = vpop.f32.mrf.mxu3 }
 0x224   : > { %v1065_v39 = vadd.f32 %v2680_v45, %v1064_v61  ;;  %v939_v48 = vadd.f32 %v2636_v15, %v938_v8 }
 0x226   : > { %v1138_v12 = vmax.f32 %v1065_v39, 0.0 }
 0x22b   : > { %v940_v32 = vpop.f32.mrf.mxu2  ;;  %v1066_v41 = vpop.f32.mrf.mxu3 }
 0x22c   : > { %v941_v6 = vadd.f32 %v2636_v15, %v940_v32  ;;  %v1067_v9 = vadd.f32 %v2680_v45, %v1066_v41 }
 0x22e   : > { %v974_v13 = vpack.c.bf16 %v941_v6, %v939_v48  ;;  %v1139_v14 = vmax.f32 %v1067_v9, 0.0  ;;  %v1199_v48 = vld [vmem:[#allocation11 + $0x3] ss:$4 sm:$0x3] }
 0x230   : > { %1108 = vmatmul.bf16.gmra.mxu3 %v974_v13  ;;  %v1168_v16 = vpack.c.bf16 %v1139_v14, %v1138_v12  ;;  %v2714_v13 = vperm.slane %v1199_v48, 0  ;;  %v2716_v14 = vperm.slane %v1199_v48, 1 }
 0x232   : > { %1303 = vmatmul.bf16.gmra.mxu0 %v1168_v16  ;;  %1392 = vmatmul.bf16.gmra.mxu1 %v1168_v16 }
 0x233   : > { %v943_v17 = vpop.f32.mrf.mxu2  ;;  %v1069_v18 = vpop.f32.mrf.mxu3 }
 0x234   : > { %v1070_v19 = vadd.f32 %v2680_v45, %v1069_v18  ;;  %v944_v11 = vadd.f32 %v2636_v15, %v943_v17 }
 0x236   : > { %v1140_v26 = vmax.f32 %v1070_v19, 0.0 }
 0x23b   : > { %v945_v22 = vpop.f32.mrf.mxu2  ;;  %v1071_v23 = vpop.f32.mrf.mxu3 }
 0x23c   : > { %v946_v24 = vadd.f32 %v2636_v15, %v945_v22  ;;  %v1072_v20 = vadd.f32 %v2680_v45, %v1071_v23 }
 0x23e   : > { %v975_v27 = vpack.c.bf16 %v946_v24, %v944_v11  ;;  %v1141_v52 = vmax.f32 %v1072_v20, 0.0 }
 0x240   : > { %1113 = vmatmul.bf16.gmra.mxu3 %v975_v27  ;;  %v1169_v58 = vpack.c.bf16 %v1141_v52, %v1140_v26 }
 0x242   : > { %1308 = vmatmul.bf16.gmra.mxu0 %v1169_v58  ;;  %1397 = vmatmul.bf16.gmra.mxu1 %v1169_v58 }
 0x243   : > { %v948_v63 = vpop.f32.mrf.mxu2  ;;  %v1074_v28 = vpop.f32.mrf.mxu3 }
 0x244   : > { %v1075_v29 = vadd.f32 %v2680_v45, %v1074_v28  ;;  %v949_v30 = vadd.f32 %v2636_v15, %v948_v63 }
 0x246   : > { %v1142_v35 = vmax.f32 %v1075_v29, 0.0 }
 0x24b   : > { %v950_v53 = vpop.f32.mrf.mxu2  ;;  %v1076_v0 = vpop.f32.mrf.mxu3 }
 0x24c   : > { %v951_v31 = vadd.f32 %v2636_v15, %v950_v53  ;;  %v1077_v33 = vadd.f32 %v2680_v45, %v1076_v0 }
 0x24e   : > { %v976_v36 = vpack.c.bf16 %v951_v31, %v949_v30  ;;  %v1143_v37 = vmax.f32 %v1077_v33, 0.0 }
 0x250   : > { %v1170_v38 = vpack.c.bf16 %v1143_v37, %v1142_v35  ;;  %1118 = vmatmul.bf16.gmra.mxu3 %v976_v36 }
 0x252   : > { %1313 = vmatmul.bf16.gmra.mxu0 %v1170_v38  ;;  %1402 = vmatmul.bf16.gmra.mxu1 %v1170_v38 }
 0x253   : > { %v953_v40 = vpop.f32.mrf.mxu2  ;;  %v1079_v42 = vpop.f32.mrf.mxu3 }
 0x254   : > { %v1080_v43 = vadd.f32 %v2680_v45, %v1079_v42  ;;  %v954_v47 = vadd.f32 %v2636_v15, %v953_v40 }
 0x256   : > { %v1144_v49 = vmax.f32 %v1080_v43, 0.0 }
 0x25b   : > { %v955_v44 = vpop.f32.mrf.mxu2  ;;  %v1081_v46 = vpop.f32.mrf.mxu3 }
 0x25c   : > { %v956_v25 = vadd.f32 %v2636_v15, %v955_v44  ;;  %v1082_v34 = vadd.f32 %v2680_v45, %v1081_v46 }
 0x25e   : > { %v977_v10 = vpack.c.bf16 %v956_v25, %v954_v47  ;;  %v1145_v21 = vmax.f32 %v1082_v34, 0.0 }
 0x260   : > { %v1171_v50 = vpack.c.bf16 %v1145_v21, %v1144_v49  ;;  %1123 = vmatmul.bf16.gmra.mxu3 %v977_v10 }
 0x262   : > { %1318 = vmatmul.bf16.gmra.mxu0 %v1171_v50  ;;  %1407 = vmatmul.bf16.gmra.mxu1 %v1171_v50 }
 0x263   : > { %v958_v51 = vpop.f32.mrf.mxu2  ;;  %v1084_v54 = vpop.f32.mrf.mxu3 }
 0x264   : > { %v1085_v55 = vadd.f32 %v2680_v45, %v1084_v54  ;;  %v959_v59 = vadd.f32 %v2636_v15, %v958_v51 }
 0x266   : > { %v1146_v1 = vmax.f32 %v1085_v55, 0.0 }
 0x26b   : > { %v960_v56 = vpop.f32.mrf.mxu2  ;;  %v1086_v57 = vpop.f32.mrf.mxu3 }
 0x26c   : > { %v961_v60 = vadd.f32 %v2636_v15, %v960_v56  ;;  %v1087_v62 = vadd.f32 %v2680_v45, %v1086_v57 }
 0x26e   : > { %v978_v2 = vpack.c.bf16 %v961_v60, %v959_v59  ;;  %v1147_v3 = vmax.f32 %v1087_v62, 0.0 }
 0x270   : > { %v1172_v4 = vpack.c.bf16 %v1147_v3, %v1146_v1  ;;  %1128 = vmatmul.bf16.gmra.mxu3 %v978_v2 }
 0x272   : > { %1323 = vmatmul.bf16.gmra.mxu0 %v1172_v4  ;;  %1412 = vmatmul.bf16.gmra.mxu1 %v1172_v4 }
 0x273   : > { %v1089_v5 = vpop.f32.mrf.mxu3 }
 0x274   : > { %v1090_v7 = vadd.f32 %v2680_v45, %v1089_v5 }
 0x276   : > { %v1148_v39 = vmax.f32 %v1090_v7, 0.0 }
 0x27b   : > { %v1091_v8 = vpop.f32.mrf.mxu3 }
 0x27c   : > { %v1092_v61 = vadd.f32 %v2680_v45, %v1091_v8 }
 0x27e   : > { %v1149_v32 = vmax.f32 %v1092_v61, 0.0 }
 0x280   : > { %v1173_v41 = vpack.c.bf16 %v1149_v32, %v1148_v39 }
 0x282   : > { %1328 = vmatmul.bf16.gmra.mxu0 %v1173_v41  ;;  %1417 = vmatmul.bf16.gmra.mxu1 %v1173_v41 }
 0x283   : > { %v1094_v15 = vpop.f32.mrf.mxu3 }
 0x284   : > { %v1095_v6 = vadd.f32 %v2680_v45, %v1094_v15 }
 0x286   : > { %v1150_v16 = vmax.f32 %v1095_v6, 0.0 }
 0x28b   : > { %v1096_v9 = vpop.f32.mrf.mxu3 }
 0x28c   : > { %v1097_v12 = vadd.f32 %v2680_v45, %v1096_v9 }
 0x28e   : > { %v1151_v17 = vmax.f32 %v1097_v12, 0.0 }
 0x28f   : > { %v1294_v18 = vpop.f32.mrf.mxu0  ;;  %v1383_v19 = vpop.f32.mrf.mxu1 }
 0x290   : > { %v1174_v22 = vpack.c.bf16 %v1151_v17, %v1150_v16  ;;  %v1295_v23 = vadd.f32 %v1294_v18, %v2714_v13  ;;  %v1384_v11 = vadd.f32 %v1383_v19, %v2716_v14 }
 0x292   : > { %1463 = vst [vmem:[%s2722_s29] sm:$0xff] %v1295_v23  ;;  %1333 = vmatmul.bf16.gmra.mxu0 %v1174_v22  ;;  %1422 = vmatmul.bf16.gmra.mxu1 %v1174_v22 }
 0x293   : > { %1464 = vst [vmem:[%s2722_s29 + $0x8] sm:$0xff] %v1384_v11  ;;  %v1099_v24 = vpop.f32.mrf.mxu3 }
 0x294   : > { %v1100_v58 = vadd.f32 %v2680_v45, %v1099_v24 }
 0x296   : > { %v1152_v29 = vmax.f32 %v1100_v58, 0.0 }
 0x297   : > { %v1296_v20 = vpop.f32.mrf.mxu0  ;;  %v1385_v26 = vpop.f32.mrf.mxu1 }
 0x298   : > { %v1297_v27 = vadd.f32 %v1296_v20, %v2714_v13  ;;  %v1386_v52 = vadd.f32 %v1385_v26, %v2716_v14 }
 0x29a   : > { %1465 = vst [vmem:[%s2722_s29 + $0x10] sm:$0xff] %v1297_v27 }
 0x29b   : > { %1466 = vst [vmem:[%s2722_s29 + $0x18] sm:$0xff] %v1386_v52  ;;  %v1101_v63 = vpop.f32.mrf.mxu3 }
 0x29c   : > { %v1102_v28 = vadd.f32 %v2680_v45, %v1101_v63 }
 0x29e   : > { %v1153_v53 = vmax.f32 %v1102_v28, 0.0 }
 0x29f   : > { %v1299_v0 = vpop.f32.mrf.mxu0  ;;  %v1388_v30 = vpop.f32.mrf.mxu1 }
 0x2a0   : > { %v1175_v31 = vpack.c.bf16 %v1153_v53, %v1152_v29  ;;  %v1300_v33 = vadd.f32 %v1299_v0, %v2714_v13  ;;  %v1389_v35 = vadd.f32 %v1388_v30, %v2716_v14 }
 0x2a2   : > { %1467 = vst [vmem:[%s2722_s29 + $0x20] sm:$0xff] %v1300_v33  ;;  %1338 = vmatmul.bf16.gmra.mxu0 %v1175_v31  ;;  %1427 = vmatmul.bf16.gmra.mxu1 %v1175_v31 }
 0x2a3   : > { %1468 = vst [vmem:[%s2722_s29 + $0x28] sm:$0xff] %v1389_v35  ;;  %v1104_v36 = vpop.f32.mrf.mxu3 }
 0x2a4   : > { %v1105_v43 = vadd.f32 %v2680_v45, %v1104_v36 }
 0x2a6   : > { %v1154_v47 = vmax.f32 %v1105_v43, 0.0 }
 0x2a7   : > { %v1301_v37 = vpop.f32.mrf.mxu0  ;;  %v1390_v38 = vpop.f32.mrf.mxu1 }
 0x2a8   : > { %v1302_v40 = vadd.f32 %v1301_v37, %v2714_v13  ;;  %v1391_v42 = vadd.f32 %v1390_v38, %v2716_v14 }
 0x2aa   : > { %1469 = vst [vmem:[%s2722_s29 + $0x30] sm:$0xff] %v1302_v40 }
 0x2ab   : > { %1470 = vst [vmem:[%s2722_s29 + $0x38] sm:$0xff] %v1391_v42  ;;  %v1106_v44 = vpop.f32.mrf.mxu3 }
 0x2ac   : > { %v1107_v46 = vadd.f32 %v2680_v45, %v1106_v44 }
 0x2ae   : > { %v1155_v25 = vmax.f32 %v1107_v46, 0.0 }
 0x2af   : > { %v1304_v34 = vpop.f32.mrf.mxu0  ;;  %v1393_v49 = vpop.f32.mrf.mxu1 }
 0x2b0   : > { %v1176_v10 = vpack.c.bf16 %v1155_v25, %v1154_v47  ;;  %v1305_v21 = vadd.f32 %v1304_v34, %v2714_v13  ;;  %v1394_v50 = vadd.f32 %v1393_v49, %v2716_v14 }
 0x2b2   : > { %1471 = vst [vmem:[%s2722_s29 + $0x40] sm:$0xff] %v1305_v21  ;;  %1343 = vmatmul.bf16.gmra.mxu0 %v1176_v10  ;;  %1432 = vmatmul.bf16.gmra.mxu1 %v1176_v10 }
 0x2b3   : > { %1472 = vst [vmem:[%s2722_s29 + $0x48] sm:$0xff] %v1394_v50  ;;  %v1109_v51 = vpop.f32.mrf.mxu3 }
 0x2b4   : > { %v1110_v59 = vadd.f32 %v2680_v45, %v1109_v51 }
 0x2b6   : > { %v1156_v1 = vmax.f32 %v1110_v59, 0.0 }
 0x2b7   : > { %v1306_v54 = vpop.f32.mrf.mxu0  ;;  %v1395_v55 = vpop.f32.mrf.mxu1 }
 0x2b8   : > { %v1307_v56 = vadd.f32 %v1306_v54, %v2714_v13  ;;  %v1396_v57 = vadd.f32 %v1395_v55, %v2716_v14 }
 0x2ba   : > { %1473 = vst [vmem:[%s2722_s29 + $0x50] sm:$0xff] %v1307_v56 }
 0x2bb   : > { %1474 = vst [vmem:[%s2722_s29 + $0x58] sm:$0xff] %v1396_v57  ;;  %v1111_v60 = vpop.f32.mrf.mxu3 }
 0x2bc   : > { %v1112_v62 = vadd.f32 %v2680_v45, %v1111_v60 }
 0x2be   : > { %v1157_v2 = vmax.f32 %v1112_v62, 0.0 }
 0x2bf   : > { %v1309_v3 = vpop.f32.mrf.mxu0  ;;  %v1398_v4 = vpop.f32.mrf.mxu1 }
 0x2c0   : > { %v1177_v5 = vpack.c.bf16 %v1157_v2, %v1156_v1  ;;  %v1310_v7 = vadd.f32 %v1309_v3, %v2714_v13  ;;  %v1399_v8 = vadd.f32 %v1398_v4, %v2716_v14 }
 0x2c2   : > { %1475 = vst [vmem:[%s2722_s29 + $0x60] sm:$0xff] %v1310_v7  ;;  %1348 = vmatmul.bf16.gmra.mxu0 %v1177_v5  ;;  %1437 = vmatmul.bf16.gmra.mxu1 %v1177_v5 }
 0x2c3   : > { %1476 = vst [vmem:[%s2722_s29 + $0x68] sm:$0xff] %v1399_v8  ;;  %v1114_v61 = vpop.f32.mrf.mxu3 }
 0x2c4   : > { %v1115_v48 = vadd.f32 %v2680_v45, %v1114_v61 }
 0x2c6   : > { %v1158_v12 = vmax.f32 %v1115_v48, 0.0 }
 0x2c7   : > { %v1311_v39 = vpop.f32.mrf.mxu0  ;;  %v1400_v32 = vpop.f32.mrf.mxu1 }
 0x2c8   : > { %v1312_v41 = vadd.f32 %v1311_v39, %v2714_v13  ;;  %v1401_v15 = vadd.f32 %v1400_v32, %v2716_v14 }
 0x2ca   : > { %1477 = vst [vmem:[%s2722_s29 + $0x70] sm:$0xff] %v1312_v41 }
 0x2cb   : > { %1478 = vst [vmem:[%s2722_s29 + $0x78] sm:$0xff] %v1401_v15  ;;  %v1116_v6 = vpop.f32.mrf.mxu3 }
 0x2cc   : > { %v1117_v9 = vadd.f32 %v2680_v45, %v1116_v6 }
 0x2ce   : > { %v1159_v16 = vmax.f32 %v1117_v9, 0.0 }
 0x2cf   : > { %v1314_v17 = vpop.f32.mrf.mxu0  ;;  %v1403_v18 = vpop.f32.mrf.mxu1 }
 0x2d0   : > { %v1178_v19 = vpack.c.bf16 %v1159_v16, %v1158_v12  ;;  %v1315_v22 = vadd.f32 %v1314_v17, %v2714_v13  ;;  %v1404_v23 = vadd.f32 %v1403_v18, %v2716_v14 }
 0x2d2   : > { %1479 = vst [vmem:[%s2722_s29 + $0x80] sm:$0xff] %v1315_v22  ;;  %1353 = vmatmul.bf16.gmra.mxu0 %v1178_v19  ;;  %1442 = vmatmul.bf16.gmra.mxu1 %v1178_v19 }
 0x2d3   : > { %1480 = vst [vmem:[%s2722_s29 + $0x88] sm:$0xff] %v1404_v23  ;;  %v1119_v11 = vpop.f32.mrf.mxu3 }
 0x2d4   : > { %v1120_v52 = vadd.f32 %v2680_v45, %v1119_v11 }
 0x2d6   : > { %v1160_v28 = vmax.f32 %v1120_v52, 0.0 }
 0x2d7   : > { %v1316_v24 = vpop.f32.mrf.mxu0  ;;  %v1405_v20 = vpop.f32.mrf.mxu1 }
 0x2d8   : > { %v1317_v26 = vadd.f32 %v1316_v24, %v2714_v13  ;;  %v1406_v27 = vadd.f32 %v1405_v20, %v2716_v14 }
 0x2da   : > { %1481 = vst [vmem:[%s2722_s29 + $0x90] sm:$0xff] %v1317_v26 }
 0x2db   : > { %1482 = vst [vmem:[%s2722_s29 + $0x98] sm:$0xff] %v1406_v27  ;;  %v1121_v58 = vpop.f32.mrf.mxu3 }
 0x2dc   : > { %v1122_v63 = vadd.f32 %v2680_v45, %v1121_v58 }
 0x2de   : > { %v1161_v29 = vmax.f32 %v1122_v63, 0.0 }
 0x2df   : > { %v1319_v53 = vpop.f32.mrf.mxu0  ;;  %v1408_v0 = vpop.f32.mrf.mxu1 }
 0x2e0   : > { %v1179_v30 = vpack.c.bf16 %v1161_v29, %v1160_v28  ;;  %v1320_v31 = vadd.f32 %v1319_v53, %v2714_v13  ;;  %v1409_v33 = vadd.f32 %v1408_v0, %v2716_v14 }
 0x2e2   : > { %1483 = vst [vmem:[%s2722_s29 + $0xa0] sm:$0xff] %v1320_v31  ;;  %1358 = vmatmul.bf16.gmra.mxu0 %v1179_v30  ;;  %1447 = vmatmul.bf16.gmra.mxu1 %v1179_v30 }
 0x2e3   : > { %1484 = vst [vmem:[%s2722_s29 + $0xa8] sm:$0xff] %v1409_v33  ;;  %v1124_v35 = vpop.f32.mrf.mxu3 }
 0x2e4   : > { %v1125_v42 = vadd.f32 %v2680_v45, %v1124_v35 }
 0x2e6   : > { %v1162_v46 = vmax.f32 %v1125_v42, 0.0 }
 0x2e7   : > { %v1321_v36 = vpop.f32.mrf.mxu0  ;;  %v1410_v37 = vpop.f32.mrf.mxu1 }
 0x2e8   : > { %v1322_v38 = vadd.f32 %v1321_v36, %v2714_v13  ;;  %v1411_v40 = vadd.f32 %v1410_v37, %v2716_v14 }
 0x2ea   : > { %1485 = vst [vmem:[%s2722_s29 + $0xb0] sm:$0xff] %v1322_v38 }
 0x2eb   : > { %1486 = vst [vmem:[%s2722_s29 + $0xb8] sm:$0xff] %v1411_v40  ;;  %v1126_v43 = vpop.f32.mrf.mxu3 }
 0x2ec   : > { %v1127_v44 = vadd.f32 %v2680_v45, %v1126_v43 }
 0x2ee   : > { %v1163_v47 = vmax.f32 %v1127_v44, 0.0 }
 0x2ef   : > { %v1324_v25 = vpop.f32.mrf.mxu0  ;;  %v1413_v34 = vpop.f32.mrf.mxu1 }
 0x2f0   : > { %v1180_v49 = vpack.c.bf16 %v1163_v47, %v1162_v46  ;;  %v1325_v10 = vadd.f32 %v1324_v25, %v2714_v13  ;;  %v1414_v21 = vadd.f32 %v1413_v34, %v2716_v14 }
 0x2f2   : > { %1487 = vst [vmem:[%s2722_s29 + $0xc0] sm:$0xff] %v1325_v10  ;;  %1363 = vmatmul.bf16.gmra.mxu0 %v1180_v49  ;;  %1452 = vmatmul.bf16.gmra.mxu1 %v1180_v49 }
 0x2f3   : > { %1488 = vst [vmem:[%s2722_s29 + $0xc8] sm:$0xff] %v1414_v21  ;;  %v1129_v50 = vpop.f32.mrf.mxu3 }
 0x2f4   : > { %v1130_v57 = vadd.f32 %v2680_v45, %v1129_v50 }
 0x2f6   : > { %v1164_v62 = vmax.f32 %v1130_v57, 0.0 }
 0x2f7   : > { %v1326_v51 = vpop.f32.mrf.mxu0  ;;  %v1415_v54 = vpop.f32.mrf.mxu1 }
 0x2f8   : > { %v1327_v55 = vadd.f32 %v1326_v51, %v2714_v13  ;;  %v1416_v56 = vadd.f32 %v1415_v54, %v2716_v14 }
 0x2fa   : > { %1489 = vst [vmem:[%s2722_s29 + $0xd0] sm:$0xff] %v1327_v55 }
 0x2fb   : > { %1490 = vst [vmem:[%s2722_s29 + $0xd8] sm:$0xff] %v1416_v56  ;;  %v1131_v59 = vpop.f32.mrf.mxu3 }
 0x2fc   : > { %v1132_v60 = vadd.f32 %v2680_v45, %v1131_v59 }
 0x2fe   : > { %v1165_v1 = vmax.f32 %v1132_v60, 0.0 }
 0x2ff   : > { %v1329_v2 = vpop.f32.mrf.mxu0  ;;  %v1418_v3 = vpop.f32.mrf.mxu1 }
 0x300   : > { %v1181_v4 = vpack.c.bf16 %v1165_v1, %v1164_v62  ;;  %v1330_v5 = vadd.f32 %v1329_v2, %v2714_v13  ;;  %v1419_v7 = vadd.f32 %v1418_v3, %v2716_v14 }
 0x302   : > { %1491 = vst [vmem:[%s2722_s29 + $0xe0] sm:$0xff] %v1330_v5  ;;  %1368 = vmatmul.bf16.gmra.mxu0 %v1181_v4  ;;  %1457 = vmatmul.bf16.gmra.mxu1 %v1181_v4 }
 0x303   : > { %1492 = vst [vmem:[%s2722_s29 + $0xe8] sm:$0xff] %v1419_v7 }
 0x307   : > { %v1331_v8 = vpop.f32.mrf.mxu0  ;;  %v1420_v45 = vpop.f32.mrf.mxu1 }
 0x308   : > { %v1332_v61 = vadd.f32 %v1331_v8, %v2714_v13  ;;  %v1421_v39 = vadd.f32 %v1420_v45, %v2716_v14 }
 0x30a   : > { %1493 = vst [vmem:[%s2722_s29 + $0xf0] sm:$0xff] %v1332_v61 }
 0x30b   : > { %1494 = vst [vmem:[%s2722_s29 + $0xf8] sm:$0xff] %v1421_v39 }
 0x30f   : > { %v1334_v32 = vpop.f32.mrf.mxu0  ;;  %v1423_v41 = vpop.f32.mrf.mxu1 }
 0x310   : > { %v1335_v15 = vadd.f32 %v1334_v32, %v2714_v13  ;;  %v1424_v48 = vadd.f32 %v1423_v41, %v2716_v14 }
 0x312   : > { %1495 = vst [vmem:[%s2722_s29 + $0x100] sm:$0xff] %v1335_v15 }
 0x313   : > { %1496 = vst [vmem:[%s2722_s29 + $0x108] sm:$0xff] %v1424_v48 }
 0x317   : > { %v1336_v6 = vpop.f32.mrf.mxu0  ;;  %v1425_v9 = vpop.f32.mrf.mxu1 }
 0x318   : > { %v1337_v12 = vadd.f32 %v1336_v6, %v2714_v13  ;;  %v1426_v16 = vadd.f32 %v1425_v9, %v2716_v14 }
 0x31a   : > { %1497 = vst [vmem:[%s2722_s29 + $0x110] sm:$0xff] %v1337_v12 }
 0x31b   : > { %1498 = vst [vmem:[%s2722_s29 + $0x118] sm:$0xff] %v1426_v16 }
 0x31f   : > { %v1339_v17 = vpop.f32.mrf.mxu0  ;;  %v1428_v18 = vpop.f32.mrf.mxu1 }
 0x320   : > { %v1340_v19 = vadd.f32 %v1339_v17, %v2714_v13  ;;  %v1429_v22 = vadd.f32 %v1428_v18, %v2716_v14 }
 0x322   : > { %1499 = vst [vmem:[%s2722_s29 + $0x120] sm:$0xff] %v1340_v19 }
 0x323   : > { %1500 = vst [vmem:[%s2722_s29 + $0x128] sm:$0xff] %v1429_v22 }
 0x327   : > { %v1341_v23 = vpop.f32.mrf.mxu0  ;;  %v1430_v11 = vpop.f32.mrf.mxu1 }
 0x328   : > { %v1342_v24 = vadd.f32 %v1341_v23, %v2714_v13  ;;  %v1431_v20 = vadd.f32 %v1430_v11, %v2716_v14 }
 0x32a   : > { %1501 = vst [vmem:[%s2722_s29 + $0x130] sm:$0xff] %v1342_v24 }
 0x32b   : > { %1502 = vst [vmem:[%s2722_s29 + $0x138] sm:$0xff] %v1431_v20 }
 0x32f   : > { %v1344_v26 = vpop.f32.mrf.mxu0  ;;  %v1433_v27 = vpop.f32.mrf.mxu1 }
 0x330   : > { %v1345_v52 = vadd.f32 %v1344_v26, %v2714_v13  ;;  %v1434_v58 = vadd.f32 %v1433_v27, %v2716_v14 }
 0x332   : > { %1503 = vst [vmem:[%s2722_s29 + $0x140] sm:$0xff] %v1345_v52 }
 0x333   : > { %1504 = vst [vmem:[%s2722_s29 + $0x148] sm:$0xff] %v1434_v58 }
 0x337   : > { %v1346_v63 = vpop.f32.mrf.mxu0  ;;  %v1435_v28 = vpop.f32.mrf.mxu1 }
 0x338   : > { %v1347_v29 = vadd.f32 %v1346_v63, %v2714_v13  ;;  %v1436_v53 = vadd.f32 %v1435_v28, %v2716_v14 }
 0x33a   : > { %1505 = vst [vmem:[%s2722_s29 + $0x150] sm:$0xff] %v1347_v29 }
 0x33b   : > { %1506 = vst [vmem:[%s2722_s29 + $0x158] sm:$0xff] %v1436_v53 }
 0x33f   : > { %v1349_v0 = vpop.f32.mrf.mxu0  ;;  %v1438_v30 = vpop.f32.mrf.mxu1 }
 0x340   : > { %v1350_v31 = vadd.f32 %v1349_v0, %v2714_v13  ;;  %v1439_v33 = vadd.f32 %v1438_v30, %v2716_v14 }
 0x342   : > { %1507 = vst [vmem:[%s2722_s29 + $0x160] sm:$0xff] %v1350_v31 }
 0x343   : > { %1508 = vst [vmem:[%s2722_s29 + $0x168] sm:$0xff] %v1439_v33 }
 0x347   : > { %v1351_v35 = vpop.f32.mrf.mxu0  ;;  %v1440_v36 = vpop.f32.mrf.mxu1 }
 0x348   : > { %v1352_v37 = vadd.f32 %v1351_v35, %v2714_v13  ;;  %v1441_v38 = vadd.f32 %v1440_v36, %v2716_v14 }
 0x34a   : > { %1509 = vst [vmem:[%s2722_s29 + $0x170] sm:$0xff] %v1352_v37 }
 0x34b   : > { %1510 = vst [vmem:[%s2722_s29 + $0x178] sm:$0xff] %v1441_v38 }
 0x34f   : > { %v1354_v40 = vpop.f32.mrf.mxu0  ;;  %v1443_v42 = vpop.f32.mrf.mxu1 }
 0x350   : > { %v1355_v43 = vadd.f32 %v1354_v40, %v2714_v13  ;;  %v1444_v44 = vadd.f32 %v1443_v42, %v2716_v14 }
 0x352   : > { %1511 = vst [vmem:[%s2722_s29 + $0x180] sm:$0xff] %v1355_v43 }
 0x353   : > { %1512 = vst [vmem:[%s2722_s29 + $0x188] sm:$0xff] %v1444_v44 }
 0x357   : > { %v1356_v46 = vpop.f32.mrf.mxu0  ;;  %v1445_v47 = vpop.f32.mrf.mxu1 }
 0x358   : > { %v1357_v25 = vadd.f32 %v1356_v46, %v2714_v13  ;;  %v1446_v34 = vadd.f32 %v1445_v47, %v2716_v14 }
 0x35a   : > { %1513 = vst [vmem:[%s2722_s29 + $0x190] sm:$0xff] %v1357_v25 }
 0x35b   : > { %1514 = vst [vmem:[%s2722_s29 + $0x198] sm:$0xff] %v1446_v34 }
 0x35f   : > { %v1359_v49 = vpop.f32.mrf.mxu0  ;;  %v1448_v10 = vpop.f32.mrf.mxu1 }
 0x360   : > { %v1360_v21 = vadd.f32 %v1359_v49, %v2714_v13  ;;  %v1449_v50 = vadd.f32 %v1448_v10, %v2716_v14 }
 0x362   : > { %1515 = vst [vmem:[%s2722_s29 + $0x1a0] sm:$0xff] %v1360_v21 }
 0x363   : > { %1516 = vst [vmem:[%s2722_s29 + $0x1a8] sm:$0xff] %v1449_v50 }
 0x367   : > { %v1361_v51 = vpop.f32.mrf.mxu0  ;;  %v1450_v54 = vpop.f32.mrf.mxu1 }
 0x368   : > { %v1362_v55 = vadd.f32 %v1361_v51, %v2714_v13  ;;  %v1451_v56 = vadd.f32 %v1450_v54, %v2716_v14 }
 0x36a   : > { %1517 = vst [vmem:[%s2722_s29 + $0x1b0] sm:$0xff] %v1362_v55 }
 0x36b   : > { %1518 = vst [vmem:[%s2722_s29 + $0x1b8] sm:$0xff] %v1451_v56 }
 0x36f   : > { %v1364_v57 = vpop.f32.mrf.mxu0  ;;  %v1453_v59 = vpop.f32.mrf.mxu1 }
 0x370   : > { %v1365_v60 = vadd.f32 %v1364_v57, %v2714_v13  ;;  %v1454_v62 = vadd.f32 %v1453_v59, %v2716_v14 }
 0x372   : > { %1519 = vst [vmem:[%s2722_s29 + $0x1c0] sm:$0xff] %v1365_v60 }
 0x373   : > { %1520 = vst [vmem:[%s2722_s29 + $0x1c8] sm:$0xff] %v1454_v62 }
 0x377   : > { %v1366_v1 = vpop.f32.mrf.mxu0  ;;  %v1455_v2 = vpop.f32.mrf.mxu1 }
 0x378   : > { %v1367_v3 = vadd.f32 %v1366_v1, %v2714_v13  ;;  %v1456_v4 = vadd.f32 %v1455_v2, %v2716_v14 }
 0x37a   : > { %1521 = vst [vmem:[%s2722_s29 + $0x1d0] sm:$0xff] %v1367_v3 }
 0x37b   : > { %1522 = vst [vmem:[%s2722_s29 + $0x1d8] sm:$0xff] %v1456_v4 }
 0x37f   : > { %v1369_v5 = vpop.f32.mrf.mxu0  ;;  %v1458_v7 = vpop.f32.mrf.mxu1 }
 0x380   : > { %v1370_v8 = vadd.f32 %v1369_v5, %v2714_v13  ;;  %v1459_v45 = vadd.f32 %v1458_v7, %v2716_v14 }
 0x382   : > { %1523 = vst [vmem:[%s2722_s29 + $0x1e0] sm:$0xff] %v1370_v8 }
 0x383   : > { %1524 = vst [vmem:[%s2722_s29 + $0x1e8] sm:$0xff] %v1459_v45 }
 0x387   : > { %v1371_v61 = vpop.f32.mrf.mxu0  ;;  %v1460_v39 = vpop.f32.mrf.mxu1 }
 0x388   : > { %v1372_v32 = vadd.f32 %v1371_v61, %v2714_v13  ;;  %v1461_v41 = vadd.f32 %v1460_v39, %v2716_v14 }
 0x38a   : > { %1525 = vst [vmem:[%s2722_s29 + $0x1f0] sm:$0xff] %v1372_v32 }
 0x38b   : > { %1526 = vst [vmem:[%s2722_s29 + $0x1f8] sm:$0xff] %v1461_v41 }
 0x38c   : > { %2266 = shalt.err (!%p2263_p9)
}
 0x38d   : > { %s2330_s14 = smov 256   ;;  %s2331_s8 = smov 16  }
 0x38e   : > { %1973 = dma.vmem_to_hbm [thread:$0]  (%p2457_p0), %s1542_s18, 8192, %s1544_s7, %s1528_s28, %s2330_s14, %s2330_s14, %s2331_s8  }
 0x38f PF: > { %s1558_s29 = sand.u32 1, %s2305_s21   ;;  %p2914_p10 = scmp.ge.s32.totalorder %s2317_s24, 2 }
 0x390   : > { %s1559_s11 = scalar_lea.sflag [#allocation4], %s1558_s29 }
 0x391   : > { %p1996_p11 = pnand %p2914_p10, %p2463_p6 }
 0x393   : > { %p1997_p12 = pneg %p1996_p11 }
 0x395   : > { %2300 = dma.done.wait (%p1997_p12), %s1559_s11, 8192  }
 0x396   : > { %2302 = vsyncadd (%p1997_p12), %s1559_s11, 4294959104  ;;  %p22_p2 = scmp.ge.s32.totalorder %s2433_s17, 4   ;;  %s2915_s21 = smov %s2309_s22 }
 0x397   : > { %s2916_s22 = smov %s2313_s23  ;;  %s2917_s23 = smov %s2445_s20 }
 0x398   : > { %s2918_s24 = smov %s2433_s17  ;;  %24 = sbr.rel (!%p22_p2) target bundleno = 10 (0xa), region = 110 }
 0x39d   :  { %1565 = vsyncpa [#allocation3], 1 }
 0x39e   :  { %1567 = vsyncpa [#allocation3 + $0x1], 1 }
 0x39f   :  { %1568 = vsyncpa [#allocation6], 1 }
 0x3a0   :  { %1569 = vsyncpa [#allocation9], 1 }
 0x3a1   :  { %1570 = vsyncpa [#allocation12], 1 }
 0x3a2   :  { %1571 = vsyncpa [#allocation4], 1 }
 0x3a3   :  { %1573 = vsyncpa [#allocation4 + $0x1], 1 }

// kernel: autoencoder_forward.1
= control target key start
LH: loop header
LB: loop body
LE: loop exit
PB: predicated region body
PF: predicated region fallthrough
CT: control target
= control target key end

     0   :  { %s2898_s0 = inlined_call_operand.hbm [shape: f32[512,256], index: 0, kind: input, shape index: {}]   ;;  %s2899_s1 = inlined_call_operand.hbm [shape: bf16[256,128], index: 1, kind: input, shape index: {}]   ;;  %s2900_s2 = inlined_call_operand.hbm [shape: bf16[128,128], index: 2, kind: input, shape index: {}]   ;;  %s2901_s3 = inlined_call_operand.hbm [shape: bf16[128,128], index: 3, kind: input, shape index: {}]   ;;  %s2902_s4 = inlined_call_operand.hbm [shape: bf16[128,256], index: 4, kind: input, shape index: {}]   ;;  %s2903_s5 = inlined_call_operand.hbm [shape: f32[4,256], index: 5, kind: input, shape index: {}]   ;;  %s2904_s6 = inlined_call_operand.hbm [shape: f32[512,256], index: 6, kind: output, shape index: {}]  }
   0x1   :  { %2905 = sst [smem:[#allocation19_spill]] %s2899_s1 }
   0x2   :  { %11 = vsyncpa [#allocation3], 0 }
   0x3   :  { %13 = vsyncpa [#allocation3 + $0x1], 0 }
   0x4   :  { %14 = vsyncpa [#allocation6], 0 }
   0x5   :  { %15 = vsyncpa [#allocation9], 0 }
   0x6   :  { %16 = vsyncpa [#allocation12], 0 }
   0x7   :  { %17 = vsyncpa [#allocation4], 0 }
   0x8   :  { %19 = vsyncpa [#allocation4 + $0x1], 0  ;;  %s2367_s21 = smov 0   ;;  %s2369_s22 = smov 0  }
   0x9   :  { %s2371_s23 = smov 0   ;;  %s2373_s24 = smov 0  }
   0xa LB: > { %s2906_s1 = sld [smem:[#allocation19_spill]]  ;;  %s2391_s28 = sadd.s32 4294967295, %s2317_s24   ;;  %s2317_s24 = sphi %s2373_s24, %s2918_s24   ;;  %s2313_s23 = sphi %s2371_s23, %s2917_s23   ;;  %s2309_s22 = sphi %s2369_s22, %s2916_s22   ;;  %s2305_s21 = sphi %s2367_s21, %s2915_s21  }
   0xb   : > { %p1666_p0 = scmp.ge.s32.totalorder %s2317_s24, 1  ;;  %p46_p1 = scmp.eq.s32.totalorder %s2391_s28, 0 }
   0xc   : > { %p187_p2 = scmp.lt.s32.totalorder %s2317_s24, 3  ;;  %s2319_s30 = smov [#allocation5]  }
   0xd   : > { %s200_s7 = sshll.u32 %s2319_s30, 4  ;;  %s226_s10 = sshll.u32 %s2901_s3, 4  ;;  %s201_s7 = int_to_ptr.vmem [resolvable:$true] %s200_s7  ;;  %s227_s10 = int_to_ptr.hbm [resolvable:$true] %s226_s10 }
   0xe   : > { %p2396_p3 = pnand %p1666_p0, %p187_p2  ;;  %s212_s14 = sshll.u32 %s2900_s2, 4  ;;  %s213_s14 = int_to_ptr.hbm [resolvable:$true] %s212_s14 }
   0xf   : > { %s2320_s15 = smov [#allocation8]   ;;  %s2321_s17 = smov 64  }
  0x10   : > { %s198_s27 = sshll.u32 %s2906_s1, 4  ;;  %p1975_p4 = pneg %p2396_p3  ;;  %s199_s27 = int_to_ptr.hbm [resolvable:$true] %s198_s27 }
  0x11   : > { %s228_s16 = sshll.u32 %s2320_s15, 4  ;;  %s2322_s18 = smov 4   ;;  %s229_s16 = int_to_ptr.vmem [resolvable:$true] %s228_s16 }
  0x12   : > { %p2408_p6 = pnand %p1975_p4, %p46_p1  ;;  %s240_s25 = sshll.u32 %s2902_s4, 4  ;;  %s241_s25 = int_to_ptr.hbm [resolvable:$true] %s240_s25 }
  0x13   : > { %s2323_s26 = smov [#allocation7]   ;;  %s2325_s8 = smov 128  }
  0x14   : > { %1978 = dma.hbm_to_vmem [thread:$0]  (!%p2408_p6), %s199_s27, 2048, %s201_s7, [#allocation6], %s2321_s17, %s2321_s17, %s2322_s18  }
  0x15   : > { %1984 = dma.hbm_to_vmem [thread:$0]  (!%p2408_p6), %s227_s10, 1024, %s229_s16, [#allocation9], %s2321_s17, %s2321_s17, %s2322_s18  }
  0x16   : > { %s214_s30 = sshll.u32 %s2323_s26, 4  ;;  %s2324_s27 = smov [#allocation10]   ;;  %s215_s30 = int_to_ptr.vmem [resolvable:$true] %s214_s30 }
  0x17   : > { %1981 = dma.hbm_to_vmem [thread:$0]  (!%p2408_p6), %s213_s14, 1024, %s215_s30, [#allocation6], %s2321_s17, %s2321_s17, %s2322_s18  }
  0x18   : > { %s242_s7 = sshll.u32 %s2324_s27, 4  ;;  %s2326_s9 = smov 8   ;;  %s243_s7 = int_to_ptr.vmem [resolvable:$true] %s242_s7 }
  0x19   : > { %1987 = dma.hbm_to_vmem [thread:$0]  (!%p2408_p6), %s241_s25, 2048, %s243_s7, [#allocation9], %s2325_s8, %s2325_s8, %s2326_s9  }
  0x1a   : > { %s255_s13 = sshll.u32 %s2903_s5, 4  ;;  %s2327_s14 = smov [#allocation11]   ;;  %s256_s13 = int_to_ptr.hbm [resolvable:$true] %s255_s13 }
  0x1b   : > { %s257_s15 = sshll.u32 %s2327_s14, 4  ;;  %s1665_s16 = sadd.s32 4294967294, %s2317_s24   ;;  %s258_s15 = int_to_ptr.vmem [resolvable:$true] %s257_s15 }
  0x1c   : > { %1990 = dma.hbm_to_vmem [thread:$0]  (!%p2408_p6), %s256_s13, 128, %s258_s15, [#allocation12]  }
  0x1d   : > { %s2433_s17 = sadd.s32 1, %s2317_s24   ;;  %s32_s18 = sadd.s32 1, %s2313_s23 }
  0x1e   : > { %s29_s19 = ssub.s32 %s2317_s24, %s2433_s17  ;;  %p39_p7 = scmp.ne.s32.totalorder %s2313_s23, %s2309_s22 }
  0x1f   : > { %p30_p8 = scmp.eq.s32.totalorder %s29_s19, 0  ;;  %p40_p9 = scmp.eq.s32.totalorder %s2317_s24, 0 }
  0x20   : > { %p45_p10 = scmp.ne.s32.totalorder %s2309_s22, %s2305_s21  ;;  %p174_p11 = scmp.eq.s32.totalorder %s2391_s28, 1 }
  0x21   : > { %s2445_s20 = scalar_select %p30_p8, %s2313_s23, %s32_s18  }
  0x22   : > { %p2447_p12 = por %p40_p9, %p39_p7  ;;  %p2453_p13 = por %p46_p1, %p45_p10 }
  0x23   : > { %p2457_p0 = por %p174_p11, %p39_p7  ;;  %p180_p2 = scmp.eq.s32.totalorder %s1665_s16, 1 }
  0x24   : > { %p2004_p4 = scmp.lt.s32.totalorder %s2317_s24, 2  ;;  %s268_s30 = sand.u32 1, %s2313_s23  }
  0x25   : > { %p2463_p6 = por %p180_p2, %p45_p10  ;;  %s1673_s7 = sshll.u32 %s268_s30, 9 }
  0x26   : > { %s1884_s8 = sshll.u32 %s2317_s24, 9  ;;  %s272_s14 = scalar_lea.vmem [#allocation2], %s1673_s7 }
  0x27   : > { %s278_s12 = scalar_lea.hbm %s2898_s0, %s1884_s8  ;;  %s281_s15 = sshll.u32 %s272_s14, 4  ;;  %s282_s15 = int_to_ptr.vmem [resolvable:$true] %s281_s15 }
  0x28   : > { %s279_s13 = sshll.u32 %s278_s12, 4  ;;  %p2473_p7 = pnand %p2004_p4, %p2447_p12  ;;  %s280_s13 = int_to_ptr.hbm [resolvable:$true] %s279_s13 }
  0x29   : > { %s269_s18 = scalar_lea.sflag [#allocation3], %s268_s30  ;;  %s2209_s19 = sshra.s32 %s280_s13, 4  ;;  %s2210_s19 = int_to_ptr.hbm [resolvable:$true] %s2209_s19 }
  0x2a   : > { %s2211_s1 = scalar_lea.hbm %s2210_s19, 512  ;;  %p2213_p9 = pneg %p2473_p7 }
  0x2b   : > { %p2212_p8 = scmp.ne.s32.totalorder %s2210_s19, %s2211_s1  ;;  %s2216_s9 = scalar_lea.hbm %s2898_s0, 1024 }
  0x2c   : > { %p2217_p12 = scmp.lt.s32.totalorder %s2210_s19, %s2898_s0  ;;  %p2218_p2 = scmp.lt.s32.totalorder %s2216_s9, %s2211_s1 }
  0x2d   : > { %p2214_p10 = pnand %p2213_p9, %p2212_p8 }
  0x2e   : > { %p2219_p4 = por %p2218_p2, %p2217_p12 }
  0x2f   : > { %p2215_p11 = pneg %p2214_p10 }
  0x31   : > { %p2220_p5 = pnand %p2219_p4, %p2215_p11 }
  0x33   : > { %2223 = shalt.err (!%p2220_p5)
}
  0x34   : > { %s2328_s30 = smov 256   ;;  %s2329_s12 = smov 16  }
  0x35   : > { %1994 = dma.hbm_to_vmem [thread:$0]  (!%p2473_p7), %s280_s13, 8192, %s282_s15, %s269_s18, %s2328_s30, %s2328_s30, %s2329_s12  }
  0x36   : > { %293 = sbr.rel (%p2396_p3) target bundleno = 911 (0x38f), region = 44  ;;  %s2490_s14 = sand.u32 (!%p2396_p3), 1, %s2309_s22  }
  0x37   : > { %s1678_s19 = sshll.u32 (!%p2396_p3), %s2490_s14, 9  ;;  %s296_s1 = scalar_lea.sflag (!%p2396_p3), [#allocation3], %s2490_s14 }
  0x38   : > { %s2496_s8 = scalar_lea.vmem (!%p2396_p3), [#allocation2], %s1678_s19 }
  0x3b   : > { %2284 = dma.done.wait (%p2453_p13), %s296_s1, 8192  }
  0x3c   : > { %2286 = vsyncadd (%p2453_p13), %s296_s1, 4294959104 }
  0x3d   : > { %2288 = dma.done.wait (%p46_p1), [#allocation6], 3072  }
  0x3e   : > { %2290 = vsyncadd (%p46_p1), [#allocation6], 4294964224 }
  0x3f   : > { %2292 = dma.done.wait (%p46_p1), [#allocation9], 3072  }
  0x40   : > { %2294 = vsyncadd (%p46_p1), [#allocation9], 4294964224 }
  0x41   : > { %2296 = dma.done.wait (%p46_p1), [#allocation12], 128  }
  0x42   : > { %2298 = vsyncadd (%p46_p1), [#allocation12], 4294967168  ;;  %v1892_v0 = vld [vmem:[#allocation5 + $0x38] sm:$0xff]  ;;  %v1891_v2 = vld [vmem:[#allocation5 + $0x30] sm:$0xff]  ;;  %s2722_s29 = scalar_lea.vmem [#allocation13], %s1678_s19  ;;  %s1934_s11 = sshll.u32 %s2391_s28, 9 }
  0x43   : > { %v1900_v1 = vld [vmem:[#allocation5 + $0x78] sm:$0xff]  ;;  %582 = vmatpush.bf16.msra.mxu0 %v1892_v0  ;;  %v1899_v3 = vld [vmem:[#allocation5 + $0x70] sm:$0xff]  ;;  %1935 = vmatpush.bf16.msra.mxu2 %v1892_v0  ;;  %v1890_v4 = vld [vmem:[#allocation5 + $0x28] sm:$0xff]  ;;  %s1540_s16 = scalar_lea.hbm %s2904_s6, %s1934_s11  ;;  %s1541_s18 = sshll.u32 %s2722_s29, 4  ;;  %s1542_s18 = int_to_ptr.vmem [resolvable:$true] %s1541_s18 }
  0x44   : > { %671 = vmatpush.bf16.msra.mxu1 %v1900_v1  ;;  %1943 = vmatpush.bf16.msra.mxu3 %v1900_v1  ;;  %v1898_v5 = vld [vmem:[#allocation5 + $0x68] sm:$0xff]  ;;  %v1889_v6 = vld [vmem:[#allocation5 + $0x20] sm:$0xff]  ;;  %v1888_v8 = vld [vmem:[#allocation5 + $0x18] sm:$0xff]  ;;  %s1543_s7 = sshll.u32 %s1540_s16, 4  ;;  %s1528_s28 = scalar_lea.sflag [#allocation4], %s2490_s14  ;;  %s1544_s7 = int_to_ptr.hbm [resolvable:$true] %s1543_s7 }
  0x45   : > { %v1897_v7 = vld [vmem:[#allocation5 + $0x60] sm:$0xff]  ;;  %v1896_v9 = vld [vmem:[#allocation5 + $0x58] sm:$0xff]  ;;  %v1887_v10 = vld [vmem:[#allocation5 + $0x10] sm:$0xff]  ;;  %s2253_s9 = sshra.s32 %s1544_s7, 4  ;;  %s2259_s12 = scalar_lea.hbm %s2904_s6, 1024  ;;  %s2254_s9 = int_to_ptr.hbm [resolvable:$true] %s2253_s9 }
  0x46   : > { %v1895_v11 = vld [vmem:[#allocation5 + $0x50] sm:$0xff]  ;;  %v1886_v12 = vld [vmem:[#allocation5 + $0x8] sm:$0xff]  ;;  %v1885_v14 = vld [vmem:[#allocation5] sm:$0xff]  ;;  %s2255_s10 = scalar_lea.hbm %s2254_s9, 512  ;;  %p2260_p13 = scmp.lt.s32.totalorder %s2254_s9, %s2904_s6 }
  0x47   : > { %583 = vmatpush.bf16.msra.mxu0 %v1891_v2  ;;  %1936 = vmatpush.bf16.msra.mxu2 %v1891_v2  ;;  %v1894_v13 = vld [vmem:[#allocation5 + $0x48] sm:$0xff]  ;;  %v1893_v15 = vld [vmem:[#allocation5 + $0x40] sm:$0xff]  ;;  %v358_v17 = vld [vmem:[%s2496_s8 + $0x10] sm:$0xff]  ;;  %p2256_p1 = scmp.ne.s32.totalorder %s2254_s9, %s2255_s10  ;;  %p2261_p7 = scmp.lt.s32.totalorder %s2259_s12, %s2255_s10 }
  0x48   : > { %672 = vmatpush.bf16.msra.mxu1 %v1899_v3  ;;  %1944 = vmatpush.bf16.msra.mxu3 %v1899_v3  ;;  %v356_v16 = vld [vmem:[%s2496_s8] sm:$0xff]  ;;  %v357_v18 = vld [vmem:[%s2496_s8 + $0x8] sm:$0xff]  ;;  %v359_v19 = vld [vmem:[%s2496_s8 + $0x18] sm:$0xff] }
  0x49   : > { %v388_v20 = vld [vmem:[%s2496_s8 + $0x100] sm:$0xff]  ;;  %v390_v21 = vld [vmem:[%s2496_s8 + $0x110] sm:$0xff]  ;;  %v389_v22 = vld [vmem:[%s2496_s8 + $0x108] sm:$0xff]  ;;  %v420_v25 = vpack.c.bf16 %v358_v17, %v356_v16  ;;  %v421_v26 = vpack.c.bf16 %v359_v19, %v357_v18  ;;  %p2257_p3 = pnand %p2256_p1, %p2457_p0  ;;  %p2262_p8 = por %p2261_p7, %p2260_p13 }
  0x4a   : > { %v391_v23 = vld [vmem:[%s2496_s8 + $0x118] sm:$0xff]  ;;  %v436_v27 = vpack.c.bf16 %v390_v21, %v388_v20  ;;  %v1907_v29 = vld [vmem:[#allocation7 + $0x30] sm:$0xff]  ;;  %v1906_v30 = vld [vmem:[#allocation7 + $0x28] sm:$0xff] }
  0x4b   : > { %584 = vmatpush.bf16.msra.mxu0 %v1890_v4  ;;  %1937 = vmatpush.bf16.msra.mxu2 %v1890_v4  ;;  %v1908_v24 = vld [vmem:[#allocation7 + $0x38] sm:$0xff]  ;;  %v437_v28 = vpack.c.bf16 %v391_v23, %v389_v22  ;;  %v360_v31 = vld [vmem:[%s2496_s8 + $0x20] sm:$0xff]  ;;  %v362_v32 = vld [vmem:[%s2496_s8 + $0x30] sm:$0xff]  ;;  %p2258_p5 = pneg %p2257_p3 }
  0x4c   : > { %673 = vmatpush.bf16.msra.mxu1 %v1898_v5  ;;  %1945 = vmatpush.bf16.msra.mxu3 %v1898_v5  ;;  %v361_v33 = vld [vmem:[%s2496_s8 + $0x28] sm:$0xff]  ;;  %v363_v34 = vld [vmem:[%s2496_s8 + $0x38] sm:$0xff]  ;;  %v392_v35 = vld [vmem:[%s2496_s8 + $0x120] sm:$0xff]  ;;  %v422_v39 = vpack.c.bf16 %v362_v32, %v360_v31 }
  0x4d   : > { %v394_v36 = vld [vmem:[%s2496_s8 + $0x130] sm:$0xff]  ;;  %v393_v37 = vld [vmem:[%s2496_s8 + $0x128] sm:$0xff]  ;;  %v395_v38 = vld [vmem:[%s2496_s8 + $0x138] sm:$0xff]  ;;  %v423_v40 = vpack.c.bf16 %v363_v34, %v361_v33  ;;  %p2263_p9 = pnand %p2262_p8, %p2258_p5 }
  0x4e   : > { %v438_v41 = vpack.c.bf16 %v394_v36, %v392_v35  ;;  %v439_v42 = vpack.c.bf16 %v395_v38, %v393_v37  ;;  %v1905_v43 = vld [vmem:[#allocation7 + $0x20] sm:$0xff]  ;;  %v366_v45 = vld [vmem:[%s2496_s8 + $0x50] sm:$0xff]  ;;  %v365_v46 = vld [vmem:[%s2496_s8 + $0x48] sm:$0xff] }
  0x4f   : > { %585 = vmatpush.bf16.msra.mxu0 %v1889_v6  ;;  %1938 = vmatpush.bf16.msra.mxu2 %v1889_v6  ;;  %v364_v44 = vld [vmem:[%s2496_s8 + $0x40] sm:$0xff]  ;;  %v367_v47 = vld [vmem:[%s2496_s8 + $0x58] sm:$0xff]  ;;  %v398_v49 = vld [vmem:[%s2496_s8 + $0x150] sm:$0xff] }
  0x50   : > { %674 = vmatpush.bf16.msra.mxu1 %v1897_v7  ;;  %1946 = vmatpush.bf16.msra.mxu3 %v1897_v7  ;;  %v396_v48 = vld [vmem:[%s2496_s8 + $0x140] sm:$0xff]  ;;  %v397_v50 = vld [vmem:[%s2496_s8 + $0x148] sm:$0xff]  ;;  %v399_v51 = vld [vmem:[%s2496_s8 + $0x158] sm:$0xff]  ;;  %v424_v52 = vpack.c.bf16 %v366_v45, %v364_v44  ;;  %v425_v53 = vpack.c.bf16 %v367_v47, %v365_v46 }
  0x51   : > { %v440_v54 = vpack.c.bf16 %v398_v49, %v396_v48  ;;  %v441_v55 = vpack.c.bf16 %v399_v51, %v397_v50  ;;  %v1904_v56 = vld [vmem:[#allocation7 + $0x18] sm:$0xff]  ;;  %v368_v57 = vld [vmem:[%s2496_s8 + $0x60] sm:$0xff]  ;;  %v370_v58 = vld [vmem:[%s2496_s8 + $0x70] sm:$0xff] }
  0x52   : > { %v369_v59 = vld [vmem:[%s2496_s8 + $0x68] sm:$0xff]  ;;  %v371_v60 = vld [vmem:[%s2496_s8 + $0x78] sm:$0xff]  ;;  %v400_v61 = vld [vmem:[%s2496_s8 + $0x160] sm:$0xff]  ;;  %v426_v1 = vpack.c.bf16 %v370_v58, %v368_v57 }
  0x53   : > { %586 = vmatpush.bf16.msra.mxu0 %v1888_v8  ;;  %1939 = vmatpush.bf16.msra.mxu2 %v1888_v8  ;;  %v402_v62 = vld [vmem:[%s2496_s8 + $0x170] sm:$0xff]  ;;  %v401_v63 = vld [vmem:[%s2496_s8 + $0x168] sm:$0xff]  ;;  %v403_v0 = vld [vmem:[%s2496_s8 + $0x178] sm:$0xff]  ;;  %v427_v2 = vpack.c.bf16 %v371_v60, %v369_v59 }
  0x54   : > { %675 = vmatpush.bf16.msra.mxu1 %v1896_v9  ;;  %1947 = vmatpush.bf16.msra.mxu3 %v1896_v9  ;;  %v442_v3 = vpack.c.bf16 %v402_v62, %v400_v61  ;;  %v443_v4 = vpack.c.bf16 %v403_v0, %v401_v63  ;;  %v1903_v5 = vld [vmem:[#allocation7 + $0x10] sm:$0xff]  ;;  %v372_v6 = vld [vmem:[%s2496_s8 + $0x80] sm:$0xff]  ;;  %v373_v8 = vld [vmem:[%s2496_s8 + $0x88] sm:$0xff] }
  0x55   : > { %v374_v7 = vld [vmem:[%s2496_s8 + $0x90] sm:$0xff]  ;;  %v375_v9 = vld [vmem:[%s2496_s8 + $0x98] sm:$0xff]  ;;  %v1902_v18 = vld [vmem:[#allocation7 + $0x8] sm:$0xff] }
  0x56   : > { %v376_v19 = vld [vmem:[%s2496_s8 + $0xa0] sm:$0xff]  ;;  %v378_v20 = vld [vmem:[%s2496_s8 + $0xb0] sm:$0xff]  ;;  %v377_v21 = vld [vmem:[%s2496_s8 + $0xa8] sm:$0xff] }
  0x57   : > { %587 = vmatpush.bf16.msra.mxu0 %v1887_v10  ;;  %1940 = vmatpush.bf16.msra.mxu2 %v1887_v10  ;;  %v404_v10 = vld [vmem:[%s2496_s8 + $0x180] sm:$0xff]  ;;  %v379_v22 = vld [vmem:[%s2496_s8 + $0xb8] sm:$0xff]  ;;  %v382_v32 = vld [vmem:[%s2496_s8 + $0xd0] sm:$0xff] }
  0x58   : > { %676 = vmatpush.bf16.msra.mxu1 %v1895_v11  ;;  %1948 = vmatpush.bf16.msra.mxu3 %v1895_v11  ;;  %v406_v11 = vld [vmem:[%s2496_s8 + $0x190] sm:$0xff]  ;;  %v408_v23 = vld [vmem:[%s2496_s8 + $0x1a0] sm:$0xff]  ;;  %v381_v33 = vld [vmem:[%s2496_s8 + $0xc8] sm:$0xff] }
  0x59   : > { %v444_v16 = vpack.c.bf16 %v406_v11, %v404_v10  ;;  %v380_v31 = vld [vmem:[%s2496_s8 + $0xc0] sm:$0xff]  ;;  %v383_v34 = vld [vmem:[%s2496_s8 + $0xd8] sm:$0xff]  ;;  %v414_v36 = vld [vmem:[%s2496_s8 + $0x1d0] sm:$0xff] }
  0x5a   : > { %v412_v35 = vld [vmem:[%s2496_s8 + $0x1c0] sm:$0xff]  ;;  %v413_v37 = vld [vmem:[%s2496_s8 + $0x1c8] sm:$0xff]  ;;  %v415_v38 = vld [vmem:[%s2496_s8 + $0x1d8] sm:$0xff] }
  0x5b   : > { %588 = vmatpush.bf16.msra.mxu0 %v1886_v12  ;;  %1941 = vmatpush.bf16.msra.mxu2 %v1886_v12  ;;  %v405_v12 = vld [vmem:[%s2496_s8 + $0x188] sm:$0xff]  ;;  %v384_v44 = vld [vmem:[%s2496_s8 + $0xe0] sm:$0xff]  ;;  %v386_v45 = vld [vmem:[%s2496_s8 + $0xf0] sm:$0xff] }
  0x5c   : > { %677 = vmatpush.bf16.msra.mxu1 %v1894_v13  ;;  %1949 = vmatpush.bf16.msra.mxu3 %v1894_v13  ;;  %v407_v13 = vld [vmem:[%s2496_s8 + $0x198] sm:$0xff]  ;;  %v385_v46 = vld [vmem:[%s2496_s8 + $0xe8] sm:$0xff]  ;;  %v416_v48 = vld [vmem:[%s2496_s8 + $0x1e0] sm:$0xff] }
  0x5d   : > { %v445_v17 = vpack.c.bf16 %v407_v13, %v405_v12  ;;  %v387_v47 = vld [vmem:[%s2496_s8 + $0xf8] sm:$0xff]  ;;  %v418_v49 = vld [vmem:[%s2496_s8 + $0x1f0] sm:$0xff]  ;;  %v417_v50 = vld [vmem:[%s2496_s8 + $0x1e8] sm:$0xff] }
  0x5e   : > { %v419_v51 = vld [vmem:[%s2496_s8 + $0x1f8] sm:$0xff]  ;;  %v2578_v58 = vld [vmem:[#allocation11] ss:$0 sm:$0xff]  ;;  %v1915_v10 = vld [vmem:[#allocation8 + $0x30] sm:$0xff] }
  0x5f   : > { %589 = vmatpush.bf16.msra.mxu0 %v1885_v14  ;;  %1942 = vmatpush.bf16.msra.mxu2 %v1885_v14  ;;  %v428_v14 = vpack.c.bf16 %v374_v7, %v372_v6  ;;  %v1916_v60 = vld [vmem:[#allocation8 + $0x38] sm:$0xff] }
  0x60   : > { %678 = vmatpush.bf16.msra.mxu1 %v1893_v15  ;;  %1950 = vmatpush.bf16.msra.mxu3 %v1893_v15  ;;  %v429_v15 = vpack.c.bf16 %v375_v9, %v373_v8 }
  0x62   : > { %590 = vmatmul.bf16.vlgmr.msra.gmra.mxu0 %v420_v25  ;;  %630 = vmatmul.bf16.vlgmr.msra.gmra.mxu2 %v436_v27  ;;  %v409_v25 = vld [vmem:[%s2496_s8 + $0x1a8] sm:$0xff]  ;;  %v430_v27 = vpack.c.bf16 %v378_v20, %v376_v19 }
  0x63   : > { %874 = vmatpush.bf16.msrb.mxu2 %v1908_v24  ;;  %679 = vmatmul.bf16.vlgmr.msra.gmra.mxu1 %v421_v26  ;;  %v410_v24 = vld [vmem:[%s2496_s8 + $0x1b0] sm:$0xff]  ;;  %v411_v26 = vld [vmem:[%s2496_s8 + $0x1b8] sm:$0xff] }
  0x64   : > { %719 = vmatmul.bf16.vlgmr.msra.gmra.mxu3 %v437_v28  ;;  %v431_v28 = vpack.c.bf16 %v379_v22, %v377_v21 }
  0x65   : > { %1045 = vmatpush.bf16.msrb.mxu3 %v1916_v60 }
  0x67   : > { %875 = vmatpush.bf16.msrb.mxu2 %v1907_v29  ;;  %v446_v29 = vpack.c.bf16 %v410_v24, %v408_v23  ;;  %v1914_v24 = vld [vmem:[#allocation8 + $0x28] sm:$0xff] }
  0x69   : > { %1046 = vmatpush.bf16.msrb.mxu3 %v1915_v10 }
  0x6b   : > { %876 = vmatpush.bf16.msrb.mxu2 %v1906_v30  ;;  %v447_v30 = vpack.c.bf16 %v411_v26, %v409_v25 }
  0x6d   : > { %1047 = vmatpush.bf16.msrb.mxu3 %v1914_v24 }
  0x6f   : > { %877 = vmatpush.bf16.msrb.mxu2 %v1905_v43  ;;  %v1901_v43 = vld [vmem:[#allocation7] sm:$0xff] }
  0x72   : > { %595 = vmatmul.bf16.gmra.mxu0 %v422_v39  ;;  %635 = vmatmul.bf16.gmra.mxu2 %v438_v41  ;;  %v432_v39 = vpack.c.bf16 %v382_v32, %v380_v31  ;;  %v448_v41 = vpack.c.bf16 %v414_v36, %v412_v35 }
  0x73   : > { %684 = vmatmul.bf16.gmra.mxu1 %v423_v40  ;;  %878 = vmatpush.bf16.msrb.mxu2 %v1904_v56  ;;  %v433_v40 = vpack.c.bf16 %v383_v34, %v381_v33 }
  0x74   : > { %724 = vmatmul.bf16.gmra.mxu3 %v439_v42  ;;  %v449_v42 = vpack.c.bf16 %v415_v38, %v413_v37  ;;  %v1913_v38 = vld [vmem:[#allocation8 + $0x20] sm:$0xff] }
  0x75   : > { %1048 = vmatpush.bf16.msrb.mxu3 %v1913_v38 }
  0x77   : > { %879 = vmatpush.bf16.msrb.mxu2 %v1903_v5 }
  0x7b   : > { %880 = vmatpush.bf16.msrb.mxu2 %v1902_v18 }
  0x7f   : > { %881 = vmatpush.bf16.msrb.mxu2 %v1901_v43 }
  0x82   : > { %600 = vmatmul.bf16.gmra.mxu0 %v424_v52  ;;  %640 = vmatmul.bf16.gmra.mxu2 %v440_v54  ;;  %v434_v52 = vpack.c.bf16 %v386_v45, %v384_v44  ;;  %v450_v54 = vpack.c.bf16 %v418_v49, %v416_v48 }
  0x83   : > { %689 = vmatmul.bf16.gmra.mxu1 %v425_v53  ;;  %v435_v53 = vpack.c.bf16 %v387_v47, %v385_v46 }
  0x84   : > { %729 = vmatmul.bf16.gmra.mxu3 %v441_v55  ;;  %v451_v55 = vpack.c.bf16 %v419_v51, %v417_v50 }
  0x92   : > { %605 = vmatmul.bf16.gmra.mxu0 %v426_v1  ;;  %645 = vmatmul.bf16.gmra.mxu2 %v442_v3 }
  0x93   : > { %694 = vmatmul.bf16.gmra.mxu1 %v427_v2 }
  0x94   : > { %734 = vmatmul.bf16.gmra.mxu3 %v443_v4 }
  0xa2   : > { %610 = vmatmul.bf16.gmra.mxu0 %v428_v14  ;;  %650 = vmatmul.bf16.gmra.mxu2 %v444_v16 }
  0xa3   : > { %699 = vmatmul.bf16.gmra.mxu1 %v429_v15 }
  0xa4   : > { %739 = vmatmul.bf16.gmra.mxu3 %v445_v17 }
  0xb2   : > { %615 = vmatmul.bf16.gmra.mxu0 %v430_v27  ;;  %655 = vmatmul.bf16.gmra.mxu2 %v446_v29 }
  0xb3   : > { %704 = vmatmul.bf16.gmra.mxu1 %v431_v28 }
  0xb4   : > { %744 = vmatmul.bf16.gmra.mxu3 %v447_v30 }
  0xc2   : > { %620 = vmatmul.bf16.gmra.mxu0 %v432_v39  ;;  %660 = vmatmul.bf16.gmra.mxu2 %v448_v41 }
  0xc3   : > { %709 = vmatmul.bf16.gmra.mxu1 %v433_v40 }
  0xc4   : > { %749 = vmatmul.bf16.gmra.mxu3 %v449_v42 }
  0xd2   : > { %625 = vmatmul.bf16.gmra.mxu0 %v434_v52  ;;  %665 = vmatmul.bf16.gmra.mxu2 %v450_v54  ;;  %v1912_v52 = vld [vmem:[#allocation8 + $0x18] sm:$0xff] }
  0xd3   : > { %714 = vmatmul.bf16.gmra.mxu1 %v435_v53  ;;  %1049 = vmatpush.bf16.msrb.mxu3 %v1912_v52 }
  0xd4   : > { %754 = vmatmul.bf16.gmra.mxu3 %v451_v55 }
  0xdf   : > { %v591_v56 = vpop.f32.mrf.mxu0 }
  0xe0   : > { %v680_v57 = vpop.f32.mrf.mxu1  ;;  %v592_v59 = vadd.f32 %v2578_v58, %v591_v56 }
  0xe2   : > { %v681_v0 = vadd.f32 %v680_v57, %v592_v59 }
  0xe4   : > { %v760_v3 = vmax.f32 %v681_v0, 0.0 }
  0xe5   : > { %v2581_v61 = vpop.f32.mrf.mxu2 }
  0xe7   : > { %v593_v62 = vpop.f32.mrf.mxu0 }
  0xe8   : > { %v682_v63 = vpop.f32.mrf.mxu1  ;;  %v594_v1 = vadd.f32 %v2578_v58, %v593_v62 }
  0xea   : > { %v683_v2 = vadd.f32 %v682_v63, %v594_v1 }
  0xec   : > { %v761_v4 = vmax.f32 %v683_v2, 0.0 }
  0xed   : > { %v2584_v6 = vpop.f32.mrf.mxu2 }
  0xee   : > { %v792_v5 = vpack.c.bf16 %v761_v4, %v760_v3  ;;  %v1911_v4 = vld [vmem:[#allocation8 + $0x10] sm:$0xff] }
  0xef   : > { %v596_v7 = vpop.f32.mrf.mxu0  ;;  %1050 = vmatpush.bf16.msrb.mxu3 %v1911_v4  ;;  %v1932_v4 = vld [vmem:[#allocation10 + $0x74] sm:$0xf0] }
  0xf0   : > { %v685_v8 = vpop.f32.mrf.mxu1  ;;  %882 = vmatmul.bf16.vlgmr.msrb.gmra.mxu2 %v792_v5  ;;  %v597_v9 = vadd.f32 %v2578_v58, %v596_v7 }
  0xf2   : > { %v686_v14 = vadd.f32 %v685_v8, %v597_v9 }
  0xf4   : > { %v762_v17 = vmax.f32 %v686_v14, 0.0 }
  0xf5   : > { %v2587_v11 = vpop.f32.mrf.mxu2 }
  0xf7   : > { %v598_v12 = vpop.f32.mrf.mxu0 }
  0xf8   : > { %v687_v13 = vpop.f32.mrf.mxu1  ;;  %v599_v15 = vadd.f32 %v2578_v58, %v598_v12 }
  0xfa   : > { %v688_v16 = vadd.f32 %v687_v13, %v599_v15  ;;  %v720_v13 = vpop.f32.mrf.mxu3 }
  0xfc   : > { %v763_v18 = vmax.f32 %v688_v16, 0.0 }
  0xfd   : > { %v2590_v20 = vpop.f32.mrf.mxu2 }
  0xfe   : > { %v793_v19 = vpack.c.bf16 %v763_v18, %v762_v17 }
  0xff   : > { %v601_v21 = vpop.f32.mrf.mxu0 }
 0x100   : > { %v690_v22 = vpop.f32.mrf.mxu1  ;;  %887 = vmatmul.bf16.gmra.mxu2 %v793_v19  ;;  %v602_v23 = vadd.f32 %v2578_v58, %v601_v21  ;;  %v1910_v19 = vld [vmem:[#allocation8 + $0x8] sm:$0xff] }
 0x101   : > { %1051 = vmatpush.bf16.msrb.mxu3 %v1910_v19 }
 0x102   : > { %v691_v28 = vadd.f32 %v690_v22, %v602_v23  ;;  %v722_v23 = vpop.f32.mrf.mxu3 }
 0x104   : > { %v764_v31 = vmax.f32 %v691_v28, 0.0 }
 0x105   : > { %v2593_v25 = vpop.f32.mrf.mxu2 }
 0x107   : > { %v603_v26 = vpop.f32.mrf.mxu0 }
 0x108   : > { %v692_v27 = vpop.f32.mrf.mxu1  ;;  %v604_v29 = vadd.f32 %v2578_v58, %v603_v26 }
 0x10a   : > { %v693_v30 = vadd.f32 %v692_v27, %v604_v29  ;;  %v725_v38 = vpop.f32.mrf.mxu3 }
 0x10c   : > { %v765_v32 = vmax.f32 %v693_v30, 0.0 }
 0x10d   : > { %v2596_v34 = vpop.f32.mrf.mxu2 }
 0x10e   : > { %v794_v33 = vpack.c.bf16 %v765_v32, %v764_v31 }
 0x10f   : > { %v606_v35 = vpop.f32.mrf.mxu0 }
 0x110   : > { %v695_v36 = vpop.f32.mrf.mxu1  ;;  %892 = vmatmul.bf16.gmra.mxu2 %v794_v33  ;;  %v607_v37 = vadd.f32 %v2578_v58, %v606_v35 }
 0x112   : > { %v696_v42 = vadd.f32 %v695_v36, %v607_v37  ;;  %v1909_v37 = vld [vmem:[#allocation8] sm:$0xff] }
 0x113   : > { %1052 = vmatpush.bf16.msrb.mxu3 %v1909_v37 }
 0x114   : > { %v766_v45 = vmax.f32 %v696_v42, 0.0 }
 0x115   : > { %v2599_v39 = vpop.f32.mrf.mxu2 }
 0x117   : > { %v608_v40 = vpop.f32.mrf.mxu0 }
 0x118   : > { %v697_v41 = vpop.f32.mrf.mxu1  ;;  %v609_v43 = vadd.f32 %v2578_v58, %v608_v40 }
 0x11a   : > { %v698_v44 = vadd.f32 %v697_v41, %v609_v43 }
 0x11c   : > { %v767_v46 = vmax.f32 %v698_v44, 0.0 }
 0x11d   : > { %v2602_v48 = vpop.f32.mrf.mxu2 }
 0x11e   : > { %v795_v47 = vpack.c.bf16 %v767_v46, %v766_v45 }
 0x11f   : > { %v611_v49 = vpop.f32.mrf.mxu0 }
 0x120   : > { %v700_v50 = vpop.f32.mrf.mxu1  ;;  %897 = vmatmul.bf16.gmra.mxu2 %v795_v47  ;;  %v612_v51 = vadd.f32 %v2578_v58, %v611_v49  ;;  %v727_v47 = vpop.f32.mrf.mxu3 }
 0x122   : > { %v701_v56 = vadd.f32 %v700_v50, %v612_v51 }
 0x124   : > { %v768_v60 = vmax.f32 %v701_v56, 0.0 }
 0x125   : > { %v2605_v53 = vpop.f32.mrf.mxu2 }
 0x127   : > { %v613_v54 = vpop.f32.mrf.mxu0 }
 0x128   : > { %v702_v55 = vpop.f32.mrf.mxu1  ;;  %v614_v57 = vadd.f32 %v2578_v58, %v613_v54  ;;  %v632_v54 = vadd.f32 %v2578_v58, %v2581_v61  ;;  %v730_v56 = vpop.f32.mrf.mxu3  ;;  %v637_v61 = vadd.f32 %v2578_v58, %v2587_v11 }
 0x12a   : > { %v703_v59 = vadd.f32 %v702_v55, %v614_v57  ;;  %v634_v55 = vadd.f32 %v2578_v58, %v2584_v6  ;;  %v721_v57 = vadd.f32 %v720_v13, %v632_v54  ;;  %v639_v6 = vadd.f32 %v2578_v58, %v2590_v20  ;;  %v1863_v20 = vld [vmem:[#allocation10 + $0x60] sm:$0xf]  ;;  %v1857_v54 = vld [vmem:[#allocation10 + $0x58] sm:$0xf0] }
 0x12b   : > { %v726_v13 = vadd.f32 %v725_v38, %v637_v61 }
 0x12c   : > { %v769_v62 = vmax.f32 %v703_v59, 0.0  ;;  %v723_v59 = vadd.f32 %v722_v23, %v634_v55  ;;  %v647_v55 = vadd.f32 %v2578_v58, %v2599_v39  ;;  %v1847_v39 = vld [vmem:[#allocation10 + $0x40] sm:$0xf] }
 0x12d   : > { %v2608_v0 = vpop.f32.mrf.mxu2 }
 0x12e   : > { %v796_v63 = vpack.c.bf16 %v769_v62, %v768_v60  ;;  %v776_v60 = vmax.f32 %v721_v57, 0.0  ;;  %v777_v62 = vmax.f32 %v723_v59, 0.0 }
 0x12f   : > { %v616_v1 = vpop.f32.mrf.mxu0 }
 0x130   : > { %v705_v2 = vpop.f32.mrf.mxu1  ;;  %902 = vmatmul.bf16.gmra.mxu2 %v796_v63  ;;  %v617_v3 = vadd.f32 %v2578_v58, %v616_v1  ;;  %v800_v1 = vpack.c.bf16 %v777_v62, %v776_v60 }
 0x132   : > { %v706_v8 = vadd.f32 %v705_v2, %v617_v3  ;;  %v732_v2 = vpop.f32.mrf.mxu3  ;;  %v1871_v3 = vld [vmem:[#allocation10 + $0x70] sm:$0xf] }
 0x134   : > { %v770_v14 = vmax.f32 %v706_v8, 0.0  ;;  %v1873_v8 = vld [vmem:[#allocation10 + $0x78] sm:$0xf0] }
 0x135   : > { %v2612_v10 = vpop.f32.mrf.mxu2 }
 0x137   : > { %v618_v5 = vpop.f32.mrf.mxu0 }
 0x138   : > { %v707_v7 = vpop.f32.mrf.mxu1  ;;  %v619_v9 = vadd.f32 %v2578_v58, %v618_v5  ;;  %v1931_v5 = vld [vmem:[#allocation10 + $0x74] sm:$0xf] }
 0x13a   : > { %v708_v12 = vadd.f32 %v707_v7, %v619_v9  ;;  %v1872_v7 = vor.u32 %v1932_v4, %v1871_v3  ;;  %v1876_v9 = vor.u32 %v1931_v5, %v1873_v8 }
 0x13c   : > { %v771_v15 = vmax.f32 %v708_v12, 0.0  ;;  %1285 = vmatpush.bf16.msrb.mxu0 %v1872_v7  ;;  %1374 = vmatpush.bf16.msrb.mxu1 %v1876_v9 }
 0x13d   : > { %v2614_v21 = vpop.f32.mrf.mxu2 }
 0x13e   : > { %v797_v16 = vpack.c.bf16 %v771_v15, %v770_v14  ;;  %v728_v14 = vadd.f32 %v727_v47, %v639_v6  ;;  %v2636_v15 = vld [vmem:[#allocation11 + $0x1] ss:$0 sm:$0xff]  ;;  %v1925_v6 = vld [vmem:[#allocation10 + $0x44] sm:$0xf] }
 0x13f   : > { %v621_v17 = vpop.f32.mrf.mxu0 }
 0x140   : > { %v710_v18 = vpop.f32.mrf.mxu1  ;;  %907 = vmatmul.bf16.gmra.mxu2 %v797_v16  ;;  %v622_v22 = vadd.f32 %v2578_v58, %v621_v17  ;;  %v735_v16 = vpop.f32.mrf.mxu3  ;;  %v778_v17 = vmax.f32 %v726_v13, 0.0  ;;  %v1849_v13 = vld [vmem:[#allocation10 + $0x48] sm:$0xf0] }
 0x141   : > { %v736_v60 = vadd.f32 %v735_v16, %v647_v55  ;;  %v654_v16 = vadd.f32 %v2578_v58, %v2608_v0  ;;  %v1924_v0 = vld [vmem:[#allocation10 + $0x34] sm:$0xf0]  ;;  %v1833_v55 = vld [vmem:[#allocation10 + $0x28] sm:$0xf0] }
 0x142   : > { %v711_v27 = vadd.f32 %v710_v18, %v622_v22  ;;  %v779_v18 = vmax.f32 %v728_v14, 0.0  ;;  %v652_v14 = vadd.f32 %v2578_v58, %v2605_v53  ;;  %v1839_v53 = vld [vmem:[#allocation10 + $0x30] sm:$0xf] }
 0x144   : > { %v772_v30 = vmax.f32 %v711_v27, 0.0  ;;  %v1929_v27 = vld [vmem:[#allocation10 + $0x64] sm:$0xf] }
 0x145   : > { %v2618_v32 = vpop.f32.mrf.mxu2 }
 0x147   : > { %v623_v24 = vpop.f32.mrf.mxu0 }
 0x148   : > { %v712_v26 = vpop.f32.mrf.mxu1  ;;  %v624_v28 = vadd.f32 %v2578_v58, %v623_v24  ;;  %v801_v24 = vpack.c.bf16 %v779_v18, %v778_v17  ;;  %v1852_v17 = vor.u32 %v1925_v6, %v1849_v13 }
 0x14a   : > { %v713_v29 = vadd.f32 %v712_v26, %v624_v28  ;;  %v1930_v26 = vld [vmem:[#allocation10 + $0x64] sm:$0xf0] }
 0x14b   : > { %v1864_v28 = vor.u32 %v1930_v26, %v1863_v20 }
 0x14c   : > { %v773_v31 = vmax.f32 %v713_v29, 0.0  ;;  %v1865_v29 = vld [vmem:[#allocation10 + $0x68] sm:$0xf0] }
 0x14d   : > { %v2621_v41 = vpop.f32.mrf.mxu2  ;;  %1286 = vmatpush.bf16.msrb.mxu0 %v1864_v28 }
 0x14e   : > { %v798_v33 = vpack.c.bf16 %v773_v31, %v772_v30  ;;  %v642_v30 = vadd.f32 %v2578_v58, %v2593_v25  ;;  %v644_v31 = vadd.f32 %v2578_v58, %v2596_v34  ;;  %v1855_v34 = vld [vmem:[#allocation10 + $0x50] sm:$0xf] }
 0x14f   : > { %v626_v35 = vpop.f32.mrf.mxu0 }
 0x150   : > { %v715_v36 = vpop.f32.mrf.mxu1  ;;  %912 = vmatmul.bf16.gmra.mxu2 %v798_v33  ;;  %v627_v40 = vadd.f32 %v2578_v58, %v626_v35  ;;  %v1868_v33 = vor.u32 %v1929_v27, %v1865_v29  ;;  %v737_v35 = vpop.f32.mrf.mxu3  ;;  %v731_v37 = vadd.f32 %v730_v56, %v642_v30  ;;  %v733_v38 = vadd.f32 %v732_v2, %v644_v31  ;;  %v1923_v30 = vld [vmem:[#allocation10 + $0x34] sm:$0xf] }
 0x151   : > { %v649_v56 = vadd.f32 %v2578_v58, %v2602_v48  ;;  %v782_v2 = vmax.f32 %v736_v60, 0.0  ;;  %v1926_v48 = vld [vmem:[#allocation10 + $0x44] sm:$0xf0]  ;;  %v1840_v31 = vor.u32 %v1924_v0, %v1839_v53 }
 0x152   : > { %v716_v43 = vadd.f32 %v715_v36, %v627_v40  ;;  %1375 = vmatpush.bf16.msrb.mxu1 %v1868_v33  ;;  %v780_v40 = vmax.f32 %v731_v37, 0.0  ;;  %v1841_v33 = vld [vmem:[#allocation10 + $0x38] sm:$0xf0] }
 0x153   : > { %v738_v62 = vadd.f32 %v737_v35, %v649_v56  ;;  %v657_v35 = vadd.f32 %v2578_v58, %v2612_v10  ;;  %v1844_v37 = vor.u32 %v1923_v30, %v1841_v33  ;;  %v662_v56 = vadd.f32 %v2578_v58, %v2618_v32  ;;  %v1823_v32 = vld [vmem:[#allocation10 + $0x10] sm:$0xf] }
 0x154   : > { %v774_v49 = vmax.f32 %v716_v43, 0.0 }
 0x155   : > { %v2624_v52 = vpop.f32.mrf.mxu2  ;;  %v783_v3 = vmax.f32 %v738_v62, 0.0 }
 0x157   : > { %v628_v42 = vpop.f32.mrf.mxu0  ;;  %v803_v8 = vpack.c.bf16 %v783_v3, %v782_v2 }
 0x158   : > { %v629_v44 = vadd.f32 %v2578_v58, %v628_v42  ;;  %v717_v45 = vpop.f32.mrf.mxu1  ;;  %v781_v42 = vmax.f32 %v733_v38, 0.0 }
 0x15a   : > { %v718_v46 = vadd.f32 %v717_v45, %v629_v44  ;;  %v802_v47 = vpack.c.bf16 %v781_v42, %v780_v40 }
 0x15c   : > { %v775_v50 = vmax.f32 %v718_v46, 0.0  ;;  %v740_v46 = vpop.f32.mrf.mxu3 }
 0x15d   : > { %v2630_v63 = vpop.f32.mrf.mxu2 }
 0x15e   : > { %v799_v51 = vpack.c.bf16 %v775_v50, %v774_v49  ;;  %v1928_v49 = vld [vmem:[#allocation10 + $0x54] sm:$0xf0]  ;;  %v1927_v50 = vld [vmem:[#allocation10 + $0x54] sm:$0xf]  ;;  %v669_v13 = vadd.f32 %v2578_v58, %v2630_v63  ;;  %v1917_v63 = vld [vmem:[#allocation10 + $0x4] sm:$0xf] }
 0x15f   : > { %v1860_v57 = vor.u32 %v1927_v50, %v1857_v54  ;;  %v1922_v50 = vld [vmem:[#allocation10 + $0x24] sm:$0xf0] }
 0x160   : > { %917 = vmatmul.bf16.gmra.mxu2 %v799_v51  ;;  %v1856_v51 = vor.u32 %v1928_v49, %v1855_v34 }
 0x161   : > { %1376 = vmatpush.bf16.msrb.mxu1 %v1860_v57  ;;  %v664_v57 = vadd.f32 %v2578_v58, %v2621_v41  ;;  %v1920_v41 = vld [vmem:[#allocation10 + $0x14] sm:$0xf0] }
 0x162   : > { %1287 = vmatpush.bf16.msrb.mxu0 %v1856_v51  ;;  %v1921_v51 = vld [vmem:[#allocation10 + $0x24] sm:$0xf]  ;;  %v1824_v6 = vor.u32 %v1920_v41, %v1823_v32 }
 0x165   : > { %1377 = vmatpush.bf16.msrb.mxu1 %v1852_v17 }
 0x169   : > { %1378 = vmatpush.bf16.msrb.mxu1 %v1844_v37 }
 0x170   : > { %922 = vmatmul.bf16.gmra.mxu2 %v800_v1  ;;  %v742_v1 = vpop.f32.mrf.mxu3 }
 0x173   : > { %v883_v12 = vpop.f32.mrf.mxu2 }
 0x174   : > { %v884_v22 = vadd.f32 %v2636_v15, %v883_v12  ;;  %v1848_v12 = vor.u32 %v1926_v48, %v1847_v39  ;;  %v1919_v48 = vld [vmem:[#allocation10 + $0x14] sm:$0xf] }
 0x176   : > { %1288 = vmatpush.bf16.msrb.mxu0 %v1848_v12  ;;  %v667_v12 = vadd.f32 %v2578_v58, %v2624_v52  ;;  %v1815_v52 = vld [vmem:[#allocation10] sm:$0xf] }
 0x178   : > { %v745_v9 = vpop.f32.mrf.mxu3 }
 0x179   : > { %v746_v42 = vadd.f32 %v745_v9, %v657_v35  ;;  %v1825_v9 = vld [vmem:[#allocation10 + $0x18] sm:$0xf0] }
 0x17a   : > { %1289 = vmatpush.bf16.msrb.mxu0 %v1840_v31 }
 0x17b   : > { %v885_v19 = vpop.f32.mrf.mxu2 }
 0x17c   : > { %v886_v23 = vadd.f32 %v2636_v15, %v885_v19  ;;  %v741_v19 = vadd.f32 %v740_v46, %v652_v14  ;;  %v1828_v14 = vor.u32 %v1919_v48, %v1825_v9 }
 0x17e   : > { %v963_v11 = vpack.c.bf16 %v886_v23, %v884_v22  ;;  %v743_v22 = vadd.f32 %v742_v1, %v654_v16  ;;  %v784_v23 = vmax.f32 %v741_v19, 0.0 }
 0x180   : > { %927 = vmatmul.bf16.gmra.mxu2 %v801_v24  ;;  %1053 = vmatmul.bf16.vlgmr.msrb.gmra.mxu3 %v963_v11  ;;  %v785_v11 = vmax.f32 %v743_v22, 0.0  ;;  %v747_v24 = vpop.f32.mrf.mxu3 }
 0x182   : > { %v804_v28 = vpack.c.bf16 %v785_v11, %v784_v23 }
 0x183   : > { %v888_v36 = vpop.f32.mrf.mxu2 }
 0x184   : > { %v889_v44 = vadd.f32 %v2636_v15, %v888_v36  ;;  %v659_v36 = vadd.f32 %v2578_v58, %v2614_v21  ;;  %v1831_v21 = vld [vmem:[#allocation10 + $0x20] sm:$0xf]  ;;  %v1918_v58 = vld [vmem:[#allocation10 + $0x4] sm:$0xf0] }
 0x185   : > { %v1832_v54 = vor.u32 %v1922_v50, %v1831_v21 }
 0x187   : > { %1290 = vmatpush.bf16.msrb.mxu0 %v1832_v54 }
 0x188   : > { %v750_v40 = vpop.f32.mrf.mxu3 }
 0x189   : > { %v751_v62 = vadd.f32 %v750_v40, %v662_v56 }
 0x18b   : > { %v890_v43 = vpop.f32.mrf.mxu2  ;;  %v788_v3 = vmax.f32 %v751_v62, 0.0  ;;  %1291 = vmatpush.bf16.msrb.mxu0 %v1824_v6 }
 0x18c   : > { %v891_v45 = vadd.f32 %v2636_v15, %v890_v43  ;;  %v748_v43 = vadd.f32 %v747_v24, %v659_v36 }
 0x18e   : > { %v964_v25 = vpack.c.bf16 %v891_v45, %v889_v44  ;;  %v786_v44 = vmax.f32 %v746_v42, 0.0  ;;  %v787_v45 = vmax.f32 %v748_v43, 0.0 }
 0x190   : > { %932 = vmatmul.bf16.gmra.mxu2 %v802_v47  ;;  %1058 = vmatmul.bf16.gmra.mxu3 %v964_v25  ;;  %v805_v49 = vpack.c.bf16 %v787_v45, %v786_v44  ;;  %v752_v10 = vpop.f32.mrf.mxu3  ;;  %v2680_v45 = vld [vmem:[#allocation11 + $0x2] ss:$0 sm:$0xff] }
 0x191   : > { %v753_v1 = vadd.f32 %v752_v10, %v664_v57 }
 0x193   : > { %v893_v59 = vpop.f32.mrf.mxu2 }
 0x194   : > { %v894_v5 = vadd.f32 %v2636_v15, %v893_v59  ;;  %v1836_v59 = vor.u32 %v1921_v51, %v1833_v55 }
 0x196   : > { %1379 = vmatpush.bf16.msrb.mxu1 %v1836_v59 }
 0x198   : > { %v755_v2 = vpop.f32.mrf.mxu3 }
 0x19a   : > { %1380 = vmatpush.bf16.msrb.mxu1 %v1828_v14 }
 0x19b   : > { %v895_v4 = vpop.f32.mrf.mxu2 }
 0x19c   : > { %v896_v7 = vadd.f32 %v2636_v15, %v895_v4  ;;  %v789_v4 = vmax.f32 %v753_v1, 0.0 }
 0x19e   : > { %v965_v61 = vpack.c.bf16 %v896_v7, %v894_v5  ;;  %v806_v39 = vpack.c.bf16 %v789_v4, %v788_v3 }
 0x1a0   : > { %937 = vmatmul.bf16.gmra.mxu2 %v803_v8  ;;  %1063 = vmatmul.bf16.gmra.mxu3 %v965_v61  ;;  %v757_v16 = vpop.f32.mrf.mxu3 }
 0x1a1   : > { %v758_v19 = vadd.f32 %v757_v16, %v669_v13 }
 0x1a3   : > { %v898_v18 = vpop.f32.mrf.mxu2  ;;  %v791_v23 = vmax.f32 %v758_v19, 0.0 }
 0x1a4   : > { %v899_v26 = vadd.f32 %v2636_v15, %v898_v18  ;;  %v756_v18 = vadd.f32 %v755_v2, %v667_v12 }
 0x1a6   : > { %v790_v22 = vmax.f32 %v756_v18, 0.0 }
 0x1ab   : > { %v900_v20 = vpop.f32.mrf.mxu2 }
 0x1ac   : > { %v901_v27 = vadd.f32 %v2636_v15, %v900_v20 }
 0x1ae   : > { %v966_v29 = vpack.c.bf16 %v901_v27, %v899_v26  ;;  %v807_v27 = vpack.c.bf16 %v791_v23, %v790_v22 }
 0x1b0   : > { %942 = vmatmul.bf16.gmra.mxu2 %v804_v28  ;;  %1068 = vmatmul.bf16.gmra.mxu3 %v966_v29  ;;  %v1816_v28 = vor.u32 %v1918_v58, %v1815_v52  ;;  %v1817_v29 = vld [vmem:[#allocation10 + $0x8] sm:$0xf0] }
 0x1b1   : > { %v1820_v53 = vor.u32 %v1917_v63, %v1817_v29 }
 0x1b2   : > { %1292 = vmatpush.bf16.msrb.mxu0 %v1816_v28 }
 0x1b3   : > { %v903_v38 = vpop.f32.mrf.mxu2  ;;  %1381 = vmatpush.bf16.msrb.mxu1 %v1820_v53 }
 0x1b4   : > { %v904_v47 = vadd.f32 %v2636_v15, %v903_v38 }
 0x1bb   : > { %v905_v46 = vpop.f32.mrf.mxu2 }
 0x1bc   : > { %v906_v25 = vadd.f32 %v2636_v15, %v905_v46 }
 0x1be   : > { %v967_v34 = vpack.c.bf16 %v906_v25, %v904_v47 }
 0x1c0   : > { %947 = vmatmul.bf16.gmra.mxu2 %v805_v49  ;;  %1073 = vmatmul.bf16.gmra.mxu3 %v967_v34 }
 0x1c3   : > { %v908_v60 = vpop.f32.mrf.mxu2 }
 0x1c4   : > { %v909_v7 = vadd.f32 %v2636_v15, %v908_v60 }
 0x1cb   : > { %v910_v5 = vpop.f32.mrf.mxu2 }
 0x1cc   : > { %v911_v8 = vadd.f32 %v2636_v15, %v910_v5 }
 0x1ce   : > { %v968_v61 = vpack.c.bf16 %v911_v8, %v909_v7 }
 0x1d0   : > { %952 = vmatmul.bf16.gmra.mxu2 %v806_v39  ;;  %1078 = vmatmul.bf16.gmra.mxu3 %v968_v61 }
 0x1d3   : > { %v913_v17 = vpop.f32.mrf.mxu2 }
 0x1d4   : > { %v914_v24 = vadd.f32 %v2636_v15, %v913_v17 }
 0x1db   : > { %v915_v11 = vpop.f32.mrf.mxu2 }
 0x1dc   : > { %v916_v20 = vadd.f32 %v2636_v15, %v915_v11 }
 0x1de   : > { %v969_v26 = vpack.c.bf16 %v916_v20, %v914_v24 }
 0x1e0   : > { %957 = vmatmul.bf16.gmra.mxu2 %v807_v27  ;;  %1083 = vmatmul.bf16.gmra.mxu3 %v969_v26 }
 0x1e3   : > { %v918_v0 = vpop.f32.mrf.mxu2 }
 0x1e4   : > { %v919_v31 = vadd.f32 %v2636_v15, %v918_v0 }
 0x1eb   : > { %v920_v30 = vpop.f32.mrf.mxu2 }
 0x1ec   : > { %v921_v33 = vadd.f32 %v2636_v15, %v920_v30 }
 0x1ee   : > { %v970_v35 = vpack.c.bf16 %v921_v33, %v919_v31 }
 0x1f0   : > { %1088 = vmatmul.bf16.gmra.mxu3 %v970_v35 }
 0x1f3   : > { %v923_v36 = vpop.f32.mrf.mxu2 }
 0x1f4   : > { %v924_v38 = vadd.f32 %v2636_v15, %v923_v36 }
 0x1fb   : > { %v925_v37 = vpop.f32.mrf.mxu2 }
 0x1fc   : > { %v926_v40 = vadd.f32 %v2636_v15, %v925_v37 }
 0x1fe   : > { %v971_v42 = vpack.c.bf16 %v926_v40, %v924_v38 }
 0x200   : > { %1093 = vmatmul.bf16.gmra.mxu3 %v971_v42 }
 0x203   : > { %v928_v43 = vpop.f32.mrf.mxu2  ;;  %v1054_v44 = vpop.f32.mrf.mxu3 }
 0x204   : > { %v1055_v46 = vadd.f32 %v2680_v45, %v1054_v44  ;;  %v929_v34 = vadd.f32 %v2636_v15, %v928_v43 }
 0x206   : > { %v1134_v21 = vmax.f32 %v1055_v46, 0.0 }
 0x20b   : > { %v930_v47 = vpop.f32.mrf.mxu2  ;;  %v1056_v25 = vpop.f32.mrf.mxu3 }
 0x20c   : > { %v931_v49 = vadd.f32 %v2636_v15, %v930_v47  ;;  %v1057_v10 = vadd.f32 %v2680_v45, %v1056_v25 }
 0x20e   : > { %v972_v50 = vpack.c.bf16 %v931_v49, %v929_v34  ;;  %v1135_v51 = vmax.f32 %v1057_v10, 0.0 }
 0x210   : > { %1098 = vmatmul.bf16.gmra.mxu3 %v972_v50  ;;  %v1166_v54 = vpack.c.bf16 %v1135_v51, %v1134_v21 }
 0x212   : > { %1293 = vmatmul.bf16.vlgmr.msrb.gmra.mxu0 %v1166_v54  ;;  %1382 = vmatmul.bf16.vlgmr.msrb.gmra.mxu1 %v1166_v54 }
 0x213   : > { %v933_v55 = vpop.f32.mrf.mxu2  ;;  %v1059_v56 = vpop.f32.mrf.mxu3 }
 0x214   : > { %v1060_v57 = vadd.f32 %v2680_v45, %v1059_v56  ;;  %v934_v62 = vadd.f32 %v2636_v15, %v933_v55 }
 0x216   : > { %v1136_v3 = vmax.f32 %v1060_v57, 0.0 }
 0x21b   : > { %v935_v59 = vpop.f32.mrf.mxu2  ;;  %v1061_v60 = vpop.f32.mrf.mxu3 }
 0x21c   : > { %v936_v1 = vadd.f32 %v2636_v15, %v935_v59  ;;  %v1062_v2 = vadd.f32 %v2680_v45, %v1061_v60 }
 0x21e   : > { %v973_v4 = vpack.c.bf16 %v936_v1, %v934_v62  ;;  %v1137_v5 = vmax.f32 %v1062_v2, 0.0 }
 0x220   : > { %1103 = vmatmul.bf16.gmra.mxu3 %v973_v4  ;;  %v1167_v7 = vpack.c.bf16 %v1137_v5, %v1136_v3 }
 0x222   : > { %1298 = vmatmul.bf16.gmra.mxu0 %v1167_v7  ;;  %1387 = vmatmul.bf16.gmra.mxu1 %v1167_v7 }
 0x223   : > { %v938_v8 = vpop.f32.mrf.mxu2  ;;  %v1064_v61 = vpop.f32.mrf.mxu3 }
 0x224   : > { %v1065_v39 = vadd.f32 %v2680_v45, %v1064_v61  ;;  %v939_v48 = vadd.f32 %v2636_v15, %v938_v8 }
 0x226   : > { %v1138_v12 = vmax.f32 %v1065_v39, 0.0 }
 0x22b   : > { %v940_v32 = vpop.f32.mrf.mxu2  ;;  %v1066_v41 = vpop.f32.mrf.mxu3 }
 0x22c   : > { %v941_v6 = vadd.f32 %v2636_v15, %v940_v32  ;;  %v1067_v9 = vadd.f32 %v2680_v45, %v1066_v41 }
 0x22e   : > { %v974_v13 = vpack.c.bf16 %v941_v6, %v939_v48  ;;  %v1139_v14 = vmax.f32 %v1067_v9, 0.0  ;;  %v1199_v48 = vld [vmem:[#allocation11 + $0x3] ss:$4 sm:$0x3] }
 0x230   : > { %1108 = vmatmul.bf16.gmra.mxu3 %v974_v13  ;;  %v1168_v16 = vpack.c.bf16 %v1139_v14, %v1138_v12  ;;  %v2714_v13 = vperm.slane %v1199_v48, 0  ;;  %v2716_v14 = vperm.slane %v1199_v48, 1 }
 0x232   : > { %1303 = vmatmul.bf16.gmra.mxu0 %v1168_v16  ;;  %1392 = vmatmul.bf16.gmra.mxu1 %v1168_v16 }
 0x233   : > { %v943_v17 = vpop.f32.mrf.mxu2  ;;  %v1069_v18 = vpop.f32.mrf.mxu3 }
 0x234   : > { %v1070_v19 = vadd.f32 %v2680_v45, %v1069_v18  ;;  %v944_v11 = vadd.f32 %v2636_v15, %v943_v17 }
 0x236   : > { %v1140_v26 = vmax.f32 %v1070_v19, 0.0 }
 0x23b   : > { %v945_v22 = vpop.f32.mrf.mxu2  ;;  %v1071_v23 = vpop.f32.mrf.mxu3 }
 0x23c   : > { %v946_v24 = vadd.f32 %v2636_v15, %v945_v22  ;;  %v1072_v20 = vadd.f32 %v2680_v45, %v1071_v23 }
 0x23e   : > { %v975_v27 = vpack.c.bf16 %v946_v24, %v944_v11  ;;  %v1141_v52 = vmax.f32 %v1072_v20, 0.0 }
 0x240   : > { %1113 = vmatmul.bf16.gmra.mxu3 %v975_v27  ;;  %v1169_v58 = vpack.c.bf16 %v1141_v52, %v1140_v26 }
 0x242   : > { %1308 = vmatmul.bf16.gmra.mxu0 %v1169_v58  ;;  %1397 = vmatmul.bf16.gmra.mxu1 %v1169_v58 }
 0x243   : > { %v948_v63 = vpop.f32.mrf.mxu2  ;;  %v1074_v28 = vpop.f32.mrf.mxu3 }
 0x244   : > { %v1075_v29 = vadd.f32 %v2680_v45, %v1074_v28  ;;  %v949_v30 = vadd.f32 %v2636_v15, %v948_v63 }
 0x246   : > { %v1142_v35 = vmax.f32 %v1075_v29, 0.0 }
 0x24b   : > { %v950_v53 = vpop.f32.mrf.mxu2  ;;  %v1076_v0 = vpop.f32.mrf.mxu3 }
 0x24c   : > { %v951_v31 = vadd.f32 %v2636_v15, %v950_v53  ;;  %v1077_v33 = vadd.f32 %v2680_v45, %v1076_v0 }
 0x24e   : > { %v976_v36 = vpack.c.bf16 %v951_v31, %v949_v30  ;;  %v1143_v37 = vmax.f32 %v1077_v33, 0.0 }
 0x250   : > { %v1170_v38 = vpack.c.bf16 %v1143_v37, %v1142_v35  ;;  %1118 = vmatmul.bf16.gmra.mxu3 %v976_v36 }
 0x252   : > { %1313 = vmatmul.bf16.gmra.mxu0 %v1170_v38  ;;  %1402 = vmatmul.bf16.gmra.mxu1 %v1170_v38 }
 0x253   : > { %v953_v40 = vpop.f32.mrf.mxu2  ;;  %v1079_v42 = vpop.f32.mrf.mxu3 }
 0x254   : > { %v1080_v43 = vadd.f32 %v2680_v45, %v1079_v42  ;;  %v954_v47 = vadd.f32 %v2636_v15, %v953_v40 }
 0x256   : > { %v1144_v49 = vmax.f32 %v1080_v43, 0.0 }
 0x25b   : > { %v955_v44 = vpop.f32.mrf.mxu2  ;;  %v1081_v46 = vpop.f32.mrf.mxu3 }
 0x25c   : > { %v956_v25 = vadd.f32 %v2636_v15, %v955_v44  ;;  %v1082_v34 = vadd.f32 %v2680_v45, %v1081_v46 }
 0x25e   : > { %v977_v10 = vpack.c.bf16 %v956_v25, %v954_v47  ;;  %v1145_v21 = vmax.f32 %v1082_v34, 0.0 }
 0x260   : > { %v1171_v50 = vpack.c.bf16 %v1145_v21, %v1144_v49  ;;  %1123 = vmatmul.bf16.gmra.mxu3 %v977_v10 }
 0x262   : > { %1318 = vmatmul.bf16.gmra.mxu0 %v1171_v50  ;;  %1407 = vmatmul.bf16.gmra.mxu1 %v1171_v50 }
 0x263   : > { %v958_v51 = vpop.f32.mrf.mxu2  ;;  %v1084_v54 = vpop.f32.mrf.mxu3 }
 0x264   : > { %v1085_v55 = vadd.f32 %v2680_v45, %v1084_v54  ;;  %v959_v59 = vadd.f32 %v2636_v15, %v958_v51 }
 0x266   : > { %v1146_v1 = vmax.f32 %v1085_v55, 0.0 }
 0x26b   : > { %v960_v56 = vpop.f32.mrf.mxu2  ;;  %v1086_v57 = vpop.f32.mrf.mxu3 }
 0x26c   : > { %v961_v60 = vadd.f32 %v2636_v15, %v960_v56  ;;  %v1087_v62 = vadd.f32 %v2680_v45, %v1086_v57 }
 0x26e   : > { %v978_v2 = vpack.c.bf16 %v961_v60, %v959_v59  ;;  %v1147_v3 = vmax.f32 %v1087_v62, 0.0 }
 0x270   : > { %v1172_v4 = vpack.c.bf16 %v1147_v3, %v1146_v1  ;;  %1128 = vmatmul.bf16.gmra.mxu3 %v978_v2 }
 0x272   : > { %1323 = vmatmul.bf16.gmra.mxu0 %v1172_v4  ;;  %1412 = vmatmul.bf16.gmra.mxu1 %v1172_v4 }
 0x273   : > { %v1089_v5 = vpop.f32.mrf.mxu3 }
 0x274   : > { %v1090_v7 = vadd.f32 %v2680_v45, %v1089_v5 }
 0x276   : > { %v1148_v39 = vmax.f32 %v1090_v7, 0.0 }
 0x27b   : > { %v1091_v8 = vpop.f32.mrf.mxu3 }
 0x27c   : > { %v1092_v61 = vadd.f32 %v2680_v45, %v1091_v8 }
 0x27e   : > { %v1149_v32 = vmax.f32 %v1092_v61, 0.0 }
 0x280   : > { %v1173_v41 = vpack.c.bf16 %v1149_v32, %v1148_v39 }
 0x282   : > { %1328 = vmatmul.bf16.gmra.mxu0 %v1173_v41  ;;  %1417 = vmatmul.bf16.gmra.mxu1 %v1173_v41 }
 0x283   : > { %v1094_v15 = vpop.f32.mrf.mxu3 }
 0x284   : > { %v1095_v6 = vadd.f32 %v2680_v45, %v1094_v15 }
 0x286   : > { %v1150_v16 = vmax.f32 %v1095_v6, 0.0 }
 0x28b   : > { %v1096_v9 = vpop.f32.mrf.mxu3 }
 0x28c   : > { %v1097_v12 = vadd.f32 %v2680_v45, %v1096_v9 }
 0x28e   : > { %v1151_v17 = vmax.f32 %v1097_v12, 0.0 }
 0x28f   : > { %v1294_v18 = vpop.f32.mrf.mxu0  ;;  %v1383_v19 = vpop.f32.mrf.mxu1 }
 0x290   : > { %v1174_v22 = vpack.c.bf16 %v1151_v17, %v1150_v16  ;;  %v1295_v23 = vadd.f32 %v1294_v18, %v2714_v13  ;;  %v1384_v11 = vadd.f32 %v1383_v19, %v2716_v14 }
 0x292   : > { %1463 = vst [vmem:[%s2722_s29] sm:$0xff] %v1295_v23  ;;  %1333 = vmatmul.bf16.gmra.mxu0 %v1174_v22  ;;  %1422 = vmatmul.bf16.gmra.mxu1 %v1174_v22 }
 0x293   : > { %1464 = vst [vmem:[%s2722_s29 + $0x8] sm:$0xff] %v1384_v11  ;;  %v1099_v24 = vpop.f32.mrf.mxu3 }
 0x294   : > { %v1100_v58 = vadd.f32 %v2680_v45, %v1099_v24 }
 0x296   : > { %v1152_v29 = vmax.f32 %v1100_v58, 0.0 }
 0x297   : > { %v1296_v20 = vpop.f32.mrf.mxu0  ;;  %v1385_v26 = vpop.f32.mrf.mxu1 }
 0x298   : > { %v1297_v27 = vadd.f32 %v1296_v20, %v2714_v13  ;;  %v1386_v52 = vadd.f32 %v1385_v26, %v2716_v14 }
 0x29a   : > { %1465 = vst [vmem:[%s2722_s29 + $0x10] sm:$0xff] %v1297_v27 }
 0x29b   : > { %1466 = vst [vmem:[%s2722_s29 + $0x18] sm:$0xff] %v1386_v52  ;;  %v1101_v63 = vpop.f32.mrf.mxu3 }
 0x29c   : > { %v1102_v28 = vadd.f32 %v2680_v45, %v1101_v63 }
 0x29e   : > { %v1153_v53 = vmax.f32 %v1102_v28, 0.0 }
 0x29f   : > { %v1299_v0 = vpop.f32.mrf.mxu0  ;;  %v1388_v30 = vpop.f32.mrf.mxu1 }
 0x2a0   : > { %v1175_v31 = vpack.c.bf16 %v1153_v53, %v1152_v29  ;;  %v1300_v33 = vadd.f32 %v1299_v0, %v2714_v13  ;;  %v1389_v35 = vadd.f32 %v1388_v30, %v2716_v14 }
 0x2a2   : > { %1467 = vst [vmem:[%s2722_s29 + $0x20] sm:$0xff] %v1300_v33  ;;  %1338 = vmatmul.bf16.gmra.mxu0 %v1175_v31  ;;  %1427 = vmatmul.bf16.gmra.mxu1 %v1175_v31 }
 0x2a3   : > { %1468 = vst [vmem:[%s2722_s29 + $0x28] sm:$0xff] %v1389_v35  ;;  %v1104_v36 = vpop.f32.mrf.mxu3 }
 0x2a4   : > { %v1105_v43 = vadd.f32 %v2680_v45, %v1104_v36 }
 0x2a6   : > { %v1154_v47 = vmax.f32 %v1105_v43, 0.0 }
 0x2a7   : > { %v1301_v37 = vpop.f32.mrf.mxu0  ;;  %v1390_v38 = vpop.f32.mrf.mxu1 }
 0x2a8   : > { %v1302_v40 = vadd.f32 %v1301_v37, %v2714_v13  ;;  %v1391_v42 = vadd.f32 %v1390_v38, %v2716_v14 }
 0x2aa   : > { %1469 = vst [vmem:[%s2722_s29 + $0x30] sm:$0xff] %v1302_v40 }
 0x2ab   : > { %1470 = vst [vmem:[%s2722_s29 + $0x38] sm:$0xff] %v1391_v42  ;;  %v1106_v44 = vpop.f32.mrf.mxu3 }
 0x2ac   : > { %v1107_v46 = vadd.f32 %v2680_v45, %v1106_v44 }
 0x2ae   : > { %v1155_v25 = vmax.f32 %v1107_v46, 0.0 }
 0x2af   : > { %v1304_v34 = vpop.f32.mrf.mxu0  ;;  %v1393_v49 = vpop.f32.mrf.mxu1 }
 0x2b0   : > { %v1176_v10 = vpack.c.bf16 %v1155_v25, %v1154_v47  ;;  %v1305_v21 = vadd.f32 %v1304_v34, %v2714_v13  ;;  %v1394_v50 = vadd.f32 %v1393_v49, %v2716_v14 }
 0x2b2   : > { %1471 = vst [vmem:[%s2722_s29 + $0x40] sm:$0xff] %v1305_v21  ;;  %1343 = vmatmul.bf16.gmra.mxu0 %v1176_v10  ;;  %1432 = vmatmul.bf16.gmra.mxu1 %v1176_v10 }
 0x2b3   : > { %1472 = vst [vmem:[%s2722_s29 + $0x48] sm:$0xff] %v1394_v50  ;;  %v1109_v51 = vpop.f32.mrf.mxu3 }
 0x2b4   : > { %v1110_v59 = vadd.f32 %v2680_v45, %v1109_v51 }
 0x2b6   : > { %v1156_v1 = vmax.f32 %v1110_v59, 0.0 }
 0x2b7   : > { %v1306_v54 = vpop.f32.mrf.mxu0  ;;  %v1395_v55 = vpop.f32.mrf.mxu1 }
 0x2b8   : > { %v1307_v56 = vadd.f32 %v1306_v54, %v2714_v13  ;;  %v1396_v57 = vadd.f32 %v1395_v55, %v2716_v14 }
 0x2ba   : > { %1473 = vst [vmem:[%s2722_s29 + $0x50] sm:$0xff] %v1307_v56 }
 0x2bb   : > { %1474 = vst [vmem:[%s2722_s29 + $0x58] sm:$0xff] %v1396_v57  ;;  %v1111_v60 = vpop.f32.mrf.mxu3 }
 0x2bc   : > { %v1112_v62 = vadd.f32 %v2680_v45, %v1111_v60 }
 0x2be   : > { %v1157_v2 = vmax.f32 %v1112_v62, 0.0 }
 0x2bf   : > { %v1309_v3 = vpop.f32.mrf.mxu0  ;;  %v1398_v4 = vpop.f32.mrf.mxu1 }
 0x2c0   : > { %v1177_v5 = vpack.c.bf16 %v1157_v2, %v1156_v1  ;;  %v1310_v7 = vadd.f32 %v1309_v3, %v2714_v13  ;;  %v1399_v8 = vadd.f32 %v1398_v4, %v2716_v14 }
 0x2c2   : > { %1475 = vst [vmem:[%s2722_s29 + $0x60] sm:$0xff] %v1310_v7  ;;  %1348 = vmatmul.bf16.gmra.mxu0 %v1177_v5  ;;  %1437 = vmatmul.bf16.gmra.mxu1 %v1177_v5 }
 0x2c3   : > { %1476 = vst [vmem:[%s2722_s29 + $0x68] sm:$0xff] %v1399_v8  ;;  %v1114_v61 = vpop.f32.mrf.mxu3 }
 0x2c4   : > { %v1115_v48 = vadd.f32 %v2680_v45, %v1114_v61 }
 0x2c6   : > { %v1158_v12 = vmax.f32 %v1115_v48, 0.0 }
 0x2c7   : > { %v1311_v39 = vpop.f32.mrf.mxu0  ;;  %v1400_v32 = vpop.f32.mrf.mxu1 }
 0x2c8   : > { %v1312_v41 = vadd.f32 %v1311_v39, %v2714_v13  ;;  %v1401_v15 = vadd.f32 %v1400_v32, %v2716_v14 }
 0x2ca   : > { %1477 = vst [vmem:[%s2722_s29 + $0x70] sm:$0xff] %v1312_v41 }
 0x2cb   : > { %1478 = vst [vmem:[%s2722_s29 + $0x78] sm:$0xff] %v1401_v15  ;;  %v1116_v6 = vpop.f32.mrf.mxu3 }
 0x2cc   : > { %v1117_v9 = vadd.f32 %v2680_v45, %v1116_v6 }
 0x2ce   : > { %v1159_v16 = vmax.f32 %v1117_v9, 0.0 }
 0x2cf   : > { %v1314_v17 = vpop.f32.mrf.mxu0  ;;  %v1403_v18 = vpop.f32.mrf.mxu1 }
 0x2d0   : > { %v1178_v19 = vpack.c.bf16 %v1159_v16, %v1158_v12  ;;  %v1315_v22 = vadd.f32 %v1314_v17, %v2714_v13  ;;  %v1404_v23 = vadd.f32 %v1403_v18, %v2716_v14 }
 0x2d2   : > { %1479 = vst [vmem:[%s2722_s29 + $0x80] sm:$0xff] %v1315_v22  ;;  %1353 = vmatmul.bf16.gmra.mxu0 %v1178_v19  ;;  %1442 = vmatmul.bf16.gmra.mxu1 %v1178_v19 }
 0x2d3   : > { %1480 = vst [vmem:[%s2722_s29 + $0x88] sm:$0xff] %v1404_v23  ;;  %v1119_v11 = vpop.f32.mrf.mxu3 }
 0x2d4   : > { %v1120_v52 = vadd.f32 %v2680_v45, %v1119_v11 }
 0x2d6   : > { %v1160_v28 = vmax.f32 %v1120_v52, 0.0 }
 0x2d7   : > { %v1316_v24 = vpop.f32.mrf.mxu0  ;;  %v1405_v20 = vpop.f32.mrf.mxu1 }
 0x2d8   : > { %v1317_v26 = vadd.f32 %v1316_v24, %v2714_v13  ;;  %v1406_v27 = vadd.f32 %v1405_v20, %v2716_v14 }
 0x2da   : > { %1481 = vst [vmem:[%s2722_s29 + $0x90] sm:$0xff] %v1317_v26 }
 0x2db   : > { %1482 = vst [vmem:[%s2722_s29 + $0x98] sm:$0xff] %v1406_v27  ;;  %v1121_v58 = vpop.f32.mrf.mxu3 }
 0x2dc   : > { %v1122_v63 = vadd.f32 %v2680_v45, %v1121_v58 }
 0x2de   : > { %v1161_v29 = vmax.f32 %v1122_v63, 0.0 }
 0x2df   : > { %v1319_v53 = vpop.f32.mrf.mxu0  ;;  %v1408_v0 = vpop.f32.mrf.mxu1 }
 0x2e0   : > { %v1179_v30 = vpack.c.bf16 %v1161_v29, %v1160_v28  ;;  %v1320_v31 = vadd.f32 %v1319_v53, %v2714_v13  ;;  %v1409_v33 = vadd.f32 %v1408_v0, %v2716_v14 }
 0x2e2   : > { %1483 = vst [vmem:[%s2722_s29 + $0xa0] sm:$0xff] %v1320_v31  ;;  %1358 = vmatmul.bf16.gmra.mxu0 %v1179_v30  ;;  %1447 = vmatmul.bf16.gmra.mxu1 %v1179_v30 }
 0x2e3   : > { %1484 = vst [vmem:[%s2722_s29 + $0xa8] sm:$0xff] %v1409_v33  ;;  %v1124_v35 = vpop.f32.mrf.mxu3 }
 0x2e4   : > { %v1125_v42 = vadd.f32 %v2680_v45, %v1124_v35 }
 0x2e6   : > { %v1162_v46 = vmax.f32 %v1125_v42, 0.0 }
 0x2e7   : > { %v1321_v36 = vpop.f32.mrf.mxu0  ;;  %v1410_v37 = vpop.f32.mrf.mxu1 }
 0x2e8   : > { %v1322_v38 = vadd.f32 %v1321_v36, %v2714_v13  ;;  %v1411_v40 = vadd.f32 %v1410_v37, %v2716_v14 }
 0x2ea   : > { %1485 = vst [vmem:[%s2722_s29 + $0xb0] sm:$0xff] %v1322_v38 }
 0x2eb   : > { %1486 = vst [vmem:[%s2722_s29 + $0xb8] sm:$0xff] %v1411_v40  ;;  %v1126_v43 = vpop.f32.mrf.mxu3 }
 0x2ec   : > { %v1127_v44 = vadd.f32 %v2680_v45, %v1126_v43 }
 0x2ee   : > { %v1163_v47 = vmax.f32 %v1127_v44, 0.0 }
 0x2ef   : > { %v1324_v25 = vpop.f32.mrf.mxu0  ;;  %v1413_v34 = vpop.f32.mrf.mxu1 }
 0x2f0   : > { %v1180_v49 = vpack.c.bf16 %v1163_v47, %v1162_v46  ;;  %v1325_v10 = vadd.f32 %v1324_v25, %v2714_v13  ;;  %v1414_v21 = vadd.f32 %v1413_v34, %v2716_v14 }
 0x2f2   : > { %1487 = vst [vmem:[%s2722_s29 + $0xc0] sm:$0xff] %v1325_v10  ;;  %1363 = vmatmul.bf16.gmra.mxu0 %v1180_v49  ;;  %1452 = vmatmul.bf16.gmra.mxu1 %v1180_v49 }
 0x2f3   : > { %1488 = vst [vmem:[%s2722_s29 + $0xc8] sm:$0xff] %v1414_v21  ;;  %v1129_v50 = vpop.f32.mrf.mxu3 }
 0x2f4   : > { %v1130_v57 = vadd.f32 %v2680_v45, %v1129_v50 }
 0x2f6   : > { %v1164_v62 = vmax.f32 %v1130_v57, 0.0 }
 0x2f7   : > { %v1326_v51 = vpop.f32.mrf.mxu0  ;;  %v1415_v54 = vpop.f32.mrf.mxu1 }
 0x2f8   : > { %v1327_v55 = vadd.f32 %v1326_v51, %v2714_v13  ;;  %v1416_v56 = vadd.f32 %v1415_v54, %v2716_v14 }
 0x2fa   : > { %1489 = vst [vmem:[%s2722_s29 + $0xd0] sm:$0xff] %v1327_v55 }
 0x2fb   : > { %1490 = vst [vmem:[%s2722_s29 + $0xd8] sm:$0xff] %v1416_v56  ;;  %v1131_v59 = vpop.f32.mrf.mxu3 }
 0x2fc   : > { %v1132_v60 = vadd.f32 %v2680_v45, %v1131_v59 }
 0x2fe   : > { %v1165_v1 = vmax.f32 %v1132_v60, 0.0 }
 0x2ff   : > { %v1329_v2 = vpop.f32.mrf.mxu0  ;;  %v1418_v3 = vpop.f32.mrf.mxu1 }
 0x300   : > { %v1181_v4 = vpack.c.bf16 %v1165_v1, %v1164_v62  ;;  %v1330_v5 = vadd.f32 %v1329_v2, %v2714_v13  ;;  %v1419_v7 = vadd.f32 %v1418_v3, %v2716_v14 }
 0x302   : > { %1491 = vst [vmem:[%s2722_s29 + $0xe0] sm:$0xff] %v1330_v5  ;;  %1368 = vmatmul.bf16.gmra.mxu0 %v1181_v4  ;;  %1457 = vmatmul.bf16.gmra.mxu1 %v1181_v4 }
 0x303   : > { %1492 = vst [vmem:[%s2722_s29 + $0xe8] sm:$0xff] %v1419_v7 }
 0x307   : > { %v1331_v8 = vpop.f32.mrf.mxu0  ;;  %v1420_v45 = vpop.f32.mrf.mxu1 }
 0x308   : > { %v1332_v61 = vadd.f32 %v1331_v8, %v2714_v13  ;;  %v1421_v39 = vadd.f32 %v1420_v45, %v2716_v14 }
 0x30a   : > { %1493 = vst [vmem:[%s2722_s29 + $0xf0] sm:$0xff] %v1332_v61 }
 0x30b   : > { %1494 = vst [vmem:[%s2722_s29 + $0xf8] sm:$0xff] %v1421_v39 }
 0x30f   : > { %v1334_v32 = vpop.f32.mrf.mxu0  ;;  %v1423_v41 = vpop.f32.mrf.mxu1 }
 0x310   : > { %v1335_v15 = vadd.f32 %v1334_v32, %v2714_v13  ;;  %v1424_v48 = vadd.f32 %v1423_v41, %v2716_v14 }
 0x312   : > { %1495 = vst [vmem:[%s2722_s29 + $0x100] sm:$0xff] %v1335_v15 }
 0x313   : > { %1496 = vst [vmem:[%s2722_s29 + $0x108] sm:$0xff] %v1424_v48 }
 0x317   : > { %v1336_v6 = vpop.f32.mrf.mxu0  ;;  %v1425_v9 = vpop.f32.mrf.mxu1 }
 0x318   : > { %v1337_v12 = vadd.f32 %v1336_v6, %v2714_v13  ;;  %v1426_v16 = vadd.f32 %v1425_v9, %v2716_v14 }
 0x31a   : > { %1497 = vst [vmem:[%s2722_s29 + $0x110] sm:$0xff] %v1337_v12 }
 0x31b   : > { %1498 = vst [vmem:[%s2722_s29 + $0x118] sm:$0xff] %v1426_v16 }
 0x31f   : > { %v1339_v17 = vpop.f32.mrf.mxu0  ;;  %v1428_v18 = vpop.f32.mrf.mxu1 }
 0x320   : > { %v1340_v19 = vadd.f32 %v1339_v17, %v2714_v13  ;;  %v1429_v22 = vadd.f32 %v1428_v18, %v2716_v14 }
 0x322   : > { %1499 = vst [vmem:[%s2722_s29 + $0x120] sm:$0xff] %v1340_v19 }
 0x323   : > { %1500 = vst [vmem:[%s2722_s29 + $0x128] sm:$0xff] %v1429_v22 }
 0x327   : > { %v1341_v23 = vpop.f32.mrf.mxu0  ;;  %v1430_v11 = vpop.f32.mrf.mxu1 }
 0x328   : > { %v1342_v24 = vadd.f32 %v1341_v23, %v2714_v13  ;;  %v1431_v20 = vadd.f32 %v1430_v11, %v2716_v14 }
 0x32a   : > { %1501 = vst [vmem:[%s2722_s29 + $0x130] sm:$0xff] %v1342_v24 }
 0x32b   : > { %1502 = vst [vmem:[%s2722_s29 + $0x138] sm:$0xff] %v1431_v20 }
 0x32f   : > { %v1344_v26 = vpop.f32.mrf.mxu0  ;;  %v1433_v27 = vpop.f32.mrf.mxu1 }
 0x330   : > { %v1345_v52 = vadd.f32 %v1344_v26, %v2714_v13  ;;  %v1434_v58 = vadd.f32 %v1433_v27, %v2716_v14 }
 0x332   : > { %1503 = vst [vmem:[%s2722_s29 + $0x140] sm:$0xff] %v1345_v52 }
 0x333   : > { %1504 = vst [vmem:[%s2722_s29 + $0x148] sm:$0xff] %v1434_v58 }
 0x337   : > { %v1346_v63 = vpop.f32.mrf.mxu0  ;;  %v1435_v28 = vpop.f32.mrf.mxu1 }
 0x338   : > { %v1347_v29 = vadd.f32 %v1346_v63, %v2714_v13  ;;  %v1436_v53 = vadd.f32 %v1435_v28, %v2716_v14 }
 0x33a   : > { %1505 = vst [vmem:[%s2722_s29 + $0x150] sm:$0xff] %v1347_v29 }
 0x33b   : > { %1506 = vst [vmem:[%s2722_s29 + $0x158] sm:$0xff] %v1436_v53 }
 0x33f   : > { %v1349_v0 = vpop.f32.mrf.mxu0  ;;  %v1438_v30 = vpop.f32.mrf.mxu1 }
 0x340   : > { %v1350_v31 = vadd.f32 %v1349_v0, %v2714_v13  ;;  %v1439_v33 = vadd.f32 %v1438_v30, %v2716_v14 }
 0x342   : > { %1507 = vst [vmem:[%s2722_s29 + $0x160] sm:$0xff] %v1350_v31 }
 0x343   : > { %1508 = vst [vmem:[%s2722_s29 + $0x168] sm:$0xff] %v1439_v33 }
 0x347   : > { %v1351_v35 = vpop.f32.mrf.mxu0  ;;  %v1440_v36 = vpop.f32.mrf.mxu1 }
 0x348   : > { %v1352_v37 = vadd.f32 %v1351_v35, %v2714_v13  ;;  %v1441_v38 = vadd.f32 %v1440_v36, %v2716_v14 }
 0x34a   : > { %1509 = vst [vmem:[%s2722_s29 + $0x170] sm:$0xff] %v1352_v37 }
 0x34b   : > { %1510 = vst [vmem:[%s2722_s29 + $0x178] sm:$0xff] %v1441_v38 }
 0x34f   : > { %v1354_v40 = vpop.f32.mrf.mxu0  ;;  %v1443_v42 = vpop.f32.mrf.mxu1 }
 0x350   : > { %v1355_v43 = vadd.f32 %v1354_v40, %v2714_v13  ;;  %v1444_v44 = vadd.f32 %v1443_v42, %v2716_v14 }
 0x352   : > { %1511 = vst [vmem:[%s2722_s29 + $0x180] sm:$0xff] %v1355_v43 }
 0x353   : > { %1512 = vst [vmem:[%s2722_s29 + $0x188] sm:$0xff] %v1444_v44 }
 0x357   : > { %v1356_v46 = vpop.f32.mrf.mxu0  ;;  %v1445_v47 = vpop.f32.mrf.mxu1 }
 0x358   : > { %v1357_v25 = vadd.f32 %v1356_v46, %v2714_v13  ;;  %v1446_v34 = vadd.f32 %v1445_v47, %v2716_v14 }
 0x35a   : > { %1513 = vst [vmem:[%s2722_s29 + $0x190] sm:$0xff] %v1357_v25 }
 0x35b   : > { %1514 = vst [vmem:[%s2722_s29 + $0x198] sm:$0xff] %v1446_v34 }
 0x35f   : > { %v1359_v49 = vpop.f32.mrf.mxu0  ;;  %v1448_v10 = vpop.f32.mrf.mxu1 }
 0x360   : > { %v1360_v21 = vadd.f32 %v1359_v49, %v2714_v13  ;;  %v1449_v50 = vadd.f32 %v1448_v10, %v2716_v14 }
 0x362   : > { %1515 = vst [vmem:[%s2722_s29 + $0x1a0] sm:$0xff] %v1360_v21 }
 0x363   : > { %1516 = vst [vmem:[%s2722_s29 + $0x1a8] sm:$0xff] %v1449_v50 }
 0x367   : > { %v1361_v51 = vpop.f32.mrf.mxu0  ;;  %v1450_v54 = vpop.f32.mrf.mxu1 }
 0x368   : > { %v1362_v55 = vadd.f32 %v1361_v51, %v2714_v13  ;;  %v1451_v56 = vadd.f32 %v1450_v54, %v2716_v14 }
 0x36a   : > { %1517 = vst [vmem:[%s2722_s29 + $0x1b0] sm:$0xff] %v1362_v55 }
 0x36b   : > { %1518 = vst [vmem:[%s2722_s29 + $0x1b8] sm:$0xff] %v1451_v56 }
 0x36f   : > { %v1364_v57 = vpop.f32.mrf.mxu0  ;;  %v1453_v59 = vpop.f32.mrf.mxu1 }
 0x370   : > { %v1365_v60 = vadd.f32 %v1364_v57, %v2714_v13  ;;  %v1454_v62 = vadd.f32 %v1453_v59, %v2716_v14 }
 0x372   : > { %1519 = vst [vmem:[%s2722_s29 + $0x1c0] sm:$0xff] %v1365_v60 }
 0x373   : > { %1520 = vst [vmem:[%s2722_s29 + $0x1c8] sm:$0xff] %v1454_v62 }
 0x377   : > { %v1366_v1 = vpop.f32.mrf.mxu0  ;;  %v1455_v2 = vpop.f32.mrf.mxu1 }
 0x378   : > { %v1367_v3 = vadd.f32 %v1366_v1, %v2714_v13  ;;  %v1456_v4 = vadd.f32 %v1455_v2, %v2716_v14 }
 0x37a   : > { %1521 = vst [vmem:[%s2722_s29 + $0x1d0] sm:$0xff] %v1367_v3 }
 0x37b   : > { %1522 = vst [vmem:[%s2722_s29 + $0x1d8] sm:$0xff] %v1456_v4 }
 0x37f   : > { %v1369_v5 = vpop.f32.mrf.mxu0  ;;  %v1458_v7 = vpop.f32.mrf.mxu1 }
 0x380   : > { %v1370_v8 = vadd.f32 %v1369_v5, %v2714_v13  ;;  %v1459_v45 = vadd.f32 %v1458_v7, %v2716_v14 }
 0x382   : > { %1523 = vst [vmem:[%s2722_s29 + $0x1e0] sm:$0xff] %v1370_v8 }
 0x383   : > { %1524 = vst [vmem:[%s2722_s29 + $0x1e8] sm:$0xff] %v1459_v45 }
 0x387   : > { %v1371_v61 = vpop.f32.mrf.mxu0  ;;  %v1460_v39 = vpop.f32.mrf.mxu1 }
 0x388   : > { %v1372_v32 = vadd.f32 %v1371_v61, %v2714_v13  ;;  %v1461_v41 = vadd.f32 %v1460_v39, %v2716_v14 }
 0x38a   : > { %1525 = vst [vmem:[%s2722_s29 + $0x1f0] sm:$0xff] %v1372_v32 }
 0x38b   : > { %1526 = vst [vmem:[%s2722_s29 + $0x1f8] sm:$0xff] %v1461_v41 }
 0x38c   : > { %2266 = shalt.err (!%p2263_p9)
}
 0x38d   : > { %s2330_s14 = smov 256   ;;  %s2331_s8 = smov 16  }
 0x38e   : > { %1973 = dma.vmem_to_hbm [thread:$0]  (%p2457_p0), %s1542_s18, 8192, %s1544_s7, %s1528_s28, %s2330_s14, %s2330_s14, %s2331_s8  }
 0x38f PF: > { %s1558_s29 = sand.u32 1, %s2305_s21   ;;  %p2914_p10 = scmp.ge.s32.totalorder %s2317_s24, 2 }
 0x390   : > { %s1559_s11 = scalar_lea.sflag [#allocation4], %s1558_s29 }
 0x391   : > { %p1996_p11 = pnand %p2914_p10, %p2463_p6 }
 0x393   : > { %p1997_p12 = pneg %p1996_p11 }
 0x395   : > { %2300 = dma.done.wait (%p1997_p12), %s1559_s11, 8192  }
 0x396   : > { %2302 = vsyncadd (%p1997_p12), %s1559_s11, 4294959104  ;;  %p22_p2 = scmp.ge.s32.totalorder %s2433_s17, 4   ;;  %s2915_s21 = smov %s2309_s22 }
 0x397   : > { %s2916_s22 = smov %s2313_s23  ;;  %s2917_s23 = smov %s2445_s20 }
 0x398   : > { %s2918_s24 = smov %s2433_s17  ;;  %24 = sbr.rel (!%p22_p2) target bundleno = 10 (0xa), region = 110 }
 0x39d   :  { %1565 = vsyncpa [#allocation3], 1 }
 0x39e   :  { %1567 = vsyncpa [#allocation3 + $0x1], 1 }
 0x39f   :  { %1568 = vsyncpa [#allocation6], 1 }
 0x3a0   :  { %1569 = vsyncpa [#allocation9], 1 }
 0x3a1   :  { %1570 = vsyncpa [#allocation12], 1 }
 0x3a2   :  { %1571 = vsyncpa [#allocation4], 1 }
 0x3a3   :  { %1573 = vsyncpa [#allocation4 + $0x1], 1 }

</bundles_post_ra>
